<compile_context>
chip_gen: v6e
topology: v6e:2x2x1
jax: 0.10.0
libtpu: 0.0.40
codegen_flags: <defaults>
</compile_context>

<pallas_src>
import functools

import jax
import jax.numpy as jnp
from jax.experimental import pallas as pl
from jax.experimental.pallas import tpu as pltpu


_PRED_LANES = 128          # lane-dense padded width of the fused `pred` output
_CHUNK_ROWS_TARGET = 256   # target M rows of the packed-K 3x3 matmul per chunk
_NEG_SLOPE = 0.1           # LeakyReLU slope of the Conv blocks

_vmem_limit_cache = [None]


def _vmem_limit_bytes():
    """Generation-aware scoped-VMEM limit (~100 MiB on v5e/v6e, ~48 MiB on v7x)."""
    if _vmem_limit_cache[0] is None:
        try:
            cap = int(getattr(pltpu.get_tpu_info(), "vmem_capacity_bytes",
                              64 * 1024 * 1024))
        except Exception:            # no TPU info -> conservative v7x ceiling
            cap = 64 * 1024 * 1024
        _vmem_limit_cache[0] = max(32 * 1024 * 1024,
                                   min(cap - 16 * 1024 * 1024, 100 * 1024 * 1024))
    return _vmem_limit_cache[0]


def _compiler_params():
    return pltpu.CompilerParams(
        dimension_semantics=("parallel",),          # batch axis -> megacore / v7x TCs
        vmem_limit_bytes=_vmem_limit_bytes(),
    )


def _row_chunk(h, w):
    return max(1, min(h, -(-_CHUNK_ROWS_TARGET // w)))


# ----------------------------------------------------------------------------
# In-kernel fused block:  1x1 conv + LeakyReLU  ->  3x3 conv (pad=1) + LeakyReLU
#                         [-> fused 1x1 `pred`]
# Operates on ONE image whose spatial dims are flattened: x_ref is (H*W, Cin).
# ----------------------------------------------------------------------------
def _block_compute(x_ref, w1_ref, b1_ref, w3_ref, b3_ref, pw_ref, pb_ref,
                   out_ref, y1_ref, pad_ref, *, H, W, th, neg_slope):
    wp2 = W + 2                                   # padded flat width

    # ---- fused 1x1 prologue: one whole-image matmul, never leaves VMEM ----
    y1 = jnp.dot(x_ref[...], w1_ref[...], preferred_element_type=jnp.float32)
    y1 = y1 + b1_ref[...]
    y1_ref[...] = jnp.where(y1 > 0, y1, neg_slope * y1).astype(y1_ref.dtype)

    # ---- build the zero-padded halo layout entirely in VMEM (no HBM pad pass) ----
    pad_ref[...] = jnp.zeros_like(pad_ref)
    for h in range(H):                            # static offsets -> clean lowering
        dst = (h + 1) * wp2 + 1
        pad_ref[dst:dst + W, :] = y1_ref[h * W:(h + 1) * W, :]

    # ---- 3x3 as a packed im2col matmul (K = 9*Chalf) per row chunk ----
    b3 = b3_ref[...]                              # hoisted out of the chunk loop
    if pw_ref is not None:
        pw = pw_ref[...]
        pb = pb_ref[...]
    for h0 in range(0, H, th):
        nrows = min(th, H - h0)
        rows = []
        for r in range(nrows):
            base = h0 + r
            taps = [pad_ref[(base + kh) * wp2 + kw:(base + kh) * wp2 + kw + W, :]
                    for kh in range(3) for kw in range(3)]
            rows.append(jnp.concatenate(taps, axis=1))      # (W, 9*Chalf)
        lhs = rows[0] if len(rows) == 1 else jnp.concatenate(rows, axis=0)
        y3 = jnp.dot(lhs, w3_ref[...], preferred_element_type=jnp.float32) + b3
        y3 = jnp.where(y3 > 0, y3, neg_slope * y3)
        if pw_ref is not None:                    # fused `pred` 1x1 epilogue
            y3 = jnp.dot(y3.astype(jnp.bfloat16), pw,
                         preferred_element_type=jnp.float32) + pb
        q0 = h0 * W                               # junk-free output rows
        out_ref[q0:q0 + nrows * W, :] = y3.astype(out_ref.dtype)


def _head_kernel(x_ref, w1a, b1a, w3a, b3a, w1b, b1b, w3b, b3b, pw, pb, o_ref,
                 y1_s, pad_s, mid_s, *, H, W, th, neg_slope):
    """Whole head in one kernel: block A -> VMEM scratch -> block B (+pred)."""
    _block_compute(x_ref, w1a, b1a, w3a, b3a, None, None, mid_s, y1_s, pad_s,
                   H=H, W=W, th=th, neg_slope=neg_slope)
    _block_compute(mid_s, w1b, b1b, w3b, b3b, pw, pb, o_ref, y1_s, pad_s,
                   H=H, W=W, th=th, neg_slope=neg_slope)


def _block_kernel(*refs, H, W, th, neg_slope, has_pred):
    """One fused block as a standalone pallas_call body (fallback path)."""
    if has_pred:
        x, w1, b1, w3, b3, pw, pb, o, y1_s, pad_s = refs
    else:
        x, w1, b1, w3, b3, o, y1_s, pad_s = refs
        pw = pb = None
    _block_compute(x, w1, b1, w3, b3, pw, pb, o, y1_s, pad_s,
                   H=H, W=W, th=th, neg_slope=neg_slope)


# ----------------------------------------------------------------------------
# pallas_call wrappers
# ----------------------------------------------------------------------------
def _fused_head_call(x_flat, prep, *, H, W):
    n, q, feat = x_flat.shape
    half = prep["c1a_w"].shape[1]
    p_lanes = prep["pred_w"].shape[1]
    qin = (H + 2) * (W + 2)
    th = _row_chunk(H, W)
    kernel = functools.partial(_head_kernel, H=H, W=W, th=th, neg_slope=_NEG_SLOPE)
    in_specs = [
        pl.BlockSpec((None, q, feat), lambda i: (i, 0, 0)),   # one image per step
        pl.BlockSpec((feat, half), lambda i: (0, 0)),         # weights resident
        pl.BlockSpec((1, half), lambda i: (0, 0)),
        pl.BlockSpec((9 * half, feat), lambda i: (0, 0)),
        pl.BlockSpec((1, feat), lambda i: (0, 0)),
        pl.BlockSpec((feat, half), lambda i: (0, 0)),
        pl.BlockSpec((1, half), lambda i: (0, 0)),
        pl.BlockSpec((9 * half, feat), lambda i: (0, 0)),
        pl.BlockSpec((1, feat), lambda i: (0, 0)),
        pl.BlockSpec((feat, p_lanes), lambda i: (0, 0)),
        pl.BlockSpec((1, p_lanes), lambda i: (0, 0)),
    ]
    return pl.pallas_call(
        kernel,
        out_shape=jax.ShapeDtypeStruct((n, q, p_lanes), jnp.float32),
        grid=(n,),
        in_specs=in_specs,
        out_specs=pl.BlockSpec((None, q, p_lanes), lambda i: (i, 0, 0)),
        scratch_shapes=[pltpu.VMEM((q, half), jnp.bfloat16),    # 1x1 output
                        pltpu.VMEM((qin, half), jnp.bfloat16),  # padded halo layout
                        pltpu.VMEM((q, feat), jnp.bfloat16)],   # inter-block activ.
        compiler_params=_compiler_params(),
    )(x_flat, prep["c1a_w"], prep["c1a_b"], prep["c3a_w"], prep["c3a_b"],
      prep["c1b_w"], prep["c1b_b"], prep["c3b_w"], prep["c3b_b"],
      prep["pred_w"], prep["pred_b"])


def _fused_block_call(x_flat, w1, b1, w3, b3, *, H, W, pred_w=None, pred_b=None,
                      out_dtype=jnp.bfloat16):
    n, q, cin = x_flat.shape
    half = w1.shape[1]
    cout = w3.shape[1]
    has_pred = pred_w is not None
    c_last = pred_w.shape[1] if has_pred else cout
    qin = (H + 2) * (W + 2)
    th = _row_chunk(H, W)
    kernel = functools.partial(_block_kernel, H=H, W=W, th=th,
                               neg_slope=_NEG_SLOPE, has_pred=has_pred)
    in_specs = [
        pl.BlockSpec((None, q, cin), lambda i: (i, 0, 0)),
        pl.BlockSpec((cin, half), lambda i: (0, 0)),
        pl.BlockSpec((1, half), lambda i: (0, 0)),
        pl.BlockSpec((9 * half, cout), lambda i: (0, 0)),
        pl.BlockSpec((1, cout), lambda i: (0, 0)),
    ]
    args = [x_flat, w1, b1, w3, b3]
    if has_pred:
        in_specs += [pl.BlockSpec((cout, c_last), lambda i: (0, 0)),
                     pl.BlockSpec((1, c_last), lambda i: (0, 0))]
        args += [pred_w, pred_b]
    return pl.pallas_call(
        kernel,
        out_shape=jax.ShapeDtypeStruct((n, q, c_last), out_dtype),
        grid=(n,),
        in_specs=in_specs,
        out_specs=pl.BlockSpec((None, q, c_last), lambda i: (i, 0, 0)),
        scratch_shapes=[pltpu.VMEM((q, half), jnp.bfloat16),
                        pltpu.VMEM((qin, half), jnp.bfloat16)],
        compiler_params=_compiler_params(),
    )(*args)


# ----------------------------------------------------------------------------
# Parameters: init, BN folding, one-time inference preparation
# ----------------------------------------------------------------------------
def fold_bn(w, b, gamma, beta, mean, var, eps=1e-5):
    scale = gamma / jnp.sqrt(var + eps)
    return w * scale[:, None, None, None], (b - mean) * scale + beta


def init_conv_block_params(key, cin, cout, k):
    kw_, kb_, kg_, kbe_, km_, kv_ = jax.random.split(key, 6)
    return dict(
        w=0.05 * jax.random.normal(kw_, (cout, cin, k, k), jnp.float32),
        b=0.05 * jax.random.normal(kb_, (cout,), jnp.float32),
        gamma=1.0 + 0.1 * jax.random.normal(kg_, (cout,), jnp.float32),
        beta=0.1 * jax.random.normal(kbe_, (cout,), jnp.float32),
        mean=0.1 * jax.random.normal(km_, (cout,), jnp.float32),
        var=0.5 + jax.random.uniform(kv_, (cout,), jnp.float32),
        k=k)


def make_head_params(key, feat_dim, num_classes):
    keys = jax.random.split(key, 6)
    half = feat_dim // 2
    blocks = [
        init_conv_block_params(keys[0], feat_dim, half, 1),
        init_conv_block_params(keys[1], half, feat_dim, 3),
        init_conv_block_params(keys[2], feat_dim, half, 1),
        init_conv_block_params(keys[3], half, feat_dim, 3),
    ]
    pred_out = 1 + num_classes + 4
    pred_w = 0.05 * jax.random.normal(keys[4], (pred_out, feat_dim, 1, 1), jnp.float32)
    bias_value = -jnp.log(jnp.asarray((1.0 - 0.01) / 0.01, jnp.float32))
    pred_b = 0.05 * jax.random.normal(keys[5], (pred_out,), jnp.float32)
    pred_b = pred_b.at[:1 + num_classes].set(bias_value)   # init_bias()
    return dict(blocks=blocks, pred_w=pred_w, pred_b=pred_b)


def prepare_head_params(params):
    """Fold BN and build bf16 matmul-ready weights once (outside the forward)."""
    def conv1(p):
        w, b = fold_bn(p["w"], p["b"], p["gamma"], p["beta"], p["mean"], p["var"])
        return (w[:, :, 0, 0].T.astype(jnp.bfloat16),              # (Cin, Cout)
                b.reshape(1, -1).astype(jnp.float32))

    def conv3(p):
        w, b = fold_bn(p["w"], p["b"], p["gamma"], p["beta"], p["mean"], p["var"])
        cout, cin = w.shape[0], w.shape[1]
        # stacked (9*Cin, Cout); tap order kh-major / kw-minor matches the kernel
        w9 = jnp.transpose(w, (2, 3, 1, 0)).reshape(9 * cin, cout)
        return w9.astype(jnp.bfloat16), b.reshape(1, -1).astype(jnp.float32)

    blocks = params["blocks"]
    c1a_w, c1a_b = conv1(blocks[0])
    c3a_w, c3a_b = conv3(blocks[1])
    c1b_w, c1b_b = conv1(blocks[2])
    c3b_w, c3b_b = conv3(blocks[3])

    pred_out, feat = params["pred_w"].shape[:2]
    pw = params["pred_w"][:, :, 0, 0].T                            # (feat, pred_out)
    pw_pad = jnp.zeros((feat, _PRED_LANES), jnp.float32).at[:, :pred_out].set(pw)
    pb_pad = jnp.zeros((1, _PRED_LANES), jnp.float32).at[:, :pred_out].set(
        params["pred_b"][None, :])
    return dict(c1a_w=c1a_w, c1a_b=c1a_b, c3a_w=c3a_w, c3a_b=c3a_b,
                c1b_w=c1b_w, c1b_b=c1b_b, c3b_w=c3b_w, c3b_b=c3b_b,
                pred_w=pw_pad.astype(jnp.bfloat16), pred_b=pb_pad)


# ----------------------------------------------------------------------------
# Forward pass
# ----------------------------------------------------------------------------
@functools.partial(jax.jit, static_argnames=("num_classes",))
def head_forward(prep, x_nchw, *, num_classes):
    pred_out = 1 + num_classes + 4
    n, feat, h, w = x_nchw.shape
    q = h * w
    half = feat // 2
    # NCHW -> NHWC -> (N, H*W, C): single layout pass, done in bf16.
    x = jnp.transpose(x_nchw.astype(jnp.bfloat16), (0, 2, 3, 1)).reshape(n, q, feat)

    # Rough per-grid-step VMEM footprint (double-buffered I/O + weights + scratch).
    est = (2 * q * feat * 2 + 2 * q * _PRED_LANES * 4
           + q * feat * 2 + 2 * (q * half * 2 + (h + 2) * (w + 2) * half * 2)
           + 2 * (feat * half + 9 * half * feat) * 2 + feat * _PRED_LANES * 2)

    if est <= int(0.6 * _vmem_limit_bytes()):
        # Whole head fused into one pallas_call: no intermediate HBM traffic.
        p = _fused_head_call(x, prep, H=h, W=w)
    else:
        # TODO(synk): add a spatial row-tile grid axis (halo rows via manual
        # async copies) for feature maps too large for whole-image-per-step on
        # v7x's 64 MiB VMEM; for now fall back to two fused 1x1+3x3 calls.
        y = _fused_block_call(x, prep["c1a_w"], prep["c1a_b"],
                              prep["c3a_w"], prep["c3a_b"], H=h, W=w,
                              out_dtype=jnp.bfloat16)
        p = _fused_block_call(y, prep["c1b_w"], prep["c1b_b"],
                              prep["c3b_w"], prep["c3b_b"], H=h, W=w,
                              pred_w=prep["pred_w"], pred_b=prep["pred_b"],
                              out_dtype=jnp.float32)

    p = p[..., :pred_out].reshape(n, h, w, pred_out)     # drop lane padding
    return jnp.transpose(p, (0, 3, 1, 2))                # NHWC -> NCHW


def reference_forward(params, x_nchw, num_classes):
    """Pure-JAX f32 reference (lax.conv) for a loose numerical check."""
    del num_classes
    x = jnp.transpose(x_nchw, (0, 2, 3, 1))

    def conv_block(x, p):
        w, b = fold_bn(p["w"], p["b"], p["gamma"], p["beta"], p["mean"], p["var"])
        w_hwio = jnp.transpose(w, (2, 3, 1, 0))
        pad = "SAME" if p["k"] == 3 else "VALID"
        y = jax.lax.conv_general_dilated(
            x, w_hwio, (1, 1), pad,
            dimension_numbers=("NHWC", "HWIO", "NHWC")) + b
        return jnp.where(y > 0, y, _NEG_SLOPE * y)

    for p in params["blocks"]:
        x = conv_block(x, p)
    pw = jnp.transpose(params["pred_w"], (2, 3, 1, 0))
    y = jax.lax.conv_general_dilated(
        x, pw, (1, 1), "VALID",
        dimension_numbers=("NHWC", "HWIO", "NHWC")) + params["pred_b"]
    return jnp.transpose(y, (0, 3, 1, 2))


if __name__ == "__main__":
    feat_dim = 32
    num_classes = 4
    batch, height, width = 2, 8, 8

    key = jax.random.PRNGKey(0)
    k_param, k_x = jax.random.split(key)
    params = make_head_params(k_param, feat_dim, num_classes)
    prep = prepare_head_params(params)
    x = jax.random.normal(k_x, (batch, feat_dim, height, width), jnp.float32)

    out = head_forward(prep, x, num_classes=num_classes)
    out = jax.block_until_ready(out)
    assert out.shape == (batch, 1 + num_classes + 4, height, width), out.shape
    assert bool(jnp.all(jnp.isfinite(out)))

    # Loose check vs pure-JAX f32 reference (kernel path uses bf16 MXU inputs).
    ref = reference_forward(params, x, num_classes)
    max_err = float(jnp.max(jnp.abs(out - ref)))
    assert bool(jnp.allclose(out, ref, atol=1e-1, rtol=1e-1)), max_err

    print("KERNEL_OK")
</pallas_src>

<mosaic_0001>
module attributes {stable_mosaic.version = 11 : i64} {
  func.func @_head_kernel(%arg0: i32, %arg1: memref<1x64x32xbf16, #tpu.memory_space<vmem>>, %arg2: memref<32x16xbf16, #tpu.memory_space<vmem>>, %arg3: memref<1x16xf32, #tpu.memory_space<vmem>>, %arg4: memref<144x32xbf16, #tpu.memory_space<vmem>>, %arg5: memref<1x32xf32, #tpu.memory_space<vmem>>, %arg6: memref<32x16xbf16, #tpu.memory_space<vmem>>, %arg7: memref<1x16xf32, #tpu.memory_space<vmem>>, %arg8: memref<144x32xbf16, #tpu.memory_space<vmem>>, %arg9: memref<1x32xf32, #tpu.memory_space<vmem>>, %arg10: memref<32x128xbf16, #tpu.memory_space<vmem>>, %arg11: memref<1x128xf32, #tpu.memory_space<vmem>>, %arg12: memref<1x64x128xf32, #tpu.memory_space<vmem>>, %arg13: memref<64x16xbf16, #tpu.memory_space<vmem>>, %arg14: memref<100x16xbf16, #tpu.memory_space<vmem>>, %arg15: memref<64x32xbf16, #tpu.memory_space<vmem>>) attributes {dimension_semantics = [#tpu.dimension_semantics<parallel>], iteration_bounds = array<i64: 2>, scalar_prefetch = 0 : i64, scratch_operands = 3 : i64, tpu.core_type = #tpu.core_type<tc>, window_params = [{transform_indices = @transform_0, window_bounds = array<i64: 1, 64, 32>}, {pipeline_mode = #tpu.pipeline_mode<synchronous>, transform_indices = @transform_1, window_bounds = array<i64: 32, 16>}, {pipeline_mode = #tpu.pipeline_mode<synchronous>, transform_indices = @transform_2, window_bounds = array<i64: 1, 16>}, {pipeline_mode = #tpu.pipeline_mode<synchronous>, transform_indices = @transform_3, window_bounds = array<i64: 144, 32>}, {pipeline_mode = #tpu.pipeline_mode<synchronous>, transform_indices = @transform_4, window_bounds = array<i64: 1, 32>}, {pipeline_mode = #tpu.pipeline_mode<synchronous>, transform_indices = @transform_5, window_bounds = array<i64: 32, 16>}, {pipeline_mode = #tpu.pipeline_mode<synchronous>, transform_indices = @transform_6, window_bounds = array<i64: 1, 16>}, {pipeline_mode = #tpu.pipeline_mode<synchronous>, transform_indices = @transform_7, window_bounds = array<i64: 144, 32>}, {pipeline_mode = #tpu.pipeline_mode<synchronous>, transform_indices = @transform_8, window_bounds = array<i64: 1, 32>}, {pipeline_mode = #tpu.pipeline_mode<synchronous>, transform_indices = @transform_9, window_bounds = array<i64: 32, 128>}, {pipeline_mode = #tpu.pipeline_mode<synchronous>, transform_indices = @transform_10, window_bounds = array<i64: 1, 128>}, {transform_indices = @transform_11, window_bounds = array<i64: 1, 64, 128>}]} {
    %c0 = arith.constant 0 : index
    %c0_0 = arith.constant 0 : index
    %c0_1 = arith.constant 0 : index
    %0 = vector.load %arg1[%c0, %c0_0, %c0_1] : memref<1x64x32xbf16, #tpu.memory_space<vmem>>, vector<1x64x32xbf16>
    %1 = vector.shape_cast %0 : vector<1x64x32xbf16> to vector<64x32xbf16>
    %c0_2 = arith.constant 0 : index
    %c0_3 = arith.constant 0 : index
    %2 = vector.load %arg2[%c0_2, %c0_3] : memref<32x16xbf16, #tpu.memory_space<vmem>>, vector<32x16xbf16>
    %cst = arith.constant dense<0.000000e+00> : vector<64x16xf32>
    %3 = tpu.matmul %1, %2, %cst {dimension_numbers = #tpu.dot_dimension_numbers<[1], [0], [0], [1], [0, 0, 1, 1], [], []>} : vector<64x32xbf16>, vector<32x16xbf16>, vector<64x16xf32> -> vector<64x16xf32>
    %c0_4 = arith.constant 0 : index
    %c0_5 = arith.constant 0 : index
    %4 = vector.load %arg3[%c0_4, %c0_5] : memref<1x16xf32, #tpu.memory_space<vmem>>, vector<1x16xf32>
    %5 = vector.broadcast %4 : vector<1x16xf32> to vector<64x16xf32>
    %6 = arith.addf %3, %5 : vector<64x16xf32>
    %cst_6 = arith.constant 0.000000e+00 : f32
    %7 = vector.broadcast %cst_6 : f32 to vector<64x16xf32>
    %8 = arith.cmpf ogt, %6, %7 : vector<64x16xf32>
    %cst_7 = arith.constant 1.000000e-01 : f32
    %9 = vector.broadcast %cst_7 : f32 to vector<64x16xf32>
    %10 = arith.mulf %9, %6 : vector<64x16xf32>
    %11 = arith.select %8, %6, %10 : vector<64x16xi1>, vector<64x16xf32>
    %12 = arith.truncf %11 : vector<64x16xf32> to vector<64x16xbf16>
    %c0_8 = arith.constant 0 : index
    %c0_9 = arith.constant 0 : index
    %13 = vector.load %arg13[%c0_8, %c0_9] : memref<64x16xbf16, #tpu.memory_space<vmem>>, vector<64x16xbf16>
    tpu.vector_store %arg13[%c0_8, %c0_9], %12 {strides = array<i32>} : memref<64x16xbf16, #tpu.memory_space<vmem>>, vector<64x16xbf16>,
    %cst_10 = arith.constant 0.000000e+00 : bf16
    %14 = vector.broadcast %cst_10 : bf16 to vector<100x16xbf16>
    %c0_11 = arith.constant 0 : index
    %c0_12 = arith.constant 0 : index
    %15 = vector.load %arg14[%c0_11, %c0_12] : memref<100x16xbf16, #tpu.memory_space<vmem>>, vector<100x16xbf16>
    tpu.vector_store %arg14[%c0_11, %c0_12], %14 {strides = array<i32>} : memref<100x16xbf16, #tpu.memory_space<vmem>>, vector<100x16xbf16>,
    %c0_13 = arith.constant 0 : index
    %c0_14 = arith.constant 0 : index
    %16 = vector.load %arg13[%c0_13, %c0_14] : memref<64x16xbf16, #tpu.memory_space<vmem>>, vector<8x16xbf16>
    %c11 = arith.constant 11 : index
    %c0_15 = arith.constant 0 : index
    %17 = vector.load %arg14[%c11, %c0_15] : memref<100x16xbf16, #tpu.memory_space<vmem>>, vector<8x16xbf16>
    tpu.vector_store %arg14[%c11, %c0_15], %16 {strides = array<i32>} : memref<100x16xbf16, #tpu.memory_space<vmem>>, vector<8x16xbf16>,
    %c8 = arith.constant 8 : index
    %c0_16 = arith.constant 0 : index
    %18 = vector.load %arg13[%c8, %c0_16] : memref<64x16xbf16, #tpu.memory_space<vmem>>, vector<8x16xbf16>
    %c21 = arith.constant 21 : index
    %c0_17 = arith.constant 0 : index
    %19 = vector.load %arg14[%c21, %c0_17] : memref<100x16xbf16, #tpu.memory_space<vmem>>, vector<8x16xbf16>
    tpu.vector_store %arg14[%c21, %c0_17], %18 {strides = array<i32>} : memref<100x16xbf16, #tpu.memory_space<vmem>>, vector<8x16xbf16>,
    %c16 = arith.constant 16 : index
    %c0_18 = arith.constant 0 : index
    %20 = vector.load %arg13[%c16, %c0_18] : memref<64x16xbf16, #tpu.memory_space<vmem>>, vector<8x16xbf16>
    %c31 = arith.constant 31 : index
    %c0_19 = arith.constant 0 : index
    %21 = vector.load %arg14[%c31, %c0_19] : memref<100x16xbf16, #tpu.memory_space<vmem>>, vector<8x16xbf16>
    tpu.vector_store %arg14[%c31, %c0_19], %20 {strides = array<i32>} : memref<100x16xbf16, #tpu.memory_space<vmem>>, vector<8x16xbf16>,
    %c24 = arith.constant 24 : index
    %c0_20 = arith.constant 0 : index
    %22 = vector.load %arg13[%c24, %c0_20] : memref<64x16xbf16, #tpu.memory_space<vmem>>, vector<8x16xbf16>
    %c41 = arith.constant 41 : index
    %c0_21 = arith.constant 0 : index
    %23 = vector.load %arg14[%c41, %c0_21] : memref<100x16xbf16, #tpu.memory_space<vmem>>, vector<8x16xbf16>
    tpu.vector_store %arg14[%c41, %c0_21], %22 {strides = array<i32>} : memref<100x16xbf16, #tpu.memory_space<vmem>>, vector<8x16xbf16>,
    %c32 = arith.constant 32 : index
    %c0_22 = arith.constant 0 : index
    %24 = vector.load %arg13[%c32, %c0_22] : memref<64x16xbf16, #tpu.memory_space<vmem>>, vector<8x16xbf16>
    %c51 = arith.constant 51 : index
    %c0_23 = arith.constant 0 : index
    %25 = vector.load %arg14[%c51, %c0_23] : memref<100x16xbf16, #tpu.memory_space<vmem>>, vector<8x16xbf16>
    tpu.vector_store %arg14[%c51, %c0_23], %24 {strides = array<i32>} : memref<100x16xbf16, #tpu.memory_space<vmem>>, vector<8x16xbf16>,
    %c40 = arith.constant 40 : index
    %c0_24 = arith.constant 0 : index
    %26 = vector.load %arg13[%c40, %c0_24] : memref<64x16xbf16, #tpu.memory_space<vmem>>, vector<8x16xbf16>
    %c61 = arith.constant 61 : index
    %c0_25 = arith.constant 0 : index
    %27 = vector.load %arg14[%c61, %c0_25] : memref<100x16xbf16, #tpu.memory_space<vmem>>, vector<8x16xbf16>
    tpu.vector_store %arg14[%c61, %c0_25], %26 {strides = array<i32>} : memref<100x16xbf16, #tpu.memory_space<vmem>>, vector<8x16xbf16>,
    %c48 = arith.constant 48 : index
    %c0_26 = arith.constant 0 : index
    %28 = vector.load %arg13[%c48, %c0_26] : memref<64x16xbf16, #tpu.memory_space<vmem>>, vector<8x16xbf16>
    %c71 = arith.constant 71 : index
    %c0_27 = arith.constant 0 : index
    %29 = vector.load %arg14[%c71, %c0_27] : memref<100x16xbf16, #tpu.memory_space<vmem>>, vector<8x16xbf16>
    tpu.vector_store %arg14[%c71, %c0_27], %28 {strides = array<i32>} : memref<100x16xbf16, #tpu.memory_space<vmem>>, vector<8x16xbf16>,
    %c56 = arith.constant 56 : index
    %c0_28 = arith.constant 0 : index
    %30 = vector.load %arg13[%c56, %c0_28] : memref<64x16xbf16, #tpu.memory_space<vmem>>, vector<8x16xbf16>
    %c81 = arith.constant 81 : index
    %c0_29 = arith.constant 0 : index
    %31 = vector.load %arg14[%c81, %c0_29] : memref<100x16xbf16, #tpu.memory_space<vmem>>, vector<8x16xbf16>
    tpu.vector_store %arg14[%c81, %c0_29], %30 {strides = array<i32>} : memref<100x16xbf16, #tpu.memory_space<vmem>>, vector<8x16xbf16>,
    %c0_30 = arith.constant 0 : index
    %c0_31 = arith.constant 0 : index
    %32 = vector.load %arg5[%c0_30, %c0_31] : memref<1x32xf32, #tpu.memory_space<vmem>>, vector<1x32xf32>
    %c0_32 = arith.constant 0 : index
    %c0_33 = arith.constant 0 : index
    %33 = vector.load %arg14[%c0_32, %c0_33] : memref<100x16xbf16, #tpu.memory_space<vmem>>, vector<8x16xbf16>
    %c1 = arith.constant 1 : index
    %c0_34 = arith.constant 0 : index
    %34 = vector.load %arg14[%c1, %c0_34] : memref<100x16xbf16, #tpu.memory_space<vmem>>, vector<8x16xbf16>
    %c2 = arith.constant 2 : index
    %c0_35 = arith.constant 0 : index
    %35 = vector.load %arg14[%c2, %c0_35] : memref<100x16xbf16, #tpu.memory_space<vmem>>, vector<8x16xbf16>
    %c10 = arith.constant 10 : index
    %c0_36 = arith.constant 0 : index
    %36 = vector.load %arg14[%c10, %c0_36] : memref<100x16xbf16, #tpu.memory_space<vmem>>, vector<8x16xbf16>
    %c11_37 = arith.constant 11 : index
    %c0_38 = arith.constant 0 : index
    %37 = vector.load %arg14[%c11_37, %c0_38] : memref<100x16xbf16, #tpu.memory_space<vmem>>, vector<8x16xbf16>
    %c12 = arith.constant 12 : index
    %c0_39 = arith.constant 0 : index
    %38 = vector.load %arg14[%c12, %c0_39] : memref<100x16xbf16, #tpu.memory_space<vmem>>, vector<8x16xbf16>
    %c20 = arith.constant 20 : index
    %c0_40 = arith.constant 0 : index
    %39 = vector.load %arg14[%c20, %c0_40] : memref<100x16xbf16, #tpu.memory_space<vmem>>, vector<8x16xbf16>
    %c21_41 = arith.constant 21 : index
    %c0_42 = arith.constant 0 : index
    %40 = vector.load %arg14[%c21_41, %c0_42] : memref<100x16xbf16, #tpu.memory_space<vmem>>, vector<8x16xbf16>
    %c22 = arith.constant 22 : index
    %c0_43 = arith.constant 0 : index
    %41 = vector.load %arg14[%c22, %c0_43] : memref<100x16xbf16, #tpu.memory_space<vmem>>, vector<8x16xbf16>
    %42 = tpu.concatenate %33, %34, %35, %36, %37, %38, %39, %40, %41 in 1 : vector<8x16xbf16>, vector<8x16xbf16>, vector<8x16xbf16>, vector<8x16xbf16>, vector<8x16xbf16>, vector<8x16xbf16>, vector<8x16xbf16>, vector<8x16xbf16>, vector<8x16xbf16> -> vector<8x144xbf16>
    %c10_44 = arith.constant 10 : index
    %c0_45 = arith.constant 0 : index
    %43 = vector.load %arg14[%c10_44, %c0_45] : memref<100x16xbf16, #tpu.memory_space<vmem>>, vector<8x16xbf16>
    %c11_46 = arith.constant 11 : index
    %c0_47 = arith.constant 0 : index
    %44 = vector.load %arg14[%c11_46, %c0_47] : memref<100x16xbf16, #tpu.memory_space<vmem>>, vector<8x16xbf16>
    %c12_48 = arith.constant 12 : index
    %c0_49 = arith.constant 0 : index
    %45 = vector.load %arg14[%c12_48, %c0_49] : memref<100x16xbf16, #tpu.memory_space<vmem>>, vector<8x16xbf16>
    %c20_50 = arith.constant 20 : index
    %c0_51 = arith.constant 0 : index
    %46 = vector.load %arg14[%c20_50, %c0_51] : memref<100x16xbf16, #tpu.memory_space<vmem>>, vector<8x16xbf16>
    %c21_52 = arith.constant 21 : index
    %c0_53 = arith.constant 0 : index
    %47 = vector.load %arg14[%c21_52, %c0_53] : memref<100x16xbf16, #tpu.memory_space<vmem>>, vector<8x16xbf16>
    %c22_54 = arith.constant 22 : index
    %c0_55 = arith.constant 0 : index
    %48 = vector.load %arg14[%c22_54, %c0_55] : memref<100x16xbf16, #tpu.memory_space<vmem>>, vector<8x16xbf16>
    %c30 = arith.constant 30 : index
    %c0_56 = arith.constant 0 : index
    %49 = vector.load %arg14[%c30, %c0_56] : memref<100x16xbf16, #tpu.memory_space<vmem>>, vector<8x16xbf16>
    %c31_57 = arith.constant 31 : index
    %c0_58 = arith.constant 0 : index
    %50 = vector.load %arg14[%c31_57, %c0_58] : memref<100x16xbf16, #tpu.memory_space<vmem>>, vector<8x16xbf16>
    %c32_59 = arith.constant 32 : index
    %c0_60 = arith.constant 0 : index
    %51 = vector.load %arg14[%c32_59, %c0_60] : memref<100x16xbf16, #tpu.memory_space<vmem>>, vector<8x16xbf16>
    %52 = tpu.concatenate %43, %44, %45, %46, %47, %48, %49, %50, %51 in 1 : vector<8x16xbf16>, vector<8x16xbf16>, vector<8x16xbf16>, vector<8x16xbf16>, vector<8x16xbf16>, vector<8x16xbf16>, vector<8x16xbf16>, vector<8x16xbf16>, vector<8x16xbf16> -> vector<8x144xbf16>
    %c20_61 = arith.constant 20 : index
    %c0_62 = arith.constant 0 : index
    %53 = vector.load %arg14[%c20_61, %c0_62] : memref<100x16xbf16, #tpu.memory_space<vmem>>, vector<8x16xbf16>
    %c21_63 = arith.constant 21 : index
    %c0_64 = arith.constant 0 : index
    %54 = vector.load %arg14[%c21_63, %c0_64] : memref<100x16xbf16, #tpu.memory_space<vmem>>, vector<8x16xbf16>
    %c22_65 = arith.constant 22 : index
    %c0_66 = arith.constant 0 : index
    %55 = vector.load %arg14[%c22_65, %c0_66] : memref<100x16xbf16, #tpu.memory_space<vmem>>, vector<8x16xbf16>
    %c30_67 = arith.constant 30 : index
    %c0_68 = arith.constant 0 : index
    %56 = vector.load %arg14[%c30_67, %c0_68] : memref<100x16xbf16, #tpu.memory_space<vmem>>, vector<8x16xbf16>
    %c31_69 = arith.constant 31 : index
    %c0_70 = arith.constant 0 : index
    %57 = vector.load %arg14[%c31_69, %c0_70] : memref<100x16xbf16, #tpu.memory_space<vmem>>, vector<8x16xbf16>
    %c32_71 = arith.constant 32 : index
    %c0_72 = arith.constant 0 : index
    %58 = vector.load %arg14[%c32_71, %c0_72] : memref<100x16xbf16, #tpu.memory_space<vmem>>, vector<8x16xbf16>
    %c40_73 = arith.constant 40 : index
    %c0_74 = arith.constant 0 : index
    %59 = vector.load %arg14[%c40_73, %c0_74] : memref<100x16xbf16, #tpu.memory_space<vmem>>, vector<8x16xbf16>
    %c41_75 = arith.constant 41 : index
    %c0_76 = arith.constant 0 : index
    %60 = vector.load %arg14[%c41_75, %c0_76] : memref<100x16xbf16, #tpu.memory_space<vmem>>, vector<8x16xbf16>
    %c42 = arith.constant 42 : index
    %c0_77 = arith.constant 0 : index
    %61 = vector.load %arg14[%c42, %c0_77] : memref<100x16xbf16, #tpu.memory_space<vmem>>, vector<8x16xbf16>
    %62 = tpu.concatenate %53, %54, %55, %56, %57, %58, %59, %60, %61 in 1 : vector<8x16xbf16>, vector<8x16xbf16>, vector<8x16xbf16>, vector<8x16xbf16>, vector<8x16xbf16>, vector<8x16xbf16>, vector<8x16xbf16>, vector<8x16xbf16>, vector<8x16xbf16> -> vector<8x144xbf16>
    %c30_78 = arith.constant 30 : index
    %c0_79 = arith.constant 0 : index
    %63 = vector.load %arg14[%c30_78, %c0_79] : memref<100x16xbf16, #tpu.memory_space<vmem>>, vector<8x16xbf16>
    %c31_80 = arith.constant 31 : index
    %c0_81 = arith.constant 0 : index
    %64 = vector.load %arg14[%c31_80, %c0_81] : memref<100x16xbf16, #tpu.memory_space<vmem>>, vector<8x16xbf16>
    %c32_82 = arith.constant 32 : index
    %c0_83 = arith.constant 0 : index
    %65 = vector.load %arg14[%c32_82, %c0_83] : memref<100x16xbf16, #tpu.memory_space<vmem>>, vector<8x16xbf16>
    %c40_84 = arith.constant 40 : index
    %c0_85 = arith.constant 0 : index
    %66 = vector.load %arg14[%c40_84, %c0_85] : memref<100x16xbf16, #tpu.memory_space<vmem>>, vector<8x16xbf16>
    %c41_86 = arith.constant 41 : index
    %c0_87 = arith.constant 0 : index
    %67 = vector.load %arg14[%c41_86, %c0_87] : memref<100x16xbf16, #tpu.memory_space<vmem>>, vector<8x16xbf16>
    %c42_88 = arith.constant 42 : index
    %c0_89 = arith.constant 0 : index
    %68 = vector.load %arg14[%c42_88, %c0_89] : memref<100x16xbf16, #tpu.memory_space<vmem>>, vector<8x16xbf16>
    %c50 = arith.constant 50 : index
    %c0_90 = arith.constant 0 : index
    %69 = vector.load %arg14[%c50, %c0_90] : memref<100x16xbf16, #tpu.memory_space<vmem>>, vector<8x16xbf16>
    %c51_91 = arith.constant 51 : index
    %c0_92 = arith.constant 0 : index
    %70 = vector.load %arg14[%c51_91, %c0_92] : memref<100x16xbf16, #tpu.memory_space<vmem>>, vector<8x16xbf16>
    %c52 = arith.constant 52 : index
    %c0_93 = arith.constant 0 : index
    %71 = vector.load %arg14[%c52, %c0_93] : memref<100x16xbf16, #tpu.memory_space<vmem>>, vector<8x16xbf16>
    %72 = tpu.concatenate %63, %64, %65, %66, %67, %68, %69, %70, %71 in 1 : vector<8x16xbf16>, vector<8x16xbf16>, vector<8x16xbf16>, vector<8x16xbf16>, vector<8x16xbf16>, vector<8x16xbf16>, vector<8x16xbf16>, vector<8x16xbf16>, vector<8x16xbf16> -> vector<8x144xbf16>
    %c40_94 = arith.constant 40 : index
    %c0_95 = arith.constant 0 : index
    %73 = vector.load %arg14[%c40_94, %c0_95] : memref<100x16xbf16, #tpu.memory_space<vmem>>, vector<8x16xbf16>
    %c41_96 = arith.constant 41 : index
    %c0_97 = arith.constant 0 : index
    %74 = vector.load %arg14[%c41_96, %c0_97] : memref<100x16xbf16, #tpu.memory_space<vmem>>, vector<8x16xbf16>
    %c42_98 = arith.constant 42 : index
    %c0_99 = arith.constant 0 : index
    %75 = vector.load %arg14[%c42_98, %c0_99] : memref<100x16xbf16, #tpu.memory_space<vmem>>, vector<8x16xbf16>
    %c50_100 = arith.constant 50 : index
    %c0_101 = arith.constant 0 : index
    %76 = vector.load %arg14[%c50_100, %c0_101] : memref<100x16xbf16, #tpu.memory_space<vmem>>, vector<8x16xbf16>
    %c51_102 = arith.constant 51 : index
    %c0_103 = arith.constant 0 : index
    %77 = vector.load %arg14[%c51_102, %c0_103] : memref<100x16xbf16, #tpu.memory_space<vmem>>, vector<8x16xbf16>
    %c52_104 = arith.constant 52 : index
    %c0_105 = arith.constant 0 : index
    %78 = vector.load %arg14[%c52_104, %c0_105] : memref<100x16xbf16, #tpu.memory_space<vmem>>, vector<8x16xbf16>
    %c60 = arith.constant 60 : index
    %c0_106 = arith.constant 0 : index
    %79 = vector.load %arg14[%c60, %c0_106] : memref<100x16xbf16, #tpu.memory_space<vmem>>, vector<8x16xbf16>
    %c61_107 = arith.constant 61 : index
    %c0_108 = arith.constant 0 : index
    %80 = vector.load %arg14[%c61_107, %c0_108] : memref<100x16xbf16, #tpu.memory_space<vmem>>, vector<8x16xbf16>
    %c62 = arith.constant 62 : index
    %c0_109 = arith.constant 0 : index
    %81 = vector.load %arg14[%c62, %c0_109] : memref<100x16xbf16, #tpu.memory_space<vmem>>, vector<8x16xbf16>
    %82 = tpu.concatenate %73, %74, %75, %76, %77, %78, %79, %80, %81 in 1 : vector<8x16xbf16>, vector<8x16xbf16>, vector<8x16xbf16>, vector<8x16xbf16>, vector<8x16xbf16>, vector<8x16xbf16>, vector<8x16xbf16>, vector<8x16xbf16>, vector<8x16xbf16> -> vector<8x144xbf16>
    %c50_110 = arith.constant 50 : index
    %c0_111 = arith.constant 0 : index
    %83 = vector.load %arg14[%c50_110, %c0_111] : memref<100x16xbf16, #tpu.memory_space<vmem>>, vector<8x16xbf16>
    %c51_112 = arith.constant 51 : index
    %c0_113 = arith.constant 0 : index
    %84 = vector.load %arg14[%c51_112, %c0_113] : memref<100x16xbf16, #tpu.memory_space<vmem>>, vector<8x16xbf16>
    %c52_114 = arith.constant 52 : index
    %c0_115 = arith.constant 0 : index
    %85 = vector.load %arg14[%c52_114, %c0_115] : memref<100x16xbf16, #tpu.memory_space<vmem>>, vector<8x16xbf16>
    %c60_116 = arith.constant 60 : index
    %c0_117 = arith.constant 0 : index
    %86 = vector.load %arg14[%c60_116, %c0_117] : memref<100x16xbf16, #tpu.memory_space<vmem>>, vector<8x16xbf16>
    %c61_118 = arith.constant 61 : index
    %c0_119 = arith.constant 0 : index
    %87 = vector.load %arg14[%c61_118, %c0_119] : memref<100x16xbf16, #tpu.memory_space<vmem>>, vector<8x16xbf16>
    %c62_120 = arith.constant 62 : index
    %c0_121 = arith.constant 0 : index
    %88 = vector.load %arg14[%c62_120, %c0_121] : memref<100x16xbf16, #tpu.memory_space<vmem>>, vector<8x16xbf16>
    %c70 = arith.constant 70 : index
    %c0_122 = arith.constant 0 : index
    %89 = vector.load %arg14[%c70, %c0_122] : memref<100x16xbf16, #tpu.memory_space<vmem>>, vector<8x16xbf16>
    %c71_123 = arith.constant 71 : index
    %c0_124 = arith.constant 0 : index
    %90 = vector.load %arg14[%c71_123, %c0_124] : memref<100x16xbf16, #tpu.memory_space<vmem>>, vector<8x16xbf16>
    %c72 = arith.constant 72 : index
    %c0_125 = arith.constant 0 : index
    %91 = vector.load %arg14[%c72, %c0_125] : memref<100x16xbf16, #tpu.memory_space<vmem>>, vector<8x16xbf16>
    %92 = tpu.concatenate %83, %84, %85, %86, %87, %88, %89, %90, %91 in 1 : vector<8x16xbf16>, vector<8x16xbf16>, vector<8x16xbf16>, vector<8x16xbf16>, vector<8x16xbf16>, vector<8x16xbf16>, vector<8x16xbf16>, vector<8x16xbf16>, vector<8x16xbf16> -> vector<8x144xbf16>
    %c60_126 = arith.constant 60 : index
    %c0_127 = arith.constant 0 : index
    %93 = vector.load %arg14[%c60_126, %c0_127] : memref<100x16xbf16, #tpu.memory_space<vmem>>, vector<8x16xbf16>
    %c61_128 = arith.constant 61 : index
    %c0_129 = arith.constant 0 : index
    %94 = vector.load %arg14[%c61_128, %c0_129] : memref<100x16xbf16, #tpu.memory_space<vmem>>, vector<8x16xbf16>
    %c62_130 = arith.constant 62 : index
    %c0_131 = arith.constant 0 : index
    %95 = vector.load %arg14[%c62_130, %c0_131] : memref<100x16xbf16, #tpu.memory_space<vmem>>, vector<8x16xbf16>
    %c70_132 = arith.constant 70 : index
    %c0_133 = arith.constant 0 : index
    %96 = vector.load %arg14[%c70_132, %c0_133] : memref<100x16xbf16, #tpu.memory_space<vmem>>, vector<8x16xbf16>
    %c71_134 = arith.constant 71 : index
    %c0_135 = arith.constant 0 : index
    %97 = vector.load %arg14[%c71_134, %c0_135] : memref<100x16xbf16, #tpu.memory_space<vmem>>, vector<8x16xbf16>
    %c72_136 = arith.constant 72 : index
    %c0_137 = arith.constant 0 : index
    %98 = vector.load %arg14[%c72_136, %c0_137] : memref<100x16xbf16, #tpu.memory_space<vmem>>, vector<8x16xbf16>
    %c80 = arith.constant 80 : index
    %c0_138 = arith.constant 0 : index
    %99 = vector.load %arg14[%c80, %c0_138] : memref<100x16xbf16, #tpu.memory_space<vmem>>, vector<8x16xbf16>
    %c81_139 = arith.constant 81 : index
    %c0_140 = arith.constant 0 : index
    %100 = vector.load %arg14[%c81_139, %c0_140] : memref<100x16xbf16, #tpu.memory_space<vmem>>, vector<8x16xbf16>
    %c82 = arith.constant 82 : index
    %c0_141 = arith.constant 0 : index
    %101 = vector.load %arg14[%c82, %c0_141] : memref<100x16xbf16, #tpu.memory_space<vmem>>, vector<8x16xbf16>
    %102 = tpu.concatenate %93, %94, %95, %96, %97, %98, %99, %100, %101 in 1 : vector<8x16xbf16>, vector<8x16xbf16>, vector<8x16xbf16>, vector<8x16xbf16>, vector<8x16xbf16>, vector<8x16xbf16>, vector<8x16xbf16>, vector<8x16xbf16>, vector<8x16xbf16> -> vector<8x144xbf16>
    %c70_142 = arith.constant 70 : index
    %c0_143 = arith.constant 0 : index
    %103 = vector.load %arg14[%c70_142, %c0_143] : memref<100x16xbf16, #tpu.memory_space<vmem>>, vector<8x16xbf16>
    %c71_144 = arith.constant 71 : index
    %c0_145 = arith.constant 0 : index
    %104 = vector.load %arg14[%c71_144, %c0_145] : memref<100x16xbf16, #tpu.memory_space<vmem>>, vector<8x16xbf16>
    %c72_146 = arith.constant 72 : index
    %c0_147 = arith.constant 0 : index
    %105 = vector.load %arg14[%c72_146, %c0_147] : memref<100x16xbf16, #tpu.memory_space<vmem>>, vector<8x16xbf16>
    %c80_148 = arith.constant 80 : index
    %c0_149 = arith.constant 0 : index
    %106 = vector.load %arg14[%c80_148, %c0_149] : memref<100x16xbf16, #tpu.memory_space<vmem>>, vector<8x16xbf16>
    %c81_150 = arith.constant 81 : index
    %c0_151 = arith.constant 0 : index
    %107 = vector.load %arg14[%c81_150, %c0_151] : memref<100x16xbf16, #tpu.memory_space<vmem>>, vector<8x16xbf16>
    %c82_152 = arith.constant 82 : index
    %c0_153 = arith.constant 0 : index
    %108 = vector.load %arg14[%c82_152, %c0_153] : memref<100x16xbf16, #tpu.memory_space<vmem>>, vector<8x16xbf16>
    %c90 = arith.constant 90 : index
    %c0_154 = arith.constant 0 : index
    %109 = vector.load %arg14[%c90, %c0_154] : memref<100x16xbf16, #tpu.memory_space<vmem>>, vector<8x16xbf16>
    %c91 = arith.constant 91 : index
    %c0_155 = arith.constant 0 : index
    %110 = vector.load %arg14[%c91, %c0_155] : memref<100x16xbf16, #tpu.memory_space<vmem>>, vector<8x16xbf16>
    %c92 = arith.constant 92 : index
    %c0_156 = arith.constant 0 : index
    %111 = vector.load %arg14[%c92, %c0_156] : memref<100x16xbf16, #tpu.memory_space<vmem>>, vector<8x16xbf16>
    %112 = tpu.concatenate %103, %104, %105, %106, %107, %108, %109, %110, %111 in 1 : vector<8x16xbf16>, vector<8x16xbf16>, vector<8x16xbf16>, vector<8x16xbf16>, vector<8x16xbf16>, vector<8x16xbf16>, vector<8x16xbf16>, vector<8x16xbf16>, vector<8x16xbf16> -> vector<8x144xbf16>
    %113 = tpu.concatenate %42, %52, %62, %72, %82, %92, %102, %112 in 0 : vector<8x144xbf16>, vector<8x144xbf16>, vector<8x144xbf16>, vector<8x144xbf16>, vector<8x144xbf16>, vector<8x144xbf16>, vector<8x144xbf16>, vector<8x144xbf16> -> vector<64x144xbf16>
    %c0_157 = arith.constant 0 : index
    %c0_158 = arith.constant 0 : index
    %114 = vector.load %arg4[%c0_157, %c0_158] : memref<144x32xbf16, #tpu.memory_space<vmem>>, vector<144x32xbf16>
    %cst_159 = arith.constant dense<0.000000e+00> : vector<64x32xf32>
    %115 = tpu.matmul %113, %114, %cst_159 {dimension_numbers = #tpu.dot_dimension_numbers<[1], [0], [0], [1], [0, 0, 1, 1], [], []>} : vector<64x144xbf16>, vector<144x32xbf16>, vector<64x32xf32> -> vector<64x32xf32>
    %116 = vector.broadcast %32 : vector<1x32xf32> to vector<64x32xf32>
    %117 = arith.addf %115, %116 : vector<64x32xf32>
    %cst_160 = arith.constant 0.000000e+00 : f32
    %118 = vector.broadcast %cst_160 : f32 to vector<64x32xf32>
    %119 = arith.cmpf ogt, %117, %118 : vector<64x32xf32>
    %cst_161 = arith.constant 1.000000e-01 : f32
    %120 = vector.broadcast %cst_161 : f32 to vector<64x32xf32>
    %121 = arith.mulf %120, %117 : vector<64x32xf32>
    %122 = arith.select %119, %117, %121 : vector<64x32xi1>, vector<64x32xf32>
    %123 = arith.truncf %122 : vector<64x32xf32> to vector<64x32xbf16>
    %c0_162 = arith.constant 0 : index
    %c0_163 = arith.constant 0 : index
    %124 = vector.load %arg15[%c0_162, %c0_163] : memref<64x32xbf16, #tpu.memory_space<vmem>>, vector<64x32xbf16>
    tpu.vector_store %arg15[%c0_162, %c0_163], %123 {strides = array<i32>} : memref<64x32xbf16, #tpu.memory_space<vmem>>, vector<64x32xbf16>,
    %c0_164 = arith.constant 0 : index
    %c0_165 = arith.constant 0 : index
    %125 = vector.load %arg15[%c0_164, %c0_165] : memref<64x32xbf16, #tpu.memory_space<vmem>>, vector<64x32xbf16>
    %c0_166 = arith.constant 0 : index
    %c0_167 = arith.constant 0 : index
    %126 = vector.load %arg6[%c0_166, %c0_167] : memref<32x16xbf16, #tpu.memory_space<vmem>>, vector<32x16xbf16>
    %cst_168 = arith.constant dense<0.000000e+00> : vector<64x16xf32>
    %127 = tpu.matmul %125, %126, %cst_168 {dimension_numbers = #tpu.dot_dimension_numbers<[1], [0], [0], [1], [0, 0, 1, 1], [], []>} : vector<64x32xbf16>, vector<32x16xbf16>, vector<64x16xf32> -> vector<64x16xf32>
    %c0_169 = arith.constant 0 : index
    %c0_170 = arith.constant 0 : index
    %128 = vector.load %arg7[%c0_169, %c0_170] : memref<1x16xf32, #tpu.memory_space<vmem>>, vector<1x16xf32>
    %129 = vector.broadcast %128 : vector<1x16xf32> to vector<64x16xf32>
    %130 = arith.addf %127, %129 : vector<64x16xf32>
    %cst_171 = arith.constant 0.000000e+00 : f32
    %131 = vector.broadcast %cst_171 : f32 to vector<64x16xf32>
    %132 = arith.cmpf ogt, %130, %131 : vector<64x16xf32>
    %cst_172 = arith.constant 1.000000e-01 : f32
    %133 = vector.broadcast %cst_172 : f32 to vector<64x16xf32>
    %134 = arith.mulf %133, %130 : vector<64x16xf32>
    %135 = arith.select %132, %130, %134 : vector<64x16xi1>, vector<64x16xf32>
    %136 = arith.truncf %135 : vector<64x16xf32> to vector<64x16xbf16>
    %c0_173 = arith.constant 0 : index
    %c0_174 = arith.constant 0 : index
    %137 = vector.load %arg13[%c0_173, %c0_174] : memref<64x16xbf16, #tpu.memory_space<vmem>>, vector<64x16xbf16>
    tpu.vector_store %arg13[%c0_173, %c0_174], %136 {strides = array<i32>} : memref<64x16xbf16, #tpu.memory_space<vmem>>, vector<64x16xbf16>,
    %cst_175 = arith.constant 0.000000e+00 : bf16
    %138 = vector.broadcast %cst_175 : bf16 to vector<100x16xbf16>
    %c0_176 = arith.constant 0 : index
    %c0_177 = arith.constant 0 : index
    %139 = vector.load %arg14[%c0_176, %c0_177] : memref<100x16xbf16, #tpu.memory_space<vmem>>, vector<100x16xbf16>
    tpu.vector_store %arg14[%c0_176, %c0_177], %138 {strides = array<i32>} : memref<100x16xbf16, #tpu.memory_space<vmem>>, vector<100x16xbf16>,
    %c0_178 = arith.constant 0 : index
    %c0_179 = arith.constant 0 : index
    %140 = vector.load %arg13[%c0_178, %c0_179] : memref<64x16xbf16, #tpu.memory_space<vmem>>, vector<8x16xbf16>
    %c11_180 = arith.constant 11 : index
    %c0_181 = arith.constant 0 : index
    %141 = vector.load %arg14[%c11_180, %c0_181] : memref<100x16xbf16, #tpu.memory_space<vmem>>, vector<8x16xbf16>
    tpu.vector_store %arg14[%c11_180, %c0_181], %140 {strides = array<i32>} : memref<100x16xbf16, #tpu.memory_space<vmem>>, vector<8x16xbf16>,
    %c8_182 = arith.constant 8 : index
    %c0_183 = arith.constant 0 : index
    %142 = vector.load %arg13[%c8_182, %c0_183] : memref<64x16xbf16, #tpu.memory_space<vmem>>, vector<8x16xbf16>
    %c21_184 = arith.constant 21 : index
    %c0_185 = arith.constant 0 : index
    %143 = vector.load %arg14[%c21_184, %c0_185] : memref<100x16xbf16, #tpu.memory_space<vmem>>, vector<8x16xbf16>
    tpu.vector_store %arg14[%c21_184, %c0_185], %142 {strides = array<i32>} : memref<100x16xbf16, #tpu.memory_space<vmem>>, vector<8x16xbf16>,
    %c16_186 = arith.constant 16 : index
    %c0_187 = arith.constant 0 : index
    %144 = vector.load %arg13[%c16_186, %c0_187] : memref<64x16xbf16, #tpu.memory_space<vmem>>, vector<8x16xbf16>
    %c31_188 = arith.constant 31 : index
    %c0_189 = arith.constant 0 : index
    %145 = vector.load %arg14[%c31_188, %c0_189] : memref<100x16xbf16, #tpu.memory_space<vmem>>, vector<8x16xbf16>
    tpu.vector_store %arg14[%c31_188, %c0_189], %144 {strides = array<i32>} : memref<100x16xbf16, #tpu.memory_space<vmem>>, vector<8x16xbf16>,
    %c24_190 = arith.constant 24 : index
    %c0_191 = arith.constant 0 : index
    %146 = vector.load %arg13[%c24_190, %c0_191] : memref<64x16xbf16, #tpu.memory_space<vmem>>, vector<8x16xbf16>
    %c41_192 = arith.constant 41 : index
    %c0_193 = arith.constant 0 : index
    %147 = vector.load %arg14[%c41_192, %c0_193] : memref<100x16xbf16, #tpu.memory_space<vmem>>, vector<8x16xbf16>
    tpu.vector_store %arg14[%c41_192, %c0_193], %146 {strides = array<i32>} : memref<100x16xbf16, #tpu.memory_space<vmem>>, vector<8x16xbf16>,
    %c32_194 = arith.constant 32 : index
    %c0_195 = arith.constant 0 : index
    %148 = vector.load %arg13[%c32_194, %c0_195] : memref<64x16xbf16, #tpu.memory_space<vmem>>, vector<8x16xbf16>
    %c51_196 = arith.constant 51 : index
    %c0_197 = arith.constant 0 : index
    %149 = vector.load %arg14[%c51_196, %c0_197] : memref<100x16xbf16, #tpu.memory_space<vmem>>, vector<8x16xbf16>
    tpu.vector_store %arg14[%c51_196, %c0_197], %148 {strides = array<i32>} : memref<100x16xbf16, #tpu.memory_space<vmem>>, vector<8x16xbf16>,
    %c40_198 = arith.constant 40 : index
    %c0_199 = arith.constant 0 : index
    %150 = vector.load %arg13[%c40_198, %c0_199] : memref<64x16xbf16, #tpu.memory_space<vmem>>, vector<8x16xbf16>
    %c61_200 = arith.constant 61 : index
    %c0_201 = arith.constant 0 : index
    %151 = vector.load %arg14[%c61_200, %c0_201] : memref<100x16xbf16, #tpu.memory_space<vmem>>, vector<8x16xbf16>
    tpu.vector_store %arg14[%c61_200, %c0_201], %150 {strides = array<i32>} : memref<100x16xbf16, #tpu.memory_space<vmem>>, vector<8x16xbf16>,
    %c48_202 = arith.constant 48 : index
    %c0_203 = arith.constant 0 : index
    %152 = vector.load %arg13[%c48_202, %c0_203] : memref<64x16xbf16, #tpu.memory_space<vmem>>, vector<8x16xbf16>
    %c71_204 = arith.constant 71 : index
    %c0_205 = arith.constant 0 : index
    %153 = vector.load %arg14[%c71_204, %c0_205] : memref<100x16xbf16, #tpu.memory_space<vmem>>, vector<8x16xbf16>
    tpu.vector_store %arg14[%c71_204, %c0_205], %152 {strides = array<i32>} : memref<100x16xbf16, #tpu.memory_space<vmem>>, vector<8x16xbf16>,
    %c56_206 = arith.constant 56 : index
    %c0_207 = arith.constant 0 : index
    %154 = vector.load %arg13[%c56_206, %c0_207] : memref<64x16xbf16, #tpu.memory_space<vmem>>, vector<8x16xbf16>
    %c81_208 = arith.constant 81 : index
    %c0_209 = arith.constant 0 : index
    %155 = vector.load %arg14[%c81_208, %c0_209] : memref<100x16xbf16, #tpu.memory_space<vmem>>, vector<8x16xbf16>
    tpu.vector_store %arg14[%c81_208, %c0_209], %154 {strides = array<i32>} : memref<100x16xbf16, #tpu.memory_space<vmem>>, vector<8x16xbf16>,
    %c0_210 = arith.constant 0 : index
    %c0_211 = arith.constant 0 : index
    %156 = vector.load %arg9[%c0_210, %c0_211] : memref<1x32xf32, #tpu.memory_space<vmem>>, vector<1x32xf32>
    %c0_212 = arith.constant 0 : index
    %c0_213 = arith.constant 0 : index
    %157 = vector.load %arg10[%c0_212, %c0_213] : memref<32x128xbf16, #tpu.memory_space<vmem>>, vector<32x128xbf16>
    %c0_214 = arith.constant 0 : index
    %c0_215 = arith.constant 0 : index
    %158 = vector.load %arg11[%c0_214, %c0_215] : memref<1x128xf32, #tpu.memory_space<vmem>>, vector<1x128xf32>
    %c0_216 = arith.constant 0 : index
    %c0_217 = arith.constant 0 : index
    %159 = vector.load %arg14[%c0_216, %c0_217] : memref<100x16xbf16, #tpu.memory_space<vmem>>, vector<8x16xbf16>
    %c1_218 = arith.constant 1 : index
    %c0_219 = arith.constant 0 : index
    %160 = vector.load %arg14[%c1_218, %c0_219] : memref<100x16xbf16, #tpu.memory_space<vmem>>, vector<8x16xbf16>
    %c2_220 = arith.constant 2 : index
    %c0_221 = arith.constant 0 : index
    %161 = vector.load %arg14[%c2_220, %c0_221] : memref<100x16xbf16, #tpu.memory_space<vmem>>, vector<8x16xbf16>
    %c10_222 = arith.constant 10 : index
    %c0_223 = arith.constant 0 : index
    %162 = vector.load %arg14[%c10_222, %c0_223] : memref<100x16xbf16, #tpu.memory_space<vmem>>, vector<8x16xbf16>
    %c11_224 = arith.constant 11 : index
    %c0_225 = arith.constant 0 : index
    %163 = vector.load %arg14[%c11_224, %c0_225] : memref<100x16xbf16, #tpu.memory_space<vmem>>, vector<8x16xbf16>
    %c12_226 = arith.constant 12 : index
    %c0_227 = arith.constant 0 : index
    %164 = vector.load %arg14[%c12_226, %c0_227] : memref<100x16xbf16, #tpu.memory_space<vmem>>, vector<8x16xbf16>
    %c20_228 = arith.constant 20 : index
    %c0_229 = arith.constant 0 : index
    %165 = vector.load %arg14[%c20_228, %c0_229] : memref<100x16xbf16, #tpu.memory_space<vmem>>, vector<8x16xbf16>
    %c21_230 = arith.constant 21 : index
    %c0_231 = arith.constant 0 : index
    %166 = vector.load %arg14[%c21_230, %c0_231] : memref<100x16xbf16, #tpu.memory_space<vmem>>, vector<8x16xbf16>
    %c22_232 = arith.constant 22 : index
    %c0_233 = arith.constant 0 : index
    %167 = vector.load %arg14[%c22_232, %c0_233] : memref<100x16xbf16, #tpu.memory_space<vmem>>, vector<8x16xbf16>
    %168 = tpu.concatenate %159, %160, %161, %162, %163, %164, %165, %166, %167 in 1 : vector<8x16xbf16>, vector<8x16xbf16>, vector<8x16xbf16>, vector<8x16xbf16>, vector<8x16xbf16>, vector<8x16xbf16>, vector<8x16xbf16>, vector<8x16xbf16>, vector<8x16xbf16> -> vector<8x144xbf16>
    %c10_234 = arith.constant 10 : index
    %c0_235 = arith.constant 0 : index
    %169 = vector.load %arg14[%c10_234, %c0_235] : memref<100x16xbf16, #tpu.memory_space<vmem>>, vector<8x16xbf16>
    %c11_236 = arith.constant 11 : index
    %c0_237 = arith.constant 0 : index
    %170 = vector.load %arg14[%c11_236, %c0_237] : memref<100x16xbf16, #tpu.memory_space<vmem>>, vector<8x16xbf16>
    %c12_238 = arith.constant 12 : index
    %c0_239 = arith.constant 0 : index
    %171 = vector.load %arg14[%c12_238, %c0_239] : memref<100x16xbf16, #tpu.memory_space<vmem>>, vector<8x16xbf16>
    %c20_240 = arith.constant 20 : index
    %c0_241 = arith.constant 0 : index
    %172 = vector.load %arg14[%c20_240, %c0_241] : memref<100x16xbf16, #tpu.memory_space<vmem>>, vector<8x16xbf16>
    %c21_242 = arith.constant 21 : index
    %c0_243 = arith.constant 0 : index
    %173 = vector.load %arg14[%c21_242, %c0_243] : memref<100x16xbf16, #tpu.memory_space<vmem>>, vector<8x16xbf16>
    %c22_244 = arith.constant 22 : index
    %c0_245 = arith.constant 0 : index
    %174 = vector.load %arg14[%c22_244, %c0_245] : memref<100x16xbf16, #tpu.memory_space<vmem>>, vector<8x16xbf16>
    %c30_246 = arith.constant 30 : index
    %c0_247 = arith.constant 0 : index
    %175 = vector.load %arg14[%c30_246, %c0_247] : memref<100x16xbf16, #tpu.memory_space<vmem>>, vector<8x16xbf16>
    %c31_248 = arith.constant 31 : index
    %c0_249 = arith.constant 0 : index
    %176 = vector.load %arg14[%c31_248, %c0_249] : memref<100x16xbf16, #tpu.memory_space<vmem>>, vector<8x16xbf16>
    %c32_250 = arith.constant 32 : index
    %c0_251 = arith.constant 0 : index
    %177 = vector.load %arg14[%c32_250, %c0_251] : memref<100x16xbf16, #tpu.memory_space<vmem>>, vector<8x16xbf16>
    %178 = tpu.concatenate %169, %170, %171, %172, %173, %174, %175, %176, %177 in 1 : vector<8x16xbf16>, vector<8x16xbf16>, vector<8x16xbf16>, vector<8x16xbf16>, vector<8x16xbf16>, vector<8x16xbf16>, vector<8x16xbf16>, vector<8x16xbf16>, vector<8x16xbf16> -> vector<8x144xbf16>
    %c20_252 = arith.constant 20 : index
    %c0_253 = arith.constant 0 : index
    %179 = vector.load %arg14[%c20_252, %c0_253] : memref<100x16xbf16, #tpu.memory_space<vmem>>, vector<8x16xbf16>
    %c21_254 = arith.constant 21 : index
    %c0_255 = arith.constant 0 : index
    %180 = vector.load %arg14[%c21_254, %c0_255] : memref<100x16xbf16, #tpu.memory_space<vmem>>, vector<8x16xbf16>
    %c22_256 = arith.constant 22 : index
    %c0_257 = arith.constant 0 : index
    %181 = vector.load %arg14[%c22_256, %c0_257] : memref<100x16xbf16, #tpu.memory_space<vmem>>, vector<8x16xbf16>
    %c30_258 = arith.constant 30 : index
    %c0_259 = arith.constant 0 : index
    %182 = vector.load %arg14[%c30_258, %c0_259] : memref<100x16xbf16, #tpu.memory_space<vmem>>, vector<8x16xbf16>
    %c31_260 = arith.constant 31 : index
    %c0_261 = arith.constant 0 : index
    %183 = vector.load %arg14[%c31_260, %c0_261] : memref<100x16xbf16, #tpu.memory_space<vmem>>, vector<8x16xbf16>
    %c32_262 = arith.constant 32 : index
    %c0_263 = arith.constant 0 : index
    %184 = vector.load %arg14[%c32_262, %c0_263] : memref<100x16xbf16, #tpu.memory_space<vmem>>, vector<8x16xbf16>
    %c40_264 = arith.constant 40 : index
    %c0_265 = arith.constant 0 : index
    %185 = vector.load %arg14[%c40_264, %c0_265] : memref<100x16xbf16, #tpu.memory_space<vmem>>, vector<8x16xbf16>
    %c41_266 = arith.constant 41 : index
    %c0_267 = arith.constant 0 : index
    %186 = vector.load %arg14[%c41_266, %c0_267] : memref<100x16xbf16, #tpu.memory_space<vmem>>, vector<8x16xbf16>
    %c42_268 = arith.constant 42 : index
    %c0_269 = arith.constant 0 : index
    %187 = vector.load %arg14[%c42_268, %c0_269] : memref<100x16xbf16, #tpu.memory_space<vmem>>, vector<8x16xbf16>
    %188 = tpu.concatenate %179, %180, %181, %182, %183, %184, %185, %186, %187 in 1 : vector<8x16xbf16>, vector<8x16xbf16>, vector<8x16xbf16>, vector<8x16xbf16>, vector<8x16xbf16>, vector<8x16xbf16>, vector<8x16xbf16>, vector<8x16xbf16>, vector<8x16xbf16> -> vector<8x144xbf16>
    %c30_270 = arith.constant 30 : index
    %c0_271 = arith.constant 0 : index
    %189 = vector.load %arg14[%c30_270, %c0_271] : memref<100x16xbf16, #tpu.memory_space<vmem>>, vector<8x16xbf16>
    %c31_272 = arith.constant 31 : index
    %c0_273 = arith.constant 0 : index
    %190 = vector.load %arg14[%c31_272, %c0_273] : memref<100x16xbf16, #tpu.memory_space<vmem>>, vector<8x16xbf16>
    %c32_274 = arith.constant 32 : index
    %c0_275 = arith.constant 0 : index
    %191 = vector.load %arg14[%c32_274, %c0_275] : memref<100x16xbf16, #tpu.memory_space<vmem>>, vector<8x16xbf16>
    %c40_276 = arith.constant 40 : index
    %c0_277 = arith.constant 0 : index
    %192 = vector.load %arg14[%c40_276, %c0_277] : memref<100x16xbf16, #tpu.memory_space<vmem>>, vector<8x16xbf16>
    %c41_278 = arith.constant 41 : index
    %c0_279 = arith.constant 0 : index
    %193 = vector.load %arg14[%c41_278, %c0_279] : memref<100x16xbf16, #tpu.memory_space<vmem>>, vector<8x16xbf16>
    %c42_280 = arith.constant 42 : index
    %c0_281 = arith.constant 0 : index
    %194 = vector.load %arg14[%c42_280, %c0_281] : memref<100x16xbf16, #tpu.memory_space<vmem>>, vector<8x16xbf16>
    %c50_282 = arith.constant 50 : index
    %c0_283 = arith.constant 0 : index
    %195 = vector.load %arg14[%c50_282, %c0_283] : memref<100x16xbf16, #tpu.memory_space<vmem>>, vector<8x16xbf16>
    %c51_284 = arith.constant 51 : index
    %c0_285 = arith.constant 0 : index
    %196 = vector.load %arg14[%c51_284, %c0_285] : memref<100x16xbf16, #tpu.memory_space<vmem>>, vector<8x16xbf16>
    %c52_286 = arith.constant 52 : index
    %c0_287 = arith.constant 0 : index
    %197 = vector.load %arg14[%c52_286, %c0_287] : memref<100x16xbf16, #tpu.memory_space<vmem>>, vector<8x16xbf16>
    %198 = tpu.concatenate %189, %190, %191, %192, %193, %194, %195, %196, %197 in 1 : vector<8x16xbf16>, vector<8x16xbf16>, vector<8x16xbf16>, vector<8x16xbf16>, vector<8x16xbf16>, vector<8x16xbf16>, vector<8x16xbf16>, vector<8x16xbf16>, vector<8x16xbf16> -> vector<8x144xbf16>
    %c40_288 = arith.constant 40 : index
    %c0_289 = arith.constant 0 : index
    %199 = vector.load %arg14[%c40_288, %c0_289] : memref<100x16xbf16, #tpu.memory_space<vmem>>, vector<8x16xbf16>
    %c41_290 = arith.constant 41 : index
    %c0_291 = arith.constant 0 : index
    %200 = vector.load %arg14[%c41_290, %c0_291] : memref<100x16xbf16, #tpu.memory_space<vmem>>, vector<8x16xbf16>
    %c42_292 = arith.constant 42 : index
    %c0_293 = arith.constant 0 : index
    %201 = vector.load %arg14[%c42_292, %c0_293] : memref<100x16xbf16, #tpu.memory_space<vmem>>, vector<8x16xbf16>
    %c50_294 = arith.constant 50 : index
    %c0_295 = arith.constant 0 : index
    %202 = vector.load %arg14[%c50_294, %c0_295] : memref<100x16xbf16, #tpu.memory_space<vmem>>, vector<8x16xbf16>
    %c51_296 = arith.constant 51 : index
    %c0_297 = arith.constant 0 : index
    %203 = vector.load %arg14[%c51_296, %c0_297] : memref<100x16xbf16, #tpu.memory_space<vmem>>, vector<8x16xbf16>
    %c52_298 = arith.constant 52 : index
    %c0_299 = arith.constant 0 : index
    %204 = vector.load %arg14[%c52_298, %c0_299] : memref<100x16xbf16, #tpu.memory_space<vmem>>, vector<8x16xbf16>
    %c60_300 = arith.constant 60 : index
    %c0_301 = arith.constant 0 : index
    %205 = vector.load %arg14[%c60_300, %c0_301] : memref<100x16xbf16, #tpu.memory_space<vmem>>, vector<8x16xbf16>
    %c61_302 = arith.constant 61 : index
    %c0_303 = arith.constant 0 : index
    %206 = vector.load %arg14[%c61_302, %c0_303] : memref<100x16xbf16, #tpu.memory_space<vmem>>, vector<8x16xbf16>
    %c62_304 = arith.constant 62 : index
    %c0_305 = arith.constant 0 : index
    %207 = vector.load %arg14[%c62_304, %c0_305] : memref<100x16xbf16, #tpu.memory_space<vmem>>, vector<8x16xbf16>
    %208 = tpu.concatenate %199, %200, %201, %202, %203, %204, %205, %206, %207 in 1 : vector<8x16xbf16>, vector<8x16xbf16>, vector<8x16xbf16>, vector<8x16xbf16>, vector<8x16xbf16>, vector<8x16xbf16>, vector<8x16xbf16>, vector<8x16xbf16>, vector<8x16xbf16> -> vector<8x144xbf16>
    %c50_306 = arith.constant 50 : index
    %c0_307 = arith.constant 0 : index
    %209 = vector.load %arg14[%c50_306, %c0_307] : memref<100x16xbf16, #tpu.memory_space<vmem>>, vector<8x16xbf16>
    %c51_308 = arith.constant 51 : index
    %c0_309 = arith.constant 0 : index
    %210 = vector.load %arg14[%c51_308, %c0_309] : memref<100x16xbf16, #tpu.memory_space<vmem>>, vector<8x16xbf16>
    %c52_310 = arith.constant 52 : index
    %c0_311 = arith.constant 0 : index
    %211 = vector.load %arg14[%c52_310, %c0_311] : memref<100x16xbf16, #tpu.memory_space<vmem>>, vector<8x16xbf16>
    %c60_312 = arith.constant 60 : index
    %c0_313 = arith.constant 0 : index
    %212 = vector.load %arg14[%c60_312, %c0_313] : memref<100x16xbf16, #tpu.memory_space<vmem>>, vector<8x16xbf16>
    %c61_314 = arith.constant 61 : index
    %c0_315 = arith.constant 0 : index
    %213 = vector.load %arg14[%c61_314, %c0_315] : memref<100x16xbf16, #tpu.memory_space<vmem>>, vector<8x16xbf16>
    %c62_316 = arith.constant 62 : index
    %c0_317 = arith.constant 0 : index
    %214 = vector.load %arg14[%c62_316, %c0_317] : memref<100x16xbf16, #tpu.memory_space<vmem>>, vector<8x16xbf16>
    %c70_318 = arith.constant 70 : index
    %c0_319 = arith.constant 0 : index
    %215 = vector.load %arg14[%c70_318, %c0_319] : memref<100x16xbf16, #tpu.memory_space<vmem>>, vector<8x16xbf16>
    %c71_320 = arith.constant 71 : index
    %c0_321 = arith.constant 0 : index
    %216 = vector.load %arg14[%c71_320, %c0_321] : memref<100x16xbf16, #tpu.memory_space<vmem>>, vector<8x16xbf16>
    %c72_322 = arith.constant 72 : index
    %c0_323 = arith.constant 0 : index
    %217 = vector.load %arg14[%c72_322, %c0_323] : memref<100x16xbf16, #tpu.memory_space<vmem>>, vector<8x16xbf16>
    %218 = tpu.concatenate %209, %210, %211, %212, %213, %214, %215, %216, %217 in 1 : vector<8x16xbf16>, vector<8x16xbf16>, vector<8x16xbf16>, vector<8x16xbf16>, vector<8x16xbf16>, vector<8x16xbf16>, vector<8x16xbf16>, vector<8x16xbf16>, vector<8x16xbf16> -> vector<8x144xbf16>
    %c60_324 = arith.constant 60 : index
    %c0_325 = arith.constant 0 : index
    %219 = vector.load %arg14[%c60_324, %c0_325] : memref<100x16xbf16, #tpu.memory_space<vmem>>, vector<8x16xbf16>
    %c61_326 = arith.constant 61 : index
    %c0_327 = arith.constant 0 : index
    %220 = vector.load %arg14[%c61_326, %c0_327] : memref<100x16xbf16, #tpu.memory_space<vmem>>, vector<8x16xbf16>
    %c62_328 = arith.constant 62 : index
    %c0_329 = arith.constant 0 : index
    %221 = vector.load %arg14[%c62_328, %c0_329] : memref<100x16xbf16, #tpu.memory_space<vmem>>, vector<8x16xbf16>
    %c70_330 = arith.constant 70 : index
    %c0_331 = arith.constant 0 : index
    %222 = vector.load %arg14[%c70_330, %c0_331] : memref<100x16xbf16, #tpu.memory_space<vmem>>, vector<8x16xbf16>
    %c71_332 = arith.constant 71 : index
    %c0_333 = arith.constant 0 : index
    %223 = vector.load %arg14[%c71_332, %c0_333] : memref<100x16xbf16, #tpu.memory_space<vmem>>, vector<8x16xbf16>
    %c72_334 = arith.constant 72 : index
    %c0_335 = arith.constant 0 : index
    %224 = vector.load %arg14[%c72_334, %c0_335] : memref<100x16xbf16, #tpu.memory_space<vmem>>, vector<8x16xbf16>
    %c80_336 = arith.constant 80 : index
    %c0_337 = arith.constant 0 : index
    %225 = vector.load %arg14[%c80_336, %c0_337] : memref<100x16xbf16, #tpu.memory_space<vmem>>, vector<8x16xbf16>
    %c81_338 = arith.constant 81 : index
    %c0_339 = arith.constant 0 : index
    %226 = vector.load %arg14[%c81_338, %c0_339] : memref<100x16xbf16, #tpu.memory_space<vmem>>, vector<8x16xbf16>
    %c82_340 = arith.constant 82 : index
    %c0_341 = arith.constant 0 : index
    %227 = vector.load %arg14[%c82_340, %c0_341] : memref<100x16xbf16, #tpu.memory_space<vmem>>, vector<8x16xbf16>
    %228 = tpu.concatenate %219, %220, %221, %222, %223, %224, %225, %226, %227 in 1 : vector<8x16xbf16>, vector<8x16xbf16>, vector<8x16xbf16>, vector<8x16xbf16>, vector<8x16xbf16>, vector<8x16xbf16>, vector<8x16xbf16>, vector<8x16xbf16>, vector<8x16xbf16> -> vector<8x144xbf16>
    %c70_342 = arith.constant 70 : index
    %c0_343 = arith.constant 0 : index
    %229 = vector.load %arg14[%c70_342, %c0_343] : memref<100x16xbf16, #tpu.memory_space<vmem>>, vector<8x16xbf16>
    %c71_344 = arith.constant 71 : index
    %c0_345 = arith.constant 0 : index
    %230 = vector.load %arg14[%c71_344, %c0_345] : memref<100x16xbf16, #tpu.memory_space<vmem>>, vector<8x16xbf16>
    %c72_346 = arith.constant 72 : index
    %c0_347 = arith.constant 0 : index
    %231 = vector.load %arg14[%c72_346, %c0_347] : memref<100x16xbf16, #tpu.memory_space<vmem>>, vector<8x16xbf16>
    %c80_348 = arith.constant 80 : index
    %c0_349 = arith.constant 0 : index
    %232 = vector.load %arg14[%c80_348, %c0_349] : memref<100x16xbf16, #tpu.memory_space<vmem>>, vector<8x16xbf16>
    %c81_350 = arith.constant 81 : index
    %c0_351 = arith.constant 0 : index
    %233 = vector.load %arg14[%c81_350, %c0_351] : memref<100x16xbf16, #tpu.memory_space<vmem>>, vector<8x16xbf16>
    %c82_352 = arith.constant 82 : index
    %c0_353 = arith.constant 0 : index
    %234 = vector.load %arg14[%c82_352, %c0_353] : memref<100x16xbf16, #tpu.memory_space<vmem>>, vector<8x16xbf16>
    %c90_354 = arith.constant 90 : index
    %c0_355 = arith.constant 0 : index
    %235 = vector.load %arg14[%c90_354, %c0_355] : memref<100x16xbf16, #tpu.memory_space<vmem>>, vector<8x16xbf16>
    %c91_356 = arith.constant 91 : index
    %c0_357 = arith.constant 0 : index
    %236 = vector.load %arg14[%c91_356, %c0_357] : memref<100x16xbf16, #tpu.memory_space<vmem>>, vector<8x16xbf16>
    %c92_358 = arith.constant 92 : index
    %c0_359 = arith.constant 0 : index
    %237 = vector.load %arg14[%c92_358, %c0_359] : memref<100x16xbf16, #tpu.memory_space<vmem>>, vector<8x16xbf16>
    %238 = tpu.concatenate %229, %230, %231, %232, %233, %234, %235, %236, %237 in 1 : vector<8x16xbf16>, vector<8x16xbf16>, vector<8x16xbf16>, vector<8x16xbf16>, vector<8x16xbf16>, vector<8x16xbf16>, vector<8x16xbf16>, vector<8x16xbf16>, vector<8x16xbf16> -> vector<8x144xbf16>
    %239 = tpu.concatenate %168, %178, %188, %198, %208, %218, %228, %238 in 0 : vector<8x144xbf16>, vector<8x144xbf16>, vector<8x144xbf16>, vector<8x144xbf16>, vector<8x144xbf16>, vector<8x144xbf16>, vector<8x144xbf16>, vector<8x144xbf16> -> vector<64x144xbf16>
    %c0_360 = arith.constant 0 : index
    %c0_361 = arith.constant 0 : index
    %240 = vector.load %arg8[%c0_360, %c0_361] : memref<144x32xbf16, #tpu.memory_space<vmem>>, vector<144x32xbf16>
    %cst_362 = arith.constant dense<0.000000e+00> : vector<64x32xf32>
    %241 = tpu.matmul %239, %240, %cst_362 {dimension_numbers = #tpu.dot_dimension_numbers<[1], [0], [0], [1], [0, 0, 1, 1], [], []>} : vector<64x144xbf16>, vector<144x32xbf16>, vector<64x32xf32> -> vector<64x32xf32>
    %242 = vector.broadcast %156 : vector<1x32xf32> to vector<64x32xf32>
    %243 = arith.addf %241, %242 : vector<64x32xf32>
    %cst_363 = arith.constant 0.000000e+00 : f32
    %244 = vector.broadcast %cst_363 : f32 to vector<64x32xf32>
    %245 = arith.cmpf ogt, %243, %244 : vector<64x32xf32>
    %cst_364 = arith.constant 1.000000e-01 : f32
    %246 = vector.broadcast %cst_364 : f32 to vector<64x32xf32>
    %247 = arith.mulf %246, %243 : vector<64x32xf32>
    %248 = arith.select %245, %243, %247 : vector<64x32xi1>, vector<64x32xf32>
    %249 = arith.truncf %248 : vector<64x32xf32> to vector<64x32xbf16>
    %cst_365 = arith.constant dense<0.000000e+00> : vector<64x128xf32>
    %250 = tpu.matmul %249, %157, %cst_365 {dimension_numbers = #tpu.dot_dimension_numbers<[1], [0], [0], [1], [0, 0, 1, 1], [], []>} : vector<64x32xbf16>, vector<32x128xbf16>, vector<64x128xf32> -> vector<64x128xf32>
    %251 = vector.broadcast %158 : vector<1x128xf32> to vector<64x128xf32>
    %252 = arith.addf %250, %251 : vector<64x128xf32>
    %c0_366 = arith.constant 0 : index
    %c0_367 = arith.constant 0 : index
    %c0_368 = arith.constant 0 : index
    %253 = vector.load %arg12[%c0_366, %c0_367, %c0_368] : memref<1x64x128xf32, #tpu.memory_space<vmem>>, vector<1x64x128xf32>
    %254 = vector.shape_cast %253 : vector<1x64x128xf32> to vector<64x128xf32>
    %255 = vector.shape_cast %252 : vector<64x128xf32> to vector<1x64x128xf32>
    tpu.vector_store %arg12[%c0_366, %c0_367, %c0_368], %255 {strides = array<i32>} : memref<1x64x128xf32, #tpu.memory_space<vmem>>, vector<1x64x128xf32>,
    return
  }
  func.func @transform_0(%arg0: i32) -> (i32, i32, i32) {
    %c0_i32 = arith.constant 0 : i32
    %c0_i32_0 = arith.constant 0 : i32
    %c0_i32_1 = arith.constant 0 : i32
    return %arg0, %c0_i32, %c0_i32_0 : i32, i32, i32
  }
  func.func @transform_1(%arg0: i32) -> (i32, i32) {
    %c0_i32 = arith.constant 0 : i32
    %c0_i32_0 = arith.constant 0 : i32
    %c0_i32_1 = arith.constant 0 : i32
    return %c0_i32, %c0_i32_0 : i32, i32
  }
  func.func @transform_2(%arg0: i32) -> (i32, i32) {
    %c0_i32 = arith.constant 0 : i32
    %c0_i32_0 = arith.constant 0 : i32
    %c0_i32_1 = arith.constant 0 : i32
    return %c0_i32, %c0_i32_0 : i32, i32
  }
  func.func @transform_3(%arg0: i32) -> (i32, i32) {
    %c0_i32 = arith.constant 0 : i32
    %c0_i32_0 = arith.constant 0 : i32
    %c0_i32_1 = arith.constant 0 : i32
    return %c0_i32, %c0_i32_0 : i32, i32
  }
  func.func @transform_4(%arg0: i32) -> (i32, i32) {
    %c0_i32 = arith.constant 0 : i32
    %c0_i32_0 = arith.constant 0 : i32
    %c0_i32_1 = arith.constant 0 : i32
    return %c0_i32, %c0_i32_0 : i32, i32
  }
  func.func @transform_5(%arg0: i32) -> (i32, i32) {
    %c0_i32 = arith.constant 0 : i32
    %c0_i32_0 = arith.constant 0 : i32
    %c0_i32_1 = arith.constant 0 : i32
    return %c0_i32, %c0_i32_0 : i32, i32
  }
  func.func @transform_6(%arg0: i32) -> (i32, i32) {
    %c0_i32 = arith.constant 0 : i32
    %c0_i32_0 = arith.constant 0 : i32
    %c0_i32_1 = arith.constant 0 : i32
    return %c0_i32, %c0_i32_0 : i32, i32
  }
  func.func @transform_7(%arg0: i32) -> (i32, i32) {
    %c0_i32 = arith.constant 0 : i32
    %c0_i32_0 = arith.constant 0 : i32
    %c0_i32_1 = arith.constant 0 : i32
    return %c0_i32, %c0_i32_0 : i32, i32
  }
  func.func @transform_8(%arg0: i32) -> (i32, i32) {
    %c0_i32 = arith.constant 0 : i32
    %c0_i32_0 = arith.constant 0 : i32
    %c0_i32_1 = arith.constant 0 : i32
    return %c0_i32, %c0_i32_0 : i32, i32
  }
  func.func @transform_9(%arg0: i32) -> (i32, i32) {
    %c0_i32 = arith.constant 0 : i32
    %c0_i32_0 = arith.constant 0 : i32
    %c0_i32_1 = arith.constant 0 : i32
    return %c0_i32, %c0_i32_0 : i32, i32
  }
  func.func @transform_10(%arg0: i32) -> (i32, i32) {
    %c0_i32 = arith.constant 0 : i32
    %c0_i32_0 = arith.constant 0 : i32
    %c0_i32_1 = arith.constant 0 : i32
    return %c0_i32, %c0_i32_0 : i32, i32
  }
  func.func @transform_11(%arg0: i32) -> (i32, i32, i32) {
    %c0_i32 = arith.constant 0 : i32
    %c0_i32_0 = arith.constant 0 : i32
    %c0_i32_1 = arith.constant 0 : i32
    return %arg0, %c0_i32, %c0_i32_0 : i32, i32, i32
  }
}

</mosaic_0001>

<bundles_post_ra>
// kernel: head_forward.1
= control target key start
LH: loop header
LB: loop body
LE: loop exit
PB: predicated region body
PF: predicated region fallthrough
CT: control target
= control target key end

     0   :  { %s3214_s17 = smov 0   ;;  %s4131_s0 = inlined_call_operand.vmem [shape: bf16[2,64,32], index: 0, kind: input, shape index: {}]   ;;  %s4132_s1 = inlined_call_operand.vmem [shape: bf16[32,16], index: 1, kind: input, shape index: {}]   ;;  %s4133_s2 = inlined_call_operand.vmem [shape: f32[1,16], index: 2, kind: input, shape index: {}]   ;;  %s4134_s3 = inlined_call_operand.vmem [shape: bf16[144,32], index: 3, kind: input, shape index: {}]   ;;  %s4135_s4 = inlined_call_operand.vmem [shape: f32[1,32], index: 4, kind: input, shape index: {}]   ;;  %s4136_s5 = inlined_call_operand.vmem [shape: bf16[32,16], index: 5, kind: input, shape index: {}]   ;;  %s4137_s6 = inlined_call_operand.vmem [shape: f32[1,16], index: 6, kind: input, shape index: {}]   ;;  %s4138_s7 = inlined_call_operand.vmem [shape: bf16[144,32], index: 7, kind: input, shape index: {}]   ;;  %s4139_s8 = inlined_call_operand.vmem [shape: f32[1,32], index: 8, kind: input, shape index: {}]   ;;  %s4140_s9 = inlined_call_operand.vmem [shape: bf16[32,128], index: 9, kind: input, shape index: {}]   ;;  %s4141_s10 = inlined_call_operand.vmem [shape: f32[1,128], index: 10, kind: input, shape index: {}]   ;;  %s4142_s11 = inlined_call_operand.vmem [shape: f32[2,64,128], index: 11, kind: output, shape index: {}]  }
   0x1 LB: > { %s2803_s18 = sadd.s32 4294967295, %s3144_s17   ;;  %p2807_p0 = scmp.ge.s32.totalorder %s3144_s17, 1  ;;  %s3144_s17 = sphi %s3214_s17, %s21_s17  }
   0x2   : > { %p337_p1 = scmp.lt.s32.totalorder %s3144_s17, 3 }
   0x4   : > { %p338_p2 = pnand %p2807_p0, %p337_p1 }
   0x5   : > { %p377_p3 = scmp.lt.s32.totalorder (!%p338_p2), %s2803_s18, 1  ;;  %s3147_s27 = smov (!%p338_p2), 32  }
   0x6   : > { %341 = sbr.rel (%p338_p2) target bundleno = 1520 (0x5f0), region = 64  ;;  %s3148_s28 = smov (!%p338_p2), 16  }
   0x7   : > { %s3149_s12 = smov (!%p338_p2), 48   ;;  %s3150_s13 = smov (!%p338_p2), 96  }
   0x8   : > { %s3151_s16 = smov (!%p338_p2), 80   ;;  %s3152_s25 = smov (!%p338_p2), 112  }
   0x9   : > { %s3153_s15 = smov (!%p338_p2), 64  }
   0xb   : > { %v3061_v0 = vld [vmem:[%s4132_s1 + $0x8] sm:$0xff]   ;;  %v3062_v1 = vld [vmem:[%s4132_s1] sm:$0xff]   ;;  %s4290_s18 = smov (!%p377_p3, %s2803_s18), 1  ;;  %vm4143_vm0 = vcmask 261120   ;;  %vm4144_vm1 = vcmask 125952   ;;  %v3146_v6 = vmov 0  }
   0xc   : > { %3009 = vmatprep.subr.bf16.mxu0 %v3061_v0  ;;  %s2965_s23 = sshll.u32 %s4290_s18, 5  ;;  %585 = vst.msk [vmem:[#allocation3 + $0xc] sm:$0xf] %vm4144_vm1, %v3146_v6  ;;  %582 = vst.msk [vmem:[#allocation3] sm:$0xf] %vm4144_vm1, %v3146_v6  ;;  %1419 = vmatprep.subr.bf16.mxu1 %v3146_v6  ;;  %vm594_vm2 = vcmask 123904  }
   0xd   : > { %3010 = vmatpush3.bf16.msra.mxu0 %v3061_v0  ;;  %s381_s26 = scalar_lea.vmem %s4131_s0, %s2965_s23  ;;  %583 = vst.msk [vmem:[#allocation3 + $0x4] sm:$0xf] %vm4144_vm1, %v3146_v6  ;;  %584 = vst.msk [vmem:[#allocation3 + $0x8] sm:$0xf] %vm4144_vm1, %v3146_v6  ;;  %v2812_v17 = vld [vmem:[%s4133_s2] ss:$0 sm:$0xff] }
   0xe   : > { %3011 = vmatprep.subr.bf16.mxu0 %v3062_v1  ;;  %v3063_v2 = vld [vmem:[%s381_s26] sm:$0xff]   ;;  %v3064_v3 = vld [vmem:[%s381_s26 + $0x8] sm:$0xff]   ;;  %v3065_v4 = vld [vmem:[%s381_s26 + $0x10] sm:$0xff]   ;;  %586 = vst.msk [vmem:[#allocation3 + $0x10] sm:$0xf] %vm4144_vm1, %v3146_v6  ;;  %vm656_vm8 = vcmask 125955  }
   0xf   : > { %3013 = vmatprep.mubr.msk.bf16.mxu0 %vm4143_vm0, %v3063_v2  ;;  %v3066_v5 = vld [vmem:[%s381_s26 + $0x18] sm:$0xff]   ;;  %587 = vst.msk [vmem:[#allocation3 + $0x14] sm:$0xf] %vm4144_vm1, %v3146_v6  ;;  %588 = vst.msk [vmem:[#allocation3 + $0x18] sm:$0xf] %vm4144_vm1, %v3146_v6  ;;  %vm608_vm13 = vcmask 125953  }
  0x10   : > { %589 = vst.msk [vmem:[#allocation3 + $0x1c] sm:$0xf] %vm4144_vm1, %v3146_v6  ;;  %590 = vst.msk [vmem:[#allocation3 + $0x20] sm:$0xf] %vm4144_vm1, %v3146_v6  ;;  %vm657_vm9 = vsmask.f32 7950 }
  0x11   : > { %3012 = vmatpush3.bf16.msra.mxu0 %v3062_v1  ;;  %591 = vst.msk [vmem:[#allocation3 + $0x24] sm:$0xf] %vm4144_vm1, %v3146_v6  ;;  %592 = vst.msk [vmem:[#allocation3 + $0x28] sm:$0xf] %vm4144_vm1, %v3146_v6  ;;  %vm663_vm10 = vsmask.f32 3328 }
  0x12   : > { %593 = vst.msk [vmem:[#allocation3 + $0x2c] sm:$0xf] %vm4144_vm1, %v3146_v6  ;;  %vm679_vm12 = vsmask.f32 7938  ;;  %vm609_vm14 = vsmask.f32 7942 }
  0x13   : > { %v3263_v8 = vld [vmem:[#allocation3] sm:$0xf]  ;;  %595 = vst.msk [vmem:[#allocation3 + $0x30] sm:$0x3] %vm594_vm2, %v3146_v6  ;;  %v659_v60 = vld [vmem:[#allocation3 + $0xc] sm:$0x8] }
  0x14   : > { %3014 = vmatmul.mubr.msk.bf16.vlgmr.msra.gmra.mxu0 %vm4143_vm0, %v3064_v3  ;;  %v763_v7 = vld [vmem:[#allocation3 + $0x4] sm:$0x1]  ;;  %v764_v11 = vld [vmem:[#allocation3] sm:$0xe] }
  0x15   : > { %3017 = vmatprep.mubr.msk.bf16.mxu0 %vm4143_vm0, %v3065_v4  ;;  %v2831_v9 = vcombine.low %v3263_v8, %v763_v7  ;;  %v2832_v12 = vcombine.low %v764_v11, %v763_v7  ;;  %1741 = vst.msk [vmem:[#allocation3] sm:$0xf] %vm4144_vm1, %v3146_v6 }
  0x17   : > { %v781_v10 = vshll.u32 %v2831_v9, 16  ;;  %v779_v13 = vshrl.u32 %v2831_v9, 16  ;;  %v790_v15 = vrot.slane %v2832_v12, 1 }
  0x19   : > { %v783_v14 = vrot.slane %v781_v10, 1  ;;  %791 = vrot.lane.b32.xlu0 %v790_v15, %s3147_s27  ;;  %v3275_v29 = vld [vmem:[#allocation3 + $0x2c] sm:$0xe]  ;;  %v665_v15 = vld [vmem:[#allocation3 + $0x10] sm:$0xf] }
  0x1a   : > { %v3277_v30 = vld [vmem:[#allocation3 + $0x30] sm:$0x1] }
  0x1b   : > { %v784_v16 = vor.u32 %v783_v14, %v779_v13  ;;  %v3279_v31 = vld [vmem:[#allocation3 + $0x30] sm:$0x3]  ;;  %v2857_v37 = vcombine.low %v3275_v29, %v3277_v30 }
  0x1c   : > { %3018 = vmatmul.mubr.msk.bf16.gmra.mxu0 %vm4143_vm0, %v3066_v5  ;;  %1753 = vst.msk [vmem:[#allocation3 + $0x30] sm:$0x3] %vm594_vm2, %v3146_v6  ;;  %v3289_v43 = vcombine.low %v3275_v29, %v3279_v31  ;;  %vm3319_vm0 = vmand %vm4144_vm1, %vm679_vm12 }
  0x1d   : > { %785 = vrot.lane.b32.xlu1 %v784_v16, %s3148_s28 }
  0xd4   : > { %v3015_v18 = vpop.f32.mrf.mxu0 }
  0xd5   : > { %v495_v19 = vadd.f32 %v3015_v18, %v2812_v17 }
  0xd6   : > { %v486_v20 = vpop.f32.mrf.mxu0 }
  0xd7   : > { %vm519_vm3 = vcmp.gt.f32.partialorder %v495_v19, 0.0  ;;  %v527_v21 = vmul.f32 0.1, %v495_v19  ;;  %v487_v22 = vadd.f32 %v2812_v17, %v486_v20 }
  0xd8   : > { %v3016_v23 = vpop.f32.mrf.mxu0 }
  0xd9   : > { %v535_v24 = vsel %vm519_vm3, %v495_v19, %v527_v21  ;;  %vm517_vm4 = vcmp.gt.f32.partialorder %v487_v22, 0.0  ;;  %v525_v25 = vmul.f32 0.1, %v487_v22  ;;  %v498_v26 = vadd.f32 %v3016_v23, %v2812_v17 }
  0xda   : > { %v2969_v27 = vpack.c.bf16 %v535_v24, %v535_v24  ;;  %v489_v28 = vpop.f32.mrf.mxu0  ;;  %vm615_vm3 = vsmask.f32 1280  ;;  %v681_v24 = vld [vmem:[#allocation3 + $0x14] sm:$0xf] }
  0xdb   : > { %v533_v32 = vsel %vm517_vm4, %v487_v22, %v525_v25  ;;  %vm520_vm5 = vcmp.gt.f32.partialorder %v498_v26, 0.0  ;;  %v528_v33 = vmul.f32 0.1, %v498_v26  ;;  %v490_v34 = vadd.f32 %v2812_v17, %v489_v28  ;;  %vm3296_vm4 = vmand %vm656_vm8, %vm657_vm9  ;;  %v3132_v25 = vld [vmem:[%s4138_s7 + $0x8] sm:$0xff]  }
  0xdc   : > { %576 = vst.msk [vmem:[#allocation2 + $0x8] sm:$0xf] %vm4144_vm1, %v2969_v27  ;;  %v2967_v35 = vpack.c.bf16 %v533_v32, %v533_v32  ;;  %v3019_v36 = vpop.f32.mrf.mxu0  ;;  %vm3306_vm8 = vmand %vm4144_vm1, %vm663_vm10  ;;  %vm638_vm9 = vcmask 124928   ;;  %vm639_vm10 = vsmask.f32 2304 }
  0xdd   : > { %v536_v38 = vsel %vm520_vm5, %v498_v26, %v528_v33  ;;  %vm518_vm6 = vcmp.gt.f32.partialorder %v490_v34, 0.0  ;;  %v526_v39 = vmul.f32 0.1, %v490_v34  ;;  %v511_v40 = vadd.f32 %v3019_v36, %v2812_v17  ;;  %v611_v26 = vld [vmem:[#allocation3 + $0x4] sm:$0xe] }
  0xde   : > { %574 = vst.msk [vmem:[#allocation2] sm:$0xf] %vm4144_vm1, %v2967_v35  ;;  %v2970_v41 = vpack.c.bf16 %v536_v38, %v536_v38  ;;  %v502_v42 = vpop.f32.mrf.mxu0 }
  0xdf   : > { %v534_v44 = vsel %vm518_vm6, %v490_v34, %v526_v39  ;;  %vm523_vm7 = vcmp.gt.f32.partialorder %v511_v40, 0.0  ;;  %v531_v45 = vmul.f32 0.1, %v511_v40  ;;  %v503_v46 = vadd.f32 %v2812_v17, %v502_v42 }
  0xe0   : > { %577 = vst.msk [vmem:[#allocation2 + $0xc] sm:$0xf] %vm4144_vm1, %v2970_v41  ;;  %v2968_v47 = vpack.c.bf16 %v534_v44, %v534_v44  ;;  %v3020_v48 = vpop.f32.mrf.mxu0  ;;  %vm684_vm6 = vcmask 122880  }
  0xe1   : > { %v539_v49 = vsel %vm523_vm7, %v511_v40, %v531_v45  ;;  %vm521_vm11 = vcmp.gt.f32.partialorder %v503_v46, 0.0  ;;  %v529_v50 = vmul.f32 0.1, %v503_v46  ;;  %v514_v51 = vadd.f32 %v3020_v48, %v2812_v17  ;;  %v617_v40 = vld [vmem:[#allocation3 + $0x8] sm:$0x3] }
  0xe2   : > { %575 = vst.msk [vmem:[#allocation2 + $0x4] sm:$0xf] %vm4144_vm1, %v2968_v47  ;;  %v2973_v52 = vpack.c.bf16 %v539_v49, %v539_v49  ;;  %v505_v53 = vpop.f32.mrf.mxu0  ;;  %vm632_vm7 = vcmask 125954   ;;  %v738_v45 = vld [vmem:[#allocation3 + $0x20] sm:$0x8] }
  0xe3   : > { %v644_v54 = vld [vmem:[#allocation2 + $0x8] sm:$0xf]  ;;  %v537_v55 = vsel %vm521_vm11, %v503_v46, %v529_v50  ;;  %vm524_vm15 = vcmp.gt.f32.partialorder %v514_v51, 0.0  ;;  %v532_v56 = vmul.f32 0.1, %v514_v51  ;;  %v506_v57 = vadd.f32 %v2812_v17, %v505_v53 }
  0xe4   : > { %v646_v58 = vshll.u32 %v644_v54, 16  ;;  %v649_v59 = vshrl.u32 %v644_v54, 16  ;;  %580 = vst.msk [vmem:[#allocation2 + $0x18] sm:$0xf] %vm4144_vm1, %v2973_v52  ;;  %v2971_v61 = vpack.c.bf16 %v537_v55, %v537_v55  ;;  %vm633_vm11 = vsmask.f32 7946 }
  0xe5   : > { %v596_v63 = vld [vmem:[#allocation2] sm:$0xf]  ;;  %v540_v0 = vsel %vm524_vm15, %v514_v51, %v532_v56  ;;  %vm522_vm5 = vcmp.gt.f32.partialorder %v506_v57, 0.0  ;;  %v530_v1 = vmul.f32 0.1, %v506_v57  ;;  %vm3333_vm12 = vmand %vm632_vm7, %vm633_vm11  ;;  %v4168_v56 = vmov 0 }
  0xe6   : > { %v648_v2 = vrot.slane %v646_v58, 5  ;;  %v651_v3 = vrot.slane %v649_v59, 4  ;;  %v598_v4 = vshrl.u32 %v596_v63, 16  ;;  %v601_v5 = vshll.u32 %v596_v63, 16  ;;  %578 = vst.msk [vmem:[#allocation2 + $0x10] sm:$0xf] %vm4144_vm1, %v2971_v61 }
  0xe7   : > { %v668_v7 = vld [vmem:[#allocation2 + $0xc] sm:$0xf]  ;;  %v2974_v9 = vpack.c.bf16 %v540_v0, %v540_v0  ;;  %v538_v10 = vsel %vm522_vm5, %v506_v57, %v530_v1  ;;  %vm685_vm15 = vsmask.f32 256  ;;  %vm3312_vm5 = vmand %vm608_vm13, %vm609_vm14  ;;  %v635_v53 = vld [vmem:[#allocation3 + $0x8] sm:$0xc] }
  0xe8   : > { %v652_v11 = vor.u32 %v651_v3, %v648_v2  ;;  %v660_v12 = vsel %vm3296_vm4, %v648_v2, %v659_v60  ;;  %v600_v13 = vrot.slane %v598_v4, 6  ;;  %v603_v14 = vrot.slane %v601_v5, 7  ;;  %vm3325_vm13 = vmand %vm594_vm2, %vm615_vm3  ;;  %v641_v57 = vld [vmem:[#allocation3 + $0xc] sm:$0x7]  ;;  %v687_v61 = vld [vmem:[#allocation3 + $0x18] sm:$0x1] }
  0xe9   : > { %661 = vst [vmem:[#allocation3 + $0xc] sm:$0x8] %v660_v12  ;;  %v670_v16 = vshrl.u32 %v668_v7, 16  ;;  %v620_v17 = vld [vmem:[#allocation2 + $0x4] sm:$0xf]  ;;  %v2972_v18 = vpack.c.bf16 %v538_v10, %v538_v10  ;;  %v673_v28 = vshll.u32 %v668_v7, 16  ;;  %vm3339_vm2 = vmand %vm684_vm6, %vm685_vm15 }
  0xea   : > { %581 = vst.msk [vmem:[#allocation2 + $0x1c] sm:$0xf] %vm4144_vm1, %v2974_v9  ;;  %v653_v20 = vrot.slane %v652_v11, 4  ;;  %v604_v21 = vor.u32 %v603_v14, %v600_v13  ;;  %v622_v22 = vshrl.u32 %v620_v17, 16  ;;  %v625_v23 = vshll.u32 %v620_v17, 16  ;;  %vm3345_vm14 = vmand %vm638_vm9, %vm639_vm10 }
  0xeb   : > { %v672_v27 = vrot.slane %v670_v16, 7  ;;  %v726_v32 = vld [vmem:[#allocation2 + $0x18] sm:$0xf]  ;;  %579 = vst.msk [vmem:[#allocation2 + $0x14] sm:$0xf] %vm4144_vm1, %v2972_v18  ;;  %v4169_v56 = vsel %vm3345_vm14, 4294967295, %v4168_v56 }
  0xec   : > { %v605_v34 = vrot.slane %v604_v21, 4  ;;  %v624_v35 = vrot.slane %v622_v22, 5  ;;  %v627_v36 = vrot.slane %v625_v23, 6  ;;  %v728_v38 = vshll.u32 %v726_v32, 16  ;;  %v702_v10 = vld [vmem:[#allocation3 + $0x18] sm:$0xe] }
  0xed   : > { %v675_v41 = vor.u32 %v673_v28, %v672_v27  ;;  %v676_v42 = vrot.slane %v672_v27, 4  ;;  %v731_v44 = vshrl.u32 %v726_v32, 16  ;;  %v690_v46 = vld [vmem:[#allocation2 + $0x10] sm:$0xf]  ;;  %v666_v47 = vsel %vm3306_vm8, %v653_v20, %v665_v15  ;;  %v741_v16 = vld [vmem:[#allocation3 + $0x24] sm:$0xf] }
  0xee   : > { %v628_v49 = vor.u32 %v627_v36, %v624_v35  ;;  %v730_v50 = vrot.slane %v728_v38, 5  ;;  %v692_v51 = vshrl.u32 %v690_v46, 16  ;;  %v695_v52 = vshll.u32 %v690_v46, 16  ;;  %667 = vst [vmem:[#allocation3 + $0x10] sm:$0xf] %v666_v47 }
  0xef   : > { %v733_v55 = vrot.slane %v731_v44, 4  ;;  %v682_v58 = vsel %vm3319_vm0, %v675_v41, %v681_v24  ;;  %v612_v59 = vsel %vm3312_vm5, %v604_v21, %v611_v26  ;;  %v618_v60 = vsel %vm3325_vm13, %v605_v34, %v617_v40  ;;  %v705_v17 = vld [vmem:[#allocation3 + $0x1c] sm:$0x3]  ;;  %v755_v21 = vld [vmem:[#allocation3 + $0x28] sm:$0xf] }
  0xf0   : > { %v629_v63 = vrot.slane %v628_v49, 4  ;;  %v739_v0 = vsel %vm3296_vm4, %v730_v50, %v738_v45  ;;  %v694_v1 = vrot.slane %v692_v51, 6  ;;  %v697_v2 = vrot.slane %v695_v52, 7  ;;  %683 = vst [vmem:[#allocation3 + $0x14] sm:$0xf] %v682_v58 }
  0xf1   : > { %v744_v3 = vld [vmem:[#allocation2 + $0x1c] sm:$0xf]  ;;  %613 = vst [vmem:[#allocation3 + $0x4] sm:$0xe] %v612_v59  ;;  %619 = vst [vmem:[#allocation3 + $0x8] sm:$0x3] %v618_v60  ;;  %v734_v4 = vor.u32 %v733_v55, %v730_v50  ;;  %v636_v9 = vsel %vm3333_vm12, %v628_v49, %v635_v53  ;;  %v688_v13 = vsel %vm3339_vm2, %v676_v42, %v687_v61 }
  0xf2   : > { %740 = vst [vmem:[#allocation3 + $0x20] sm:$0x8] %v739_v0  ;;  %v746_v5 = vshrl.u32 %v744_v3, 16  ;;  %v749_v7 = vshll.u32 %v744_v3, 16  ;;  %v698_v11 = vor.u32 %v697_v2, %v694_v1  ;;  %637 = vst [vmem:[#allocation3 + $0x8] sm:$0xc] %v636_v9  ;;  %v642_v12 = vsel %vm3345_vm14, %v629_v63, %v641_v57 }
  0xf3   : > { %v735_v14 = vrot.slane %v734_v4, 4  ;;  %643 = vst [vmem:[#allocation3 + $0xc] sm:$0x7] %v642_v12  ;;  %689 = vst [vmem:[#allocation3 + $0x18] sm:$0x1] %v688_v13  ;;  %vm4147_vm3 = vcmask 1043456  }
  0xf4   : > { %v748_v15 = vrot.slane %v746_v5, 7  ;;  %v699_v18 = vrot.slane %v698_v11, 4  ;;  %v703_v20 = vsel %vm3312_vm5, %v698_v11, %v702_v10  ;;  %v866_v23 = vld [vmem:[#allocation3 + $0xc] sm:$0x8]  ;;  %v758_v41 = vld [vmem:[#allocation3 + $0x2c] sm:$0x1] }
  0xf5   : > { %v867_v24 = vld [vmem:[#allocation3 + $0x10] sm:$0x7]  ;;  %704 = vst [vmem:[#allocation3 + $0x18] sm:$0xe] %v703_v20  ;;  %v742_v32 = vsel %vm3306_vm8, %v735_v14, %v741_v16  ;;  %v708_v49 = vld [vmem:[#allocation2 + $0x14] sm:$0xf] }
  0xf6   : > { %v751_v22 = vor.u32 %v749_v7, %v748_v15  ;;  %v752_v26 = vrot.slane %v748_v15, 4  ;;  %v3365_v27 = vcombine.low %v866_v23, %v867_v24  ;;  %v868_v28 = vld [vmem:[#allocation3 + $0x10] sm:$0xf]  ;;  %v706_v34 = vsel %vm3325_vm13, %v699_v18, %v705_v17  ;;  %743 = vst [vmem:[#allocation3 + $0x24] sm:$0xf] %v742_v32  ;;  %v3087_v2 = vld [vmem:[%s4134_s3 + $0x38] sm:$0xff]  }
  0xf7   : > { %v2841_v35 = vcombine.low %v868_v28, %v868_v28  ;;  %1745 = vst.msk [vmem:[#allocation3 + $0x10] sm:$0xf] %vm4144_vm1, %v3146_v6  ;;  %v3373_v36 = vld [vmem:[#allocation3 + $0x14] sm:$0xf]  ;;  %707 = vst [vmem:[#allocation3 + $0x1c] sm:$0x3] %v706_v34  ;;  %v2840_v58 = vcombine.low %v866_v23, %v868_v28  ;;  %1420 = vmatpush1.bf16.msra.mxu1 %v3087_v2 }
  0xf8   : > { %v768_v38 = vld [vmem:[#allocation3 + $0x4] sm:$0xc]  ;;  %v756_v40 = vsel %vm3319_vm0, %v751_v22, %v755_v21  ;;  %v935_v42 = vrot.slane %v3365_v27, 1  ;;  %v892_v44 = vrot.slane %v3365_v27, 2  ;;  %v927_v45 = vld [vmem:[#allocation3 + $0x14] sm:$0xe]  ;;  %v759_v52 = vsel %vm3339_vm2, %v752_v26, %v758_v41  ;;  %1421 = vmatprep.subr.bf16.mxu1 %v3146_v6 }
  0xf9   : > { %v3379_v46 = vld [vmem:[#allocation3 + $0x4] sm:$0xe]  ;;  %757 = vst [vmem:[#allocation3 + $0x28] sm:$0xf] %v756_v40  ;;  %v3381_v47 = vld [vmem:[#allocation3 + $0x8] sm:$0x3]  ;;  %v3400_v61 = vcombine.low %v3373_v36, %v3373_v36 }
  0xfa   : > { %1746 = vst.msk [vmem:[#allocation3 + $0x14] sm:$0xf] %vm4144_vm1, %v3146_v6  ;;  %1742 = vst.msk [vmem:[#allocation3 + $0x4] sm:$0xf] %vm4144_vm1, %v3146_v6  ;;  %936 = vrot.lane.b32.xlu0 %v935_v42, %s3149_s12  ;;  %893 = vrot.lane.b32.xlu1 %v892_v44, %s3150_s13  ;;  %v3389_v50 = vld [vmem:[#allocation3 + $0xc] sm:$0x7]  ;;  %v2835_v63 = vcombine.low %v768_v38, %v3381_v47 }
  0xfb   : > { %v772_v51 = vld [vmem:[#allocation3 + $0x8] sm:$0x8]  ;;  %v943_v53 = vrot.slane %v2841_v35, 6  ;;  %v766_v57 = vld [vmem:[#allocation3 + $0x8] sm:$0x1]  ;;  %v992_v60 = vrot.slane %v2841_v35, 5 }
  0xfc   : > { %v3394_v55 = vcombine.low %v772_v51, %v3389_v50  ;;  %v3396_v59 = vld [vmem:[#allocation3 + $0x8] sm:$0xc]  ;;  %760 = vst [vmem:[#allocation3 + $0x2c] sm:$0x1] %v759_v52  ;;  %v3403_v0 = vld [vmem:[#allocation3 + $0x18] sm:$0x1]  ;;  %v3430_v15 = vcombine.low %v3379_v46, %v766_v57 }
  0xfd   : > { %v3405_v1 = vld [vmem:[#allocation3 + $0xc] sm:$0x3]  ;;  %1743 = vst.msk [vmem:[#allocation3 + $0x8] sm:$0xf] %vm4144_vm1, %v3146_v6  ;;  %v710_v3 = vshrl.u32 %v708_v49, 16  ;;  %v713_v4 = vshll.u32 %v708_v49, 16  ;;  %v3419_v9 = vcombine.low %v927_v45, %v3403_v0  ;;  %v2843_v2 = vcombine.low %v3373_v36, %v3403_v0 }
  0xfe   : > { %v844_v5 = vrot.slane %v3394_v55, 3  ;;  %vm4145_vm6 = vcmask 130048   ;;  %1744 = vst.msk [vmem:[#allocation3 + $0xc] sm:$0xf] %vm4144_vm1, %v3146_v6  ;;  %944 = vrot.lane.b32.xlu0 %v943_v53, %s3151_s16  ;;  %993 = vrot.lane.b32.xlu1 %v992_v60, %s3147_s27  ;;  %v3421_v10 = vshrl.u32 %v2840_v58, 16  ;;  %v995_v13 = vrot.slane %v3400_v61, 5 }
  0xff   : > { %v3423_v11 = vld [vmem:[#allocation3 + $0x24] sm:$0x7]  ;;  %v873_v14 = vrot.slane %v2835_v63, 1  ;;  %v3432_v16 = vshll.u32 %v2840_v58, 16  ;;  %v712_v17 = vrot.slane %v710_v3, 5  ;;  %v715_v18 = vrot.slane %v713_v4, 6 }
 0x100   : > { %v1312_v7 = vsel %vm4147_vm3, %v844_v5, %v2841_v35  ;;  %v3425_v12 = vld [vmem:[#allocation3 + $0x24] sm:$0xf]  ;;  %v3437_v20 = vld [vmem:[#allocation3 + $0x18] sm:$0xe]  ;;  %v3445_v22 = vld [vmem:[#allocation3 + $0x2c] sm:$0xc]  ;;  %v2834_v58 = vcombine.low %v3379_v46, %v3381_v47 }
 0x101   : > { %2876 = vmatprep.mubr.msk.bf16.mxu1 %vm4145_vm6, %v1312_v7  ;;  %1750 = vst.msk [vmem:[#allocation3 + $0x24] sm:$0xf] %vm4144_vm1, %v3146_v6  ;;  %v3439_v21 = vld [vmem:[#allocation3 + $0x18] sm:$0xc]  ;;  %v1003_v23 = vrot.slane %v3419_v9, 6  ;;  %v901_v24 = vrot.slane %v3421_v10, 2  ;;  %v716_v40 = vor.u32 %v715_v18, %v712_v17 }
 0x102   : > { %996 = vrot.lane.b32.xlu1 %v995_v13, %s3149_s12  ;;  %874 = vrot.lane.b32.xlu0 %v873_v14, %s3147_s27  ;;  %1747 = vst.msk [vmem:[#allocation3 + $0x18] sm:$0xf] %vm4144_vm1, %v3146_v6  ;;  %v3088_v28 = vld [vmem:[%s4134_s3 + $0x30] sm:$0xff]   ;;  %v798_v32 = vrot.slane %v3430_v15, 1  ;;  %v904_v34 = vrot.slane %v3432_v16, 3  ;;  %v3089_v41 = vld [vmem:[%s4134_s3 + $0x28] sm:$0xff]  }
 0x103   : > { %v3449_v26 = vld [vmem:[#allocation3 + $0x2c] sm:$0x1]  ;;  %v3456_v35 = vld [vmem:[#allocation3 + $0x28] sm:$0xf]  ;;  %1422 = vmatpush1.bf16.msra.mxu1 %v3088_v28  ;;  %v817_v44 = vrot.slane %v2835_v63, 2  ;;  %v988_v45 = vrot.slane %v3432_v16, 1  ;;  %v3483_v63 = vcombine.low %v3396_v59, %v3405_v1 }
 0x104   : > { %v3458_v38 = vld [vmem:[#allocation3 + $0x28] sm:$0xe]  ;;  %1752 = vst.msk [vmem:[#allocation3 + $0x2c] sm:$0xf] %vm4144_vm1, %v3146_v6  ;;  %1423 = vmatprep.subr.bf16.mxu1 %v3146_v6  ;;  %v905_v42 = vor.u32 %v904_v34, %v901_v24  ;;  %v717_v49 = vrot.slane %v716_v40, 4  ;;  %v3090_v52 = vld [vmem:[%s4134_s3 + $0x20] sm:$0xff]  }
 0x105   : > { %1751 = vst.msk [vmem:[#allocation3 + $0x28] sm:$0xf] %vm4144_vm1, %v3146_v6  ;;  %v720_v51 = vld [vmem:[#allocation3 + $0x1c] sm:$0xc]  ;;  %v723_v53 = vld [vmem:[#allocation3 + $0x20] sm:$0x7]  ;;  %v989_v60 = vor.u32 %v988_v45, %v3421_v10  ;;  %v3542_v45 = vcombine.low %v3458_v38, %v3449_v26 }
 0x106   : > { %1004 = vrot.lane.b32.xlu1 %v1003_v23, %s3151_s16  ;;  %799 = vrot.lane.b32.xlu0 %v798_v32, %s3149_s12  ;;  %v949_v57 = vrot.slane %v3400_v61, 6  ;;  %v721_v3 = vsel %vm3333_vm12, %v716_v40, %v720_v51  ;;  %v724_v61 = vsel %vm3345_vm14, %v717_v49, %v723_v53  ;;  %v3091_v46 = vld [vmem:[%s4134_s3 + $0x18] sm:$0xff]   ;;  %v1054_v47 = vrot.slane %v3419_v9, 1  ;;  %v3092_v17 = vld [vmem:[%s4134_s3 + $0x10] sm:$0xff]  }
 0x107   : > { %1424 = vmatpush1.bf16.msra.mxu1 %v3089_v41  ;;  %722 = vst [vmem:[#allocation3 + $0x1c] sm:$0xc] %v721_v3  ;;  %725 = vst [vmem:[#allocation3 + $0x20] sm:$0x7] %v724_v61  ;;  %v938_v0 = vrot.slane %v3421_v10, 1  ;;  %v808_v1 = vshll.u32 %v2834_v58, 16  ;;  %v2859_v10 = vcombine.low %v3445_v22, %v3279_v31  ;;  %v2837_v3 = vcombine.low %v3396_v59, %v3389_v50 }
 0x108   : > { %1425 = vmatprep.subr.bf16.mxu1 %v3146_v6  ;;  %v876_v4 = vrot.slane %v3483_v63, 1  ;;  %v939_v5 = vrot.slane %v3432_v16, 2  ;;  %v3501_v7 = vshrl.u32 %v2843_v2, 16  ;;  %v3503_v13 = vshll.u32 %v2843_v2, 16  ;;  %v3505_v14 = vld [vmem:[#allocation3 + $0x1c] sm:$0x3] }
 0x109   : > { %v884_v16 = vrot.slane %v3394_v55, 2  ;;  %v805_v18 = vshrl.u32 %v2834_v58, 16  ;;  %v869_v23 = vrot.slane %v808_v1, 1  ;;  %v3515_v24 = vld [vmem:[#allocation3 + $0x1c] sm:$0x1]  ;;  %v3519_v28 = vcombine.low %v3439_v21, %v3505_v14  ;;  %v3093_v51 = vld [vmem:[%s4134_s3 + $0x8] sm:$0xff]  }
 0x10a   : > { %906 = vrot.lane.b32.xlu1 %v905_v42, %s3152_s25  ;;  %818 = vrot.lane.b32.xlu0 %v817_v44, %s3151_s16  ;;  %v940_v32 = vor.u32 %v939_v5, %v938_v0  ;;  %v998_v34 = vrot.slane %v3501_v7, 5  ;;  %v999_v40 = vrot.slane %v3503_v13, 6  ;;  %v3526_v22 = vld [vmem:[#allocation3 + $0x20] sm:$0x8]  ;;  %v2853_v2 = vcombine.low %v3425_v12, %v3425_v12 }
 0x10b   : > { %1426 = vmatpush1.bf16.msra.mxu1 %v3090_v52  ;;  %v3538_v21 = vcombine.low %v3526_v22, %v3423_v11  ;;  %v2865_v52 = vrot.slane %v2859_v10, 14  ;;  %v807_v53 = vrot.slane %v805_v18, 1  ;;  %v2861_v11 = vrot.slane %v3419_v9, 9  ;;  %v3094_v50 = vld [vmem:[%s4134_s3] sm:$0xff]  }
 0x10c   : > { %1427 = vmatprep.subr.bf16.mxu1 %v3146_v6  ;;  %v2862_v38 = vrot.slane %v3519_v28, 14  ;;  %v1000_v58 = vor.u32 %v999_v40, %v998_v34  ;;  %v2864_v9 = vrot.slane %v3542_v45, 9  ;;  %v832_v59 = vshrl.u32 %v2837_v3, 16 }
 0x10d   : > { %v1234_v10 = vrot.slane %v2853_v2, 5  ;;  %v958_v34 = vrot.slane %v3501_v7, 6  ;;  %vm4150_vm7 = vcmask 392192   ;;  %vm4170_vm11 = vcmask 261120  }
 0x10e   : > { %990 = vrot.lane.b32.xlu1 %v989_v60, %s3148_s28  ;;  %950 = vrot.lane.b32.xlu0 %v949_v57, %s3150_s13  ;;  %v3524_v41 = vld [vmem:[#allocation3 + $0x1c] sm:$0xc]  ;;  %v3528_v42 = vld [vmem:[#allocation3 + $0x20] sm:$0x3]  ;;  %v810_v57 = vrot.slane %v808_v1, 2  ;;  %v870_v60 = vor.u32 %v869_v23, %v805_v18  ;;  %v3560_v61 = vsel %vm4147_vm3, %v2861_v11, %v2862_v38  ;;  %v835_v1 = vshll.u32 %v2837_v3, 16  ;;  %vm4171_vm9 = vmmov %vm4170_vm11 }
 0x10f   : > { %1428 = vmatpush1.bf16.msra.mxu1 %v3091_v46  ;;  %v1049_v31 = vld [vmem:[#allocation3 + $0x1c] sm:$0x8]  ;;  %v3530_v44 = vld [vmem:[#allocation3 + $0x20] sm:$0x7]  ;;  %v3575_v5 = vsel %vm4147_vm3, %v2864_v9, %v2865_v52  ;;  %v879_v18 = vrot.slane %v832_v59, 1  ;;  %v961_v52 = vrot.slane %v3503_v13, 7  ;;  %v3593_v11 = vcombine.low %v3437_v20, %v3515_v24 }
 0x110   : > { %1429 = vmatprep.subr.bf16.mxu1 %v3146_v6  ;;  %1748 = vst.msk [vmem:[#allocation3 + $0x1c] sm:$0xf] %vm4144_vm1, %v3146_v6  ;;  %v3545_v49 = vcombine.low %v1049_v31, %v3530_v44  ;;  %1749 = vst.msk [vmem:[#allocation3 + $0x20] sm:$0xf] %vm4144_vm1, %v3146_v6  ;;  %v811_v0 = vor.u32 %v810_v57, %v807_v53  ;;  %v880_v23 = vrot.slane %v835_v1, 2  ;;  %v834_v31 = vrot.slane %v832_v59, 2 }
 0x111   : > { %v962_v57 = vor.u32 %v961_v52, %v958_v34  ;;  %v1050_v38 = vrot.slane %v3503_v13, 1  ;;  %v1177_v3 = vrot.slane %v3538_v21, 1  ;;  %v3606_v24 = vcombine.low %v3456_v35, %v3456_v35 }
 0x112   : > { %877 = vrot.lane.b32.xlu1 %v876_v4, %s3149_s12  ;;  %1055 = vrot.lane.b32.xlu0 %v1054_v47, %s3147_s27  ;;  %v1092_v46 = vrot.slane %v3545_v49, 3  ;;  %v1134_v47 = vrot.slane %v3538_v21, 2  ;;  %v881_v40 = vor.u32 %v880_v23, %v879_v18  ;;  %v2852_v13 = vcombine.low %v3526_v22, %v3425_v12 }
 0x113   : > { %1430 = vmatpush1.bf16.msra.mxu1 %v3092_v17  ;;  %v3095_v17 = vld [vmem:[%s4134_s3 + $0x40] sm:$0xff]   ;;  %v928_v9 = vrot.slane %v835_v1, 1  ;;  %v2846_v12 = vcombine.low %v3437_v20, %v3505_v14  ;;  %v2855_v20 = vcombine.low %v3456_v35, %v3449_v26  ;;  %v3630_v52 = vcombine.low %v3524_v41, %v3528_v42 }
 0x114   : > { %1431 = vmatprep.subr.bf16.mxu1 %v3146_v6  ;;  %v3572_v4 = vsel %vm4147_vm3, %v1092_v46, %v2853_v2  ;;  %v1185_v46 = vrot.slane %v2853_v2, 6  ;;  %v1057_v2 = vrot.slane %v3593_v11, 1  ;;  %v2849_v26 = vcombine.low %v3524_v41, %v3530_v44 }
 0x115   : > { %v1018_v18 = vshrl.u32 %v2846_v12, 16  ;;  %v1126_v42 = vrot.slane %v3545_v49, 2  ;;  %v1174_v41 = vrot.slane %v3545_v49, 1  ;;  %v1253_v49 = vrot.slane %v2857_v37, 6 }
 0x116   : > { %885 = vrot.lane.b32.xlu1 %v884_v16, %s3151_s16  ;;  %941 = vrot.lane.b32.xlu0 %v940_v32, %s3153_s15  ;;  %v825_v16 = vrot.slane %v3483_v63, 2  ;;  %v932_v32 = vrot.slane %v3394_v55, 1  ;;  %v1011_v55 = vrot.slane %v3593_v11, 6  ;;  %vm4153_vm15 = vcmask 523264  }
 0x117   : > { %1432 = vmatpush1.bf16.msra.mxu1 %v3093_v51  ;;  %v837_v51 = vrot.slane %v835_v1, 3  ;;  %v1020_v34 = vrot.slane %v1018_v18, 6  ;;  %vm4149_vm10 = vcmask 654336   ;;  %vm4148_vm1 = vcmask 785408  }
 0x118   : > { %1433 = vmatprep.subr.bf16.mxu1 %v3146_v6 }
 0x119   : > { %v838_v53 = vor.u32 %v837_v51, %v834_v31 }
 0x11a   : > { %1001 = vrot.lane.b32.xlu1 %v1000_v58, %s3153_s15  ;;  %871 = vrot.lane.b32.xlu0 %v870_v60, %s3148_s28  ;;  %v1051_v58 = vor.u32 %v1050_v38, %v3501_v7  ;;  %v1115_v60 = vrot.slane %v3519_v28, 1  ;;  %v1237_v7 = vrot.slane %v3606_v24, 5  ;;  %v1118_v38 = vrot.slane %v3630_v52, 1 }
 0x11b   : > { %1434 = vmatpush1.bf16.msra.mxu1 %v3094_v50  ;;  %v1245_v50 = vrot.slane %v3542_v45, 6  ;;  %v1021_v45 = vshll.u32 %v2846_v12, 16  ;;  %v1260_v12 = vshrl.u32 %v3289_v43, 16 }
 0x11c   : > { %1449 = vmatprep.subr.bf16.mxu1 %v3146_v6 }
 0x11e   : > { %1135 = vrot.lane.b32.xlu1 %v1134_v47, %s3150_s13  ;;  %812 = vrot.lane.b32.xlu0 %v811_v0, %s3153_s15  ;;  %v1141_v47 = vshrl.u32 %v2852_v13, 16  ;;  %v1144_v0 = vshll.u32 %v2852_v13, 16 }
 0x11f   : > { %1450 = vmatpush2.bf16.msra.mxu1 %v3095_v17  ;;  %v929_v17 = vor.u32 %v928_v9, %v832_v59  ;;  %v1065_v59 = vrot.slane %v3519_v28, 2  ;;  %v1060_v28 = vrot.slane %v1018_v18, 1 }
 0x120   : > { %v1230_v1 = vrot.slane %v1144_v0, 1  ;;  %v1180_v23 = vrot.slane %v1141_v47, 1  ;;  %v1181_v31 = vrot.slane %v1144_v0, 2 }
 0x122   : > { %1235 = vrot.lane.b32.xlu1 %v1234_v10, %s3147_s27  ;;  %826 = vrot.lane.b32.xlu0 %v825_v16, %s3150_s13  ;;  %v1143_v10 = vrot.slane %v1141_v47, 2  ;;  %v1146_v16 = vrot.slane %v1144_v0, 3  ;;  %v1182_v51 = vor.u32 %v1181_v31, %v1180_v23  ;;  %v786_v31 = vpop.permute.xlu1 %785 }
 0x124   : > { %v1147_v22 = vor.u32 %v1146_v16, %v1143_v10 }
 0x126   : > { %882 = vrot.lane.b32.xlu1 %v881_v40, %s3153_s15  ;;  %933 = vrot.lane.b32.xlu0 %v932_v32, %s3147_s27  ;;  %v1231_v32 = vor.u32 %v1230_v1, %v1141_v47  ;;  %v1023_v40 = vrot.slane %v1021_v45, 7  ;;  %v1073_v47 = vrot.slane %v3630_v52, 2 }
 0x128   : > { %v1024_v14 = vor.u32 %v1023_v40, %v1020_v34  ;;  %v792_v40 = vpop.permute.xlu0 %791 }
 0x12a   : > { %839 = vrot.lane.b32.xlu1 %v838_v53, %s3152_s25  ;;  %963 = vrot.lane.b32.xlu0 %v962_v57, %s3152_s25  ;;  %v1111_v53 = vrot.slane %v1021_v45, 1  ;;  %v1061_v57 = vrot.slane %v1021_v45, 2 }
 0x12c   : > { %v1062_v35 = vor.u32 %v1061_v57, %v1060_v28 }
 0x12e   : > { %1012 = vrot.lane.b32.xlu1 %v1011_v55, %s3150_s13  ;;  %1052 = vrot.lane.b32.xlu0 %v1051_v58, %s3148_s28  ;;  %v1112_v55 = vor.u32 %v1111_v53, %v1018_v18  ;;  %v1198_v58 = vshrl.u32 %v2855_v20, 16  ;;  %v1262_v18 = vrot.slane %v1260_v12, 6 }
 0x130   : > { %v1200_v23 = vrot.slane %v1198_v58, 6 }
 0x132   : > { %1116 = vrot.lane.b32.xlu1 %v1115_v60, %s3147_s27  ;;  %1178 = vrot.lane.b32.xlu0 %v1177_v3, %s3149_s12  ;;  %v1201_v60 = vshll.u32 %v2855_v20, 16  ;;  %v1240_v3 = vrot.slane %v1198_v58, 5 }
 0x134   : > { %v1241_v13 = vrot.slane %v1201_v60, 6 }
 0x136   : > { %1238 = vrot.lane.b32.xlu1 %v1237_v7, %s3149_s12  ;;  %1186 = vrot.lane.b32.xlu0 %v1185_v46, %s3151_s16  ;;  %v1080_v7 = vshrl.u32 %v2849_v26, 16  ;;  %v1083_v46 = vshll.u32 %v2849_v26, 16  ;;  %v1242_v9 = vor.u32 %v1241_v13, %v1240_v3 }
 0x138   : > { %v1121_v0 = vrot.slane %v1080_v7, 1  ;;  %v1085_v10 = vrot.slane %v1083_v46, 3  ;;  %v1170_v16 = vrot.slane %v1083_v46, 1 }
 0x13a   : > { %1246 = vrot.lane.b32.xlu1 %v1245_v50, %s3151_s16  ;;  %930 = vrot.lane.b32.xlu0 %v929_v17, %s3148_s28  ;;  %v1122_v50 = vrot.slane %v1083_v46, 2  ;;  %v1082_v17 = vrot.slane %v1080_v7, 2  ;;  %v1171_v1 = vor.u32 %v1170_v16, %v1080_v7 }
 0x13c   : > { %v1123_v44 = vor.u32 %v1122_v50, %v1121_v0 }
 0x13e   : > { %1148 = vrot.lane.b32.xlu1 %v1147_v22, %s3152_s25  ;;  %1058 = vrot.lane.b32.xlu0 %v1057_v2, %s3149_s12  ;;  %v1263_v22 = vshll.u32 %v3289_v43, 16  ;;  %v1086_v2 = vor.u32 %v1085_v10, %v1082_v17 }
 0x140   : > { %v1265_v45 = vrot.slane %v1263_v22, 7 }
 0x142   : > { %1232 = vrot.lane.b32.xlu1 %v1231_v32, %s3148_s28  ;;  %1066 = vrot.lane.b32.xlu0 %v1065_v59, %s3151_s16  ;;  %v1191_v59 = vrot.slane %v3606_v24, 6  ;;  %v1203_v32 = vrot.slane %v1201_v60, 7  ;;  %v1266_v43 = vor.u32 %v1265_v45, %v1262_v18 }
 0x144   : > { %v1204_v34 = vor.u32 %v1203_v32, %v1200_v23 }
 0x146   : > { %1025 = vrot.lane.b32.xlu1 %v1024_v14, %s3152_s25  ;;  %1183 = vrot.lane.b32.xlu0 %v1182_v51, %s3153_s15 }
 0x14a   : > { %1119 = vrot.lane.b32.xlu1 %v1118_v38, %s3149_s12  ;;  %1113 = vrot.lane.b32.xlu0 %v1112_v55, %s3148_s28 }
 0x14e   : > { %1127 = vrot.lane.b32.xlu1 %v1126_v42, %s3151_s16  ;;  %1063 = vrot.lane.b32.xlu0 %v1062_v35, %s3153_s15 }
 0x152   : > { %1243 = vrot.lane.b32.xlu1 %v1242_v9, %s3153_s15  ;;  %1074 = vrot.lane.b32.xlu0 %v1073_v47, %s3150_s13  ;;  %v848_v9 = vsel %vm4145_vm6, %v3263_v8, %v786_v31 }
 0x156   : > { %1124 = vrot.lane.b32.xlu1 %v1123_v44, %s3153_s15  ;;  %1175 = vrot.lane.b32.xlu0 %v1174_v41, %s3147_s27  ;;  %v850_v41 = vsel %vm4171_vm9, %v848_v9, %v792_v40 }
 0x15a   : > { %1087 = vrot.lane.b32.xlu1 %v1086_v2, %s3152_s25  ;;  %1172 = vrot.lane.b32.xlu0 %v1171_v1, %s3148_s28 }
 0x15e   : > { %1254 = vrot.lane.b32.xlu1 %v1253_v49, %s3150_s13  ;;  %1192 = vrot.lane.b32.xlu0 %v1191_v59, %s3150_s13 }
 0x162   : > { %1267 = vrot.lane.b32.xlu1 %v1266_v43, %s3152_s25  ;;  %1205 = vrot.lane.b32.xlu0 %v1204_v34, %s3152_s25 }
 0x16c   : > { %v937_v29 = vpop.permute.xlu0 %936  ;;  %v894_v30 = vpop.permute.xlu1 %893 }
 0x170   : > { %v3660_v37 = vpop.permute.xlu0 %944  ;;  %v994_v20 = vpop.permute.xlu1 %993 }
 0x174   : > { %v3662_v24 = vpop.permute.xlu1 %996  ;;  %v875_v14 = vpop.permute.xlu0 %874 }
 0x178   : > { %v3664_v51 = vpop.permute.xlu1 %1004  ;;  %v800_v53 = vpop.permute.xlu0 %799 }
 0x179   : > { %v853_v44 = vsel %vm4150_vm7, %v850_v41, %v800_v53 }
 0x17c   : > { %v907_v28 = vpop.permute.xlu1 %906  ;;  %v819_v57 = vpop.permute.xlu0 %818 }
 0x180   : > { %v991_v38 = vpop.permute.xlu1 %990  ;;  %v951_v55 = vpop.permute.xlu0 %950 }
 0x184   : > { %v878_v58 = vpop.permute.xlu1 %877  ;;  %v3666_v60 = vpop.permute.xlu0 %1055 }
 0x188   : > { %v886_v26 = vpop.permute.xlu1 %885  ;;  %v942_v35 = vpop.permute.xlu0 %941 }
 0x18c   : > { %v1002_v42 = vpop.permute.xlu1 %1001  ;;  %v872_v3 = vpop.permute.xlu0 %871 }
 0x18d   : > { %v912_v46 = vsel %vm4145_vm6, %v3430_v15, %v872_v3  ;;  %vm4146_vm6 = vcmask 916480  }
 0x18e   : > { %v914_v50 = vsel %vm4170_vm11, %v912_v46, %v875_v14  ;;  %vm4172_vm11 = vcmask 130048  }
 0x18f   : > { %v916_v16 = vsel %vm4150_vm7, %v914_v50, %v878_v58  ;;  %vm4173_vm9 = vmmov %vm4172_vm11 }
 0x190   : > { %v3668_v13 = vpop.permute.xlu1 %1135  ;;  %v813_v7 = vpop.permute.xlu0 %812 }
 0x191   : > { %v856_v17 = vsel %vm4153_vm15, %v853_v44, %v813_v7 }
 0x192   : > { %v859_v22 = vsel %vm4149_vm10, %v856_v17, %v819_v57 }
 0x194   : > { %v3674_v47 = vpop.permute.xlu1 %1235  ;;  %v827_v0 = vpop.permute.xlu0 %826 }
 0x195   : > { %v862_v1 = vsel %vm4148_vm1, %v859_v22, %v827_v0 }
 0x198   : > { %v883_v10 = vpop.permute.xlu1 %882  ;;  %v934_v15 = vpop.permute.xlu0 %933 }
 0x199   : > { %v918_v8 = vsel %vm4153_vm15, %v916_v16, %v883_v10 }
 0x19a   : > { %v920_v12 = vsel %vm4149_vm10, %v918_v8, %v886_v26 }
 0x19b   : > { %v922_v2 = vsel %vm4148_vm1, %v920_v12, %v894_v30 }
 0x19c   : > { %v840_v49 = vpop.permute.xlu1 %839  ;;  %v964_v18 = vpop.permute.xlu0 %963  ;;  %v924_v45 = vsel %vm4146_vm6, %v922_v2, %v907_v28  ;;  %v1033_v28 = vsel %vm4173_vm9, %v3365_v27, %v991_v38 }
 0x19d   : > { %v865_v59 = vsel %vm4146_vm6, %v862_v1, %v840_v49  ;;  %v1289_v23 = vrot.slane %v924_v45, 5  ;;  %vm4174_vm6 = vmmov %vm4173_vm9  ;;  %vm4181_vm9 = vcmask 1043456  }
 0x19f   : > { %v1308_v32 = vsel %vm4147_vm3, %v865_v59, %v1289_v23  ;;  %vm4175_vm3 = vcmask 261120  }
 0x1a0   : > { %v1013_v43 = vpop.permute.xlu1 %1012  ;;  %1452 = vmatmul.mubr.bf16.vlgmr.msra.gmra.mxu1 %v1308_v32  ;;  %v1053_v34 = vpop.permute.xlu0 %1052  ;;  %vm4176_vm1 = vmmov %vm4175_vm3 }
 0x1a1   : > { %2877 = vmatprep.mubr.msk.bf16.mxu1 %vm4172_vm11, %v3560_v61  ;;  %v1035_v61 = vsel %vm4176_vm1, %v1033_v28, %v994_v20  ;;  %vm4178_vm1 = vcmask 916480  }
 0x1a2   : > { %v1037_v50 = vsel %vm4150_vm7, %v1035_v61, %v3662_v24  ;;  %vm4180_vm11 = vmmov %vm4178_vm1 }
 0x1a3   : > { %v1039_v27 = vsel %vm4153_vm15, %v1037_v50, %v1002_v42 }
 0x1a4   : > { %v1117_v40 = vpop.permute.xlu1 %1116  ;;  %v1179_v31 = vpop.permute.xlu0 %1178 }
 0x1a8   : > { %v1239_v30 = vpop.permute.xlu1 %1238  ;;  %v3691_v14 = vpop.permute.xlu0 %1186 }
 0x1ac   : > { %v3693_v53 = vpop.permute.xlu1 %1246  ;;  %v931_v57 = vpop.permute.xlu0 %930 }
 0x1ad   : > { %v971_v58 = vsel %vm4174_vm6, %v3483_v63, %v931_v57  ;;  %vm4177_vm6 = vcmask 785408  }
 0x1ae   : > { %v973_v26 = vsel %vm4175_vm3, %v971_v58, %v934_v15  ;;  %vm4179_vm3 = vmmov %vm4177_vm6 }
 0x1af   : > { %v975_v3 = vsel %vm4150_vm7, %v973_v26, %v937_v29  ;;  %v1041_v29 = vsel %vm4149_vm10, %v1039_v27, %v3664_v51 }
 0x1b0   : > { %v977_v7 = vsel %vm4153_vm15, %v975_v3, %v942_v35  ;;  %v1149_v46 = vpop.permute.xlu1 %1148  ;;  %v1059_v9 = vpop.permute.xlu0 %1058  ;;  %v1043_v35 = vsel %vm4179_vm3, %v1041_v29, %v1013_v43 }
 0x1b1   : > { %v979_v0 = vsel %vm4149_vm10, %v977_v7, %v3660_v37 }
 0x1b2   : > { %v981_v41 = vsel %vm4177_vm6, %v979_v0, %v951_v55  ;;  %vm4182_vm6 = vcmask 130048  }
 0x1b3   : > { %v983_v20 = vsel %vm4178_vm1, %v981_v41, %v964_v18  ;;  %vm4183_vm1 = vmmov %vm4182_vm6 }
 0x1b4   : > { %v1233_v38 = vpop.permute.xlu1 %1232  ;;  %v1067_v63 = vpop.permute.xlu0 %1066  ;;  %v1292_v16 = vrot.slane %v983_v20, 2  ;;  %vm4184_vm3 = vmmov %vm4183_vm1 }
 0x1b5   : > { %v1095_v12 = vsel %vm4184_vm3, %v3373_v36, %v1053_v34  ;;  %vm4190_vm3 = vcmask 785408  }
 0x1b8   : > { %v1026_v44 = vpop.permute.xlu1 %1025  ;;  %v1184_v17 = vpop.permute.xlu0 %1183 }
 0x1b9   : > { %v1045_v37 = vsel %vm4180_vm11, %v1043_v35, %v1026_v44  ;;  %vm4185_vm11 = vcmask 261120   ;;  %v2866_v44 = vld [vmem:[%s4135_s4] ss:$0 sm:$0xff] }
 0x1ba   : > { %v1295_v10 = vrot.slane %v1045_v37, 7  ;;  %vm4186_vm10 = vmmov %vm4185_vm11 }
 0x1bb   : > { %v1097_v49 = vsel %vm4186_vm10, %v1095_v12, %v3666_v60 }
 0x1bc   : > { %v1120_v24 = vpop.permute.xlu1 %1119  ;;  %v1114_v15 = vpop.permute.xlu0 %1113  ;;  %v1315_v42 = vsel %vm4181_vm9, %v1292_v16, %v1295_v10  ;;  %v1099_v18 = vsel %vm4150_vm7, %v1097_v49, %v1059_v9  ;;  %vm4187_vm9 = vmmov %vm4183_vm1 }
 0x1bd   : > { %1460 = vmatmul.mubr.bf16.gmra.mxu1 %v1315_v42  ;;  %v1154_v8 = vsel %vm4183_vm1, %v3593_v11, %v1114_v15  ;;  %v1275_v11 = vsel %vm4187_vm9, %v3538_v21, %v1233_v38 }
 0x1be   : > { %2878 = vmatprep.mubr.msk.bf16.mxu1 %vm4182_vm6, %v3572_v4  ;;  %v1156_v1 = vsel %vm4185_vm11, %v1154_v8, %v1117_v40  ;;  %vm4188_vm6 = vcmask 654336   ;;  %v1277_v34 = vsel %vm4186_vm10, %v1275_v11, %v3674_v47  ;;  %vm4191_vm11 = vmmov %vm4190_vm3 }
 0x1bf   : > { %v1158_v59 = vsel %vm4150_vm7, %v1156_v1, %v1120_v24  ;;  %vm4189_vm1 = vmmov %vm4188_vm6  ;;  %vm4192_vm7 = vcmask 916480  }
 0x1c0   : > { %v1128_v55 = vpop.permute.xlu1 %1127  ;;  %v1064_v51 = vpop.permute.xlu0 %1063  ;;  %vm4193_vm14 = vmmov %vm4192_vm7 }
 0x1c1   : > { %v1101_v45 = vsel %vm4153_vm15, %v1099_v18, %v1064_v51 }
 0x1c2   : > { %v1103_v43 = vsel %vm4189_vm1, %v1101_v45, %v1067_v63  ;;  %vm4195_vm1 = vcmask 392192  }
 0x1c3   : > { %v1279_v7 = vsel %vm4195_vm1, %v1277_v34, %v1239_v30 }
 0x1c4   : > { %v1244_v22 = vpop.permute.xlu1 %1243  ;;  %v1075_v2 = vpop.permute.xlu0 %1074 }
 0x1c5   : > { %v1105_v40 = vsel %vm4191_vm11, %v1103_v43, %v1075_v2 }
 0x1c8   : > { %v1125_v4 = vpop.permute.xlu1 %1124  ;;  %v1176_v23 = vpop.permute.xlu0 %1175 }
 0x1c9   : > { %v1160_v36 = vsel %vm4153_vm15, %v1158_v59, %v1125_v4  ;;  %vm4197_vm15 = vcmask 1043456  }
 0x1ca   : > { %v1162_v32 = vsel %vm4188_vm6, %v1160_v36, %v1128_v55  ;;  %vm4194_vm6 = vmmov %vm4186_vm10  ;;  %vm4198_vm10 = vcmask 523264  }
 0x1cb   : > { %v1164_v60 = vsel %vm4190_vm3, %v1162_v32, %v3668_v13  ;;  %vm4196_vm3 = vmmov %vm4195_vm1  ;;  %v1281_v9 = vsel %vm4198_vm10, %v1279_v7, %v1244_v22 }
 0x1cc   : > { %v1088_v57 = vpop.permute.xlu1 %1087  ;;  %v1173_v28 = vpop.permute.xlu0 %1172  ;;  %v1166_v58 = vsel %vm4192_vm7, %v1164_v60, %v1149_v46  ;;  %vm4199_vm11 = vmmov %vm4198_vm10  ;;  %vm4207_vm10 = vcmask 1043456  }
 0x1cd   : > { %v1107_v21 = vsel %vm4193_vm14, %v1105_v40, %v1088_v57  ;;  %v1213_v26 = vsel %vm4187_vm9, %v3630_v52, %v1173_v28  ;;  %v1298_v3 = vrot.slane %v1166_v58, 5  ;;  %vm4200_vm14 = vcmask 654336   ;;  %vm4201_vm7 = vmmov %vm4187_vm9 }
 0x1ce   : > { %v1215_v61 = vsel %vm4194_vm6, %v1213_v26, %v1176_v23  ;;  %vm4202_vm9 = vmmov %vm4200_vm14  ;;  %vm4203_vm6 = vcmask 785408  }
 0x1cf   : > { %v1217_v13 = vsel %vm4196_vm3, %v1215_v61, %v1179_v31  ;;  %v1321_v47 = vsel %vm4197_vm15, %v1107_v21, %v1298_v3  ;;  %v1283_v52 = vsel %vm4202_vm9, %v1281_v9, %v3693_v53  ;;  %vm4204_vm1 = vmmov %vm4203_vm6  ;;  %vm4205_vm15 = vcmask 916480   ;;  %v3098_v53 = vld [vmem:[%s4136_s5] sm:$0xff]  }
 0x1d0   : > { %v1255_v0 = vpop.permute.xlu1 %1254  ;;  %1468 = vmatmul.mubr.bf16.gmra.mxu1 %v1321_v47  ;;  %v1219_v46 = vsel %vm4199_vm11, %v1217_v13, %v1184_v17  ;;  %v1193_v50 = vpop.permute.xlu0 %1192  ;;  %vm4206_vm3 = vmmov %vm4205_vm15  ;;  %vm4208_vm9 = vcmask 261120  }
 0x1d1   : > { %v1221_v27 = vsel %vm4200_vm14, %v1219_v46, %v3691_v14  ;;  %2879 = vmatprep.mubr.msk.bf16.mxu1 %vm4201_vm7, %v3575_v5  ;;  %v1285_v31 = vsel %vm4203_vm6, %v1283_v52, %v1255_v0  ;;  %v3097_v5 = vld [vmem:[%s4136_s5 + $0x8] sm:$0xff]   ;;  %vm1540_vm14 = vcmask 257024  }
 0x1d2   : > { %v1223_v30 = vsel %vm4204_vm1, %v1221_v27, %v1193_v50  ;;  %3021 = vmatprep.subr.bf16.mxu0 %v3097_v5 }
 0x1d3   : > { %3022 = vmatpush3.bf16.msra.mxu0 %v3097_v5  ;;  %v3780_v5 = vld [vmem:[#allocation3] sm:$0xf] }
 0x1d4   : > { %v1268_v38 = vpop.permute.xlu1 %1267  ;;  %v1206_v63 = vpop.permute.xlu0 %1205  ;;  %3023 = vmatprep.subr.bf16.mxu0 %v3098_v53 }
 0x1d5   : > { %v1287_v41 = vsel %vm4205_vm15, %v1285_v31, %v1268_v38  ;;  %v1225_v29 = vsel %vm4206_vm3, %v1223_v30, %v1206_v63  ;;  %vm4209_vm15 = vmmov %vm4208_vm9 }
 0x1d6   : > { %v1304_v20 = vrot.slane %v1287_v41, 7  ;;  %v1301_v35 = vrot.slane %v1225_v29, 2 }
 0x1d7   : > { %3024 = vmatpush3.bf16.msra.mxu0 %v3098_v53  ;;  %v1903_v53 = vld [vmem:[#allocation3 + $0x4] sm:$0x1] }
 0x1d8   : > { %v1328_v14 = vsel %vm4207_vm10, %v1301_v35, %v1304_v20  ;;  %2552 = vmatprep.subr.bf16.mxu0 %v3146_v6 }
 0x1d9   : > { %1476 = vmatmul.mubr.bf16.gmra.mxu1 %v1328_v14 }
 0x260   : > { %v1453_v17 = vpop.f32.mrf.mxu1 }
 0x261   : > { %v1454_v37 = vadd.f32 %v2866_v44, %v1453_v17 }
 0x262   : > { %v1455_v10 = vpop.f32.mrf.mxu1 }
 0x263   : > { %vm1484_vm11 = vcmp.gt.f32.partialorder %v1454_v37, 0.0  ;;  %v1492_v16 = vmul.f32 0.1, %v1454_v37 }
 0x264   : > { %v1456_v24 = vpop.f32.mrf.mxu1 }
 0x265   : > { %v1500_v15 = vsel %vm1484_vm11, %v1454_v37, %v1492_v16  ;;  %v1457_v42 = vadd.f32 %v2866_v44, %v1456_v24  ;;  %v1904_v24 = vld [vmem:[#allocation3] sm:$0xe] }
 0x266   : > { %v2975_v55 = vpack.c.bf16 %v1500_v15, %v1500_v15  ;;  %v1458_v51 = vpop.f32.mrf.mxu1  ;;  %v2908_v15 = vcombine.low %v1904_v24, %v1903_v53 }
 0x267   : > { %vm1485_vm7 = vcmp.gt.f32.partialorder %v1457_v42, 0.0  ;;  %v1493_v8 = vmul.f32 0.1, %v1457_v42 }
 0x268   : > { %1541 = vst.msk [vmem:[#allocation4] sm:$0xf] %vm1540_vm14, %v2975_v55  ;;  %v3788_v55 = vld [vmem:[%s4137_s6] ss:$0 sm:$0xff] }
 0x269   : > { %v1501_v12 = vsel %vm1485_vm7, %v1457_v42, %v1493_v8  ;;  %v1930_v42 = vrot.slane %v2908_v15, 1 }
 0x26a   : > { %v2976_v22 = vpack.c.bf16 %v1501_v12, %v1501_v12 }
 0x26c   : > { %1542 = vst.msk [vmem:[#allocation4 + $0x4] sm:$0xf] %vm1540_vm14, %v2976_v22 }
 0x273   : > { %v3096_v2 = vld [vmem:[#allocation4] sm:$0xff]  }
 0x274   : > { %3025 = vmatprep.mubr.msk.bf16.mxu0 %vm4208_vm9, %v3096_v2 }
 0x27d   : > { %v1461_v1 = vpop.f32.mrf.mxu1 }
 0x27e   : > { %v1462_v49 = vadd.f32 %v2866_v44, %v1461_v1 }
 0x27f   : > { %v1463_v18 = vpop.f32.mrf.mxu1 }
 0x280   : > { %vm1486_vm6 = vcmp.gt.f32.partialorder %v1462_v49, 0.0  ;;  %v1494_v45 = vmul.f32 0.1, %v1462_v49 }
 0x281   : > { %v1464_v4 = vpop.f32.mrf.mxu1 }
 0x282   : > { %v1502_v59 = vsel %vm1486_vm6, %v1462_v49, %v1494_v45  ;;  %v1465_v23 = vadd.f32 %v2866_v44, %v1464_v4  ;;  %vm4210_vm6 = vmmov %vm4208_vm9 }
 0x283   : > { %v2977_v11 = vpack.c.bf16 %v1502_v59, %v1502_v59  ;;  %v1466_v36 = vpop.f32.mrf.mxu1 }
 0x284   : > { %vm1487_vm1 = vcmp.gt.f32.partialorder %v1465_v23, 0.0  ;;  %v1495_v32 = vmul.f32 0.1, %v1465_v23 }
 0x285   : > { %1543 = vst.msk [vmem:[#allocation4 + $0x8] sm:$0xf] %vm1540_vm14, %v2977_v11 }
 0x286   : > { %v1503_v43 = vsel %vm1487_vm1, %v1465_v23, %v1495_v32 }
 0x287   : > { %v2978_v60 = vpack.c.bf16 %v1503_v43, %v1503_v43 }
 0x289   : > { %1544 = vst.msk [vmem:[#allocation4 + $0xc] sm:$0xf] %vm1540_vm14, %v2978_v60 }
 0x290   : > { %v1469_v34 = vpop.f32.mrf.mxu1  ;;  %v3099_v40 = vld [vmem:[#allocation4 + $0x8] sm:$0xff]  }
 0x291   : > { %v1470_v57 = vadd.f32 %v2866_v44, %v1469_v34  ;;  %3026 = vmatmul.mubr.msk.bf16.vlgmr.msra.gmra.mxu0 %vm4209_vm15, %v3099_v40 }
 0x292   : > { %v1471_v28 = vpop.f32.mrf.mxu1 }
 0x293   : > { %vm1488_vm3 = vcmp.gt.f32.partialorder %v1470_v57, 0.0  ;;  %v1496_v58 = vmul.f32 0.1, %v1470_v57 }
 0x294   : > { %v1472_v21 = vpop.f32.mrf.mxu1 }
 0x295   : > { %v1504_v26 = vsel %vm1488_vm3, %v1470_v57, %v1496_v58  ;;  %v1473_v3 = vadd.f32 %v2866_v44, %v1472_v21  ;;  %vm4211_vm3 = vcmask 125952  }
 0x296   : > { %v2979_v61 = vpack.c.bf16 %v1504_v26, %v1504_v26  ;;  %v1474_v7 = vpop.f32.mrf.mxu1 }
 0x297   : > { %vm1489_vm10 = vcmp.gt.f32.partialorder %v1473_v3, 0.0  ;;  %v1497_v13 = vmul.f32 0.1, %v1473_v3 }
 0x298   : > { %1545 = vst.msk [vmem:[#allocation4 + $0x10] sm:$0xf] %vm1540_vm14, %v2979_v61 }
 0x299   : > { %v1505_v47 = vsel %vm1489_vm10, %v1473_v3, %v1497_v13  ;;  %v1477_v9 = vpop.f32.mrf.mxu1 }
 0x29a   : > { %v2980_v0 = vpack.c.bf16 %v1505_v47, %v1505_v47  ;;  %v1478_v46 = vadd.f32 %v2866_v44, %v1477_v9  ;;  %v1802_v47 = vld [vmem:[#allocation3 + $0xc] sm:$0x8] }
 0x29b   : > { %v1479_v50 = vpop.f32.mrf.mxu1 }
 0x29c   : > { %1546 = vst.msk [vmem:[#allocation4 + $0x14] sm:$0xf] %vm1540_vm14, %v2980_v0  ;;  %vm1490_vm11 = vcmp.gt.f32.partialorder %v1478_v46, 0.0  ;;  %v1498_v27 = vmul.f32 0.1, %v1478_v46 }
 0x29d   : > { %v1480_v52 = vpop.f32.mrf.mxu1 }
 0x29e   : > { %v1506_v31 = vsel %vm1490_vm11, %v1478_v46, %v1498_v27  ;;  %v1481_v30 = vadd.f32 %v2866_v44, %v1480_v52  ;;  %v2907_v44 = vcombine.low %v3780_v5, %v1903_v53  ;;  %vm4212_vm11 = vmmov %vm4211_vm3  ;;  %v1805_v52 = vld [vmem:[#allocation3 + $0x10] sm:$0xf] }
 0x29f   : > { %v2981_v38 = vpack.c.bf16 %v1506_v31, %v1506_v31  ;;  %v1482_v63 = vpop.f32.mrf.mxu1 }
 0x2a0   : > { %vm1491_vm7 = vcmp.gt.f32.partialorder %v1481_v30, 0.0  ;;  %v1499_v41 = vmul.f32 0.1, %v1481_v30  ;;  %v1921_v17 = vshll.u32 %v2907_v44, 16  ;;  %v1919_v37 = vshrl.u32 %v2907_v44, 16 }
 0x2a1   : > { %1547 = vst.msk [vmem:[#allocation4 + $0x18] sm:$0xf] %vm1540_vm14, %v2981_v38  ;;  %v1766_v63 = vld [vmem:[#allocation3 + $0x4] sm:$0xe]  ;;  %v1819_v44 = vld [vmem:[#allocation3 + $0x14] sm:$0xf] }
 0x2a2   : > { %v1507_v29 = vsel %vm1491_vm7, %v1481_v30, %v1499_v41  ;;  %v1923_v10 = vrot.slane %v1921_v17, 1  ;;  %vm4213_vm7 = vmmov %vm4211_vm3  ;;  %v1822_v17 = vld [vmem:[#allocation3 + $0x18] sm:$0x1] }
 0x2a3   : > { %v2982_v20 = vpack.c.bf16 %v1507_v29, %v1507_v29  ;;  %v3100_v35 = vld [vmem:[#allocation4 + $0x10] sm:$0xff]  }
 0x2a4   : > { %3029 = vmatprep.mubr.msk.bf16.mxu0 %vm4208_vm9, %v3100_v35  ;;  %v1924_v16 = vor.u32 %v1923_v10, %v1919_v37  ;;  %vm4214_vm9 = vmmov %vm4211_vm3 }
 0x2a5   : > { %1548 = vst.msk [vmem:[#allocation4 + $0x1c] sm:$0xf] %vm1540_vm14, %v2982_v20 }
 0x2a6   : > { %1925 = vrot.lane.b32.xlu0 %v1924_v16, %s3148_s28 }
 0x2aa   : > { %1931 = vrot.lane.b32.xlu0 %v1930_v42, %s3147_s27 }
 0x2ac   : > { %v3101_v14 = vld [vmem:[#allocation4 + $0x18] sm:$0xff]  }
 0x2ad   : > { %3030 = vmatmul.mubr.msk.bf16.gmra.mxu0 %vm4210_vm6, %v3101_v14  ;;  %v1769_v14 = vld [vmem:[#allocation3 + $0x8] sm:$0x3] }
 0x351   : > { %v3027_v51 = vpop.f32.mrf.mxu0 }
 0x352   : > { %v1655_v8 = vadd.f32 %v3027_v51, %v3788_v55 }
 0x353   : > { %v1646_v12 = vpop.f32.mrf.mxu0 }
 0x354   : > { %vm1679_vm14 = vcmp.gt.f32.partialorder %v1655_v8, 0.0  ;;  %v1687_v22 = vmul.f32 0.1, %v1655_v8  ;;  %v1647_v2 = vadd.f32 %v3788_v55, %v1646_v12 }
 0x355   : > { %v3028_v1 = vpop.f32.mrf.mxu0 }
 0x356   : > { %v1695_v49 = vsel %vm1679_vm14, %v1655_v8, %v1687_v22  ;;  %vm1677_vm1 = vcmp.gt.f32.partialorder %v1647_v2, 0.0  ;;  %v1685_v18 = vmul.f32 0.1, %v1647_v2  ;;  %v1658_v45 = vadd.f32 %v3028_v1, %v3788_v55  ;;  %v1784_v8 = vld [vmem:[#allocation3 + $0x8] sm:$0xc] }
 0x357   : > { %v2985_v4 = vpack.c.bf16 %v1695_v49, %v1695_v49  ;;  %v1649_v59 = vpop.f32.mrf.mxu0  ;;  %vm4215_vm14 = vnez %v4169_v56 }
 0x358   : > { %v1693_v23 = vsel %vm1677_vm1, %v1647_v2, %v1685_v18  ;;  %vm1680_vm15 = vcmp.gt.f32.partialorder %v1658_v45, 0.0  ;;  %v1688_v11 = vmul.f32 0.1, %v1658_v45  ;;  %v1650_v36 = vadd.f32 %v3788_v55, %v1649_v59  ;;  %v1787_v18 = vld [vmem:[#allocation3 + $0xc] sm:$0x7] }
 0x359   : > { %1735 = vst.msk [vmem:[#allocation2 + $0x8] sm:$0xf] %vm4211_vm3, %v2985_v4  ;;  %v2983_v32 = vpack.c.bf16 %v1693_v23, %v1693_v23 }
 0x35a   : > { %v1696_v43 = vsel %vm1680_vm15, %v1658_v45, %v1688_v11  ;;  %vm1678_vm10 = vcmp.gt.f32.partialorder %v1650_v36, 0.0  ;;  %v1686_v60 = vmul.f32 0.1, %v1650_v36 }
 0x35b   : > { %1733 = vst.msk [vmem:[#allocation2] sm:$0xf] %vm4212_vm11, %v2983_v32  ;;  %v2986_v34 = vpack.c.bf16 %v1696_v43, %v1696_v43  ;;  %vm4216_vm11 = vmmov %vm4211_vm3 }
 0x35c   : > { %v1694_v40 = vsel %vm1678_vm10, %v1650_v36, %v1686_v60 }
 0x35d   : > { %1736 = vst.msk [vmem:[#allocation2 + $0xc] sm:$0xf] %vm4213_vm7, %v2986_v34  ;;  %v2984_v57 = vpack.c.bf16 %v1694_v40, %v1694_v40  ;;  %vm4217_vm7 = vmmov %vm4211_vm3 }
 0x35f   : > { %1734 = vst.msk [vmem:[#allocation2 + $0x4] sm:$0xf] %vm4214_vm9, %v2984_v57  ;;  %vm4218_vm9 = vmmov %vm4211_vm3 }
 0x360   : > { %v1790_v28 = vld [vmem:[#allocation2 + $0x8] sm:$0xf] }
 0x361   : > { %v1792_v58 = vshll.u32 %v1790_v28, 16  ;;  %v1795_v21 = vshrl.u32 %v1790_v28, 16 }
 0x362   : > { %v1754_v26 = vld [vmem:[#allocation2] sm:$0xf] }
 0x363   : > { %v1794_v3 = vrot.slane %v1792_v58, 5  ;;  %v1797_v61 = vrot.slane %v1795_v21, 4  ;;  %v1756_v7 = vshrl.u32 %v1754_v26, 16  ;;  %v1759_v13 = vshll.u32 %v1754_v26, 16 }
 0x364   : > { %v1808_v9 = vld [vmem:[#allocation2 + $0xc] sm:$0xf] }
 0x365   : > { %v1798_v0 = vor.u32 %v1797_v61, %v1794_v3  ;;  %v1758_v46 = vrot.slane %v1756_v7, 6  ;;  %v1761_v50 = vrot.slane %v1759_v13, 7  ;;  %v1810_v27 = vshrl.u32 %v1808_v9, 16 }
 0x366   : > { %v1813_v31 = vshll.u32 %v1808_v9, 16  ;;  %v1772_v30 = vld [vmem:[#allocation2 + $0x4] sm:$0xf]  ;;  %v1803_v38 = vsel %vm3296_vm4, %v1794_v3, %v1802_v47 }
 0x367   : > { %v1799_v41 = vrot.slane %v1798_v0, 4  ;;  %v1762_v29 = vor.u32 %v1761_v50, %v1758_v46  ;;  %v1812_v20 = vrot.slane %v1810_v27, 7  ;;  %v1774_v35 = vshrl.u32 %v1772_v30, 16  ;;  %1804 = vst [vmem:[#allocation3 + $0xc] sm:$0x8] %v1803_v38 }
 0x368   : > { %v1777_v53 = vshll.u32 %v1772_v30, 16  ;;  %v3126_v30 = vld [vmem:[%s4138_s7 + $0x38] sm:$0xff]  }
 0x369   : > { %v1763_v37 = vrot.slane %v1762_v29, 4  ;;  %v1815_v10 = vor.u32 %v1813_v31, %v1812_v20  ;;  %v1816_v16 = vrot.slane %v1812_v20, 4  ;;  %v1776_v24 = vrot.slane %v1774_v35, 5  ;;  %2553 = vmatpush1.bf16.msra.mxu0 %v3126_v30 }
 0x36a   : > { %v1779_v15 = vrot.slane %v1777_v53, 6  ;;  %v1806_v42 = vsel %vm3306_vm8, %v1799_v41, %v1805_v52  ;;  %v1767_v51 = vsel %vm3312_vm5, %v1762_v29, %v1766_v63  ;;  %2554 = vmatprep.subr.bf16.mxu0 %v3146_v6 }
 0x36b   : > { %1807 = vst [vmem:[#allocation3 + $0x10] sm:$0xf] %v1806_v42  ;;  %1768 = vst [vmem:[#allocation3 + $0x4] sm:$0xe] %v1767_v51  ;;  %v1770_v12 = vsel %vm3325_vm13, %v1763_v37, %v1769_v14  ;;  %v1820_v22 = vsel %vm3319_vm0, %v1815_v10, %v1819_v44  ;;  %v1823_v2 = vsel %vm3339_vm2, %v1816_v16, %v1822_v17  ;;  %v3127_v16 = vld [vmem:[%s4138_s7 + $0x30] sm:$0xff]  }
 0x36c   : > { %v1780_v1 = vor.u32 %v1779_v15, %v1776_v24  ;;  %1771 = vst [vmem:[#allocation3 + $0x8] sm:$0x3] %v1770_v12  ;;  %1821 = vst [vmem:[#allocation3 + $0x14] sm:$0xf] %v1820_v22 }
 0x36d   : > { %1824 = vst [vmem:[#allocation3 + $0x18] sm:$0x1] %v1823_v2  ;;  %v3031_v49 = vpop.f32.mrf.mxu0  ;;  %2555 = vmatpush1.bf16.msra.mxu0 %v3127_v16 }
 0x36e   : > { %v1781_v45 = vrot.slane %v1780_v1, 4  ;;  %v1785_v4 = vsel %vm3333_vm12, %v1780_v1, %v1784_v8  ;;  %v1671_v59 = vadd.f32 %v3031_v49, %v3788_v55  ;;  %v2000_v60 = vld [vmem:[#allocation3 + $0xc] sm:$0x8]  ;;  %2556 = vmatprep.subr.bf16.mxu0 %v3146_v6 }
 0x36f   : > { %1786 = vst [vmem:[#allocation3 + $0x8] sm:$0xc] %v1785_v4  ;;  %v1662_v23 = vpop.f32.mrf.mxu0 }
 0x370   : > { %vm1683_vm6 = vcmp.gt.f32.partialorder %v1671_v59, 0.0  ;;  %v1691_v11 = vmul.f32 0.1, %v1671_v59  ;;  %v1663_v36 = vadd.f32 %v3788_v55, %v1662_v23  ;;  %v1788_v32 = vsel %vm4215_vm14, %v1781_v45, %v1787_v18  ;;  %v3128_v45 = vld [vmem:[%s4138_s7 + $0x28] sm:$0xff]  }
 0x371   : > { %v3032_v43 = vpop.f32.mrf.mxu0  ;;  %1789 = vst [vmem:[#allocation3 + $0xc] sm:$0x7] %v1788_v32  ;;  %2557 = vmatpush1.bf16.msra.mxu0 %v3128_v45 }
 0x372   : > { %v1699_v34 = vsel %vm1683_vm6, %v1671_v59, %v1691_v11  ;;  %vm1681_vm1 = vcmp.gt.f32.partialorder %v1663_v36, 0.0  ;;  %v1689_v40 = vmul.f32 0.1, %v1663_v36  ;;  %v1674_v57 = vadd.f32 %v3032_v43, %v3788_v55  ;;  %v2001_v28 = vld [vmem:[#allocation3 + $0x10] sm:$0x7]  ;;  %2558 = vmatprep.subr.bf16.mxu0 %v3146_v6 }
 0x373   : > { %v2989_v58 = vpack.c.bf16 %v1699_v34, %v1699_v34  ;;  %v1665_v21 = vpop.f32.mrf.mxu0  ;;  %v3817_v26 = vcombine.low %v2000_v60, %v2001_v28  ;;  %v2002_v3 = vld [vmem:[#allocation3 + $0x10] sm:$0xf]  ;;  %v3823_v46 = vld [vmem:[#allocation3 + $0x8] sm:$0x3]  ;;  %v1908_v38 = vld [vmem:[#allocation3 + $0x4] sm:$0xc] }
 0x374   : > { %v1697_v61 = vsel %vm1681_vm1, %v1663_v36, %v1689_v40  ;;  %vm1684_vm15 = vcmp.gt.f32.partialorder %v1674_v57, 0.0  ;;  %v1692_v7 = vmul.f32 0.1, %v1674_v57  ;;  %v1666_v13 = vadd.f32 %v3788_v55, %v1665_v21  ;;  %v1906_v50 = vld [vmem:[#allocation3 + $0x8] sm:$0x1] }
 0x375   : > { %1739 = vst.msk [vmem:[#allocation2 + $0x18] sm:$0xf] %vm4211_vm3, %v2989_v58  ;;  %v2987_v47 = vpack.c.bf16 %v1697_v61, %v1697_v61  ;;  %v2069_v9 = vrot.slane %v3817_v26, 1  ;;  %v2026_v0 = vrot.slane %v3817_v26, 2  ;;  %v2917_v31 = vcombine.low %v2002_v3, %v2002_v3  ;;  %v3831_v63 = vld [vmem:[#allocation3 + $0x4] sm:$0xe] }
 0x376   : > { %v1700_v27 = vsel %vm1684_vm15, %v1674_v57, %v1692_v7  ;;  %vm1682_vm10 = vcmp.gt.f32.partialorder %v1666_v13, 0.0  ;;  %v1690_v52 = vmul.f32 0.1, %v1666_v13  ;;  %v1912_v20 = vld [vmem:[#allocation3 + $0x8] sm:$0x8]  ;;  %v2911_v35 = vcombine.low %v1908_v38, %v3823_v46 }
 0x377   : > { %1737 = vst.msk [vmem:[#allocation2 + $0x10] sm:$0xf] %vm4216_vm11, %v2987_v47  ;;  %v2990_v55 = vpack.c.bf16 %v1700_v27, %v1700_v27  ;;  %2070 = vrot.lane.b32.xlu0 %v2069_v9, %s3149_s12  ;;  %2027 = vrot.lane.b32.xlu1 %v2026_v0, %s3150_s13  ;;  %v3837_v14 = vcombine.low %v3831_v63, %v1906_v50  ;;  %v3839_v53 = vld [vmem:[#allocation3 + $0x14] sm:$0xf]  ;;  %v2077_v17 = vrot.slane %v2917_v31, 6  ;;  %v2126_v37 = vrot.slane %v2917_v31, 5 }
 0x378   : > { %v1698_v41 = vsel %vm1682_vm10, %v1666_v13, %v1690_v52  ;;  %v3833_v29 = vld [vmem:[#allocation3 + $0xc] sm:$0x7]  ;;  %v2916_v24 = vcombine.low %v2000_v60, %v2002_v3  ;;  %v2918_v42 = vcombine.low %v3839_v53, %v3839_v53  ;;  %v2007_v8 = vrot.slane %v2911_v35, 1  ;;  %v3855_v12 = vld [vmem:[#allocation3 + $0x18] sm:$0x1]  ;;  %v3129_v47 = vld [vmem:[%s4138_s7 + $0x20] sm:$0xff]  }
 0x379   : > { %1740 = vst.msk [vmem:[#allocation2 + $0x1c] sm:$0xf] %vm4217_vm7, %v2990_v55  ;;  %v2988_v44 = vpack.c.bf16 %v1698_v41, %v1698_v41  ;;  %v3843_v10 = vcombine.low %v1912_v20, %v3833_v29  ;;  %vm4219_vm6 = vcmask 1043456   ;;  %v1938_v49 = vrot.slane %v3837_v14, 1  ;;  %v2061_v18 = vld [vmem:[#allocation3 + $0x14] sm:$0xe]  ;;  %2559 = vmatpush1.bf16.msra.mxu0 %v3129_v47 }
 0x37a   : > { %vm4220_vm1 = vcmask 130048   ;;  %v2129_v11 = vrot.slane %v2918_v42, 5  ;;  %v3866_v36 = vshrl.u32 %v2916_v24, 16  ;;  %v3871_v34 = vcombine.low %v2061_v18, %v3855_v12  ;;  %v1855_v41 = vld [vmem:[#allocation3 + $0x1c] sm:$0xc]  ;;  %2560 = vmatprep.subr.bf16.mxu0 %v3146_v6 }
 0x37b   : > { %1738 = vst.msk [vmem:[#allocation2 + $0x14] sm:$0xf] %vm4218_vm9, %v2988_v44  ;;  %2078 = vrot.lane.b32.xlu0 %v2077_v17, %s3151_s16  ;;  %2127 = vrot.lane.b32.xlu1 %v2126_v37, %s3147_s27  ;;  %v1984_v15 = vrot.slane %v3843_v10, 3  ;;  %v3873_v40 = vshll.u32 %v2916_v24, 16  ;;  %v1957_v21 = vrot.slane %v2911_v35, 2  ;;  %v2083_v7 = vrot.slane %v2918_v42, 6 }
 0x37c   : > { %v1861_v51 = vld [vmem:[#allocation2 + $0x18] sm:$0xf]  ;;  %v2035_v13 = vrot.slane %v3866_v36, 2  ;;  %v2137_v50 = vrot.slane %v3871_v34, 6  ;;  %v3887_v55 = vcombine.low %v3831_v63, %v3823_v46  ;;  %v1873_v20 = vld [vmem:[#allocation3 + $0x20] sm:$0x8] }
 0x37d   : > { %v1863_v22 = vshll.u32 %v1861_v51, 16  ;;  %v1866_v2 = vshrl.u32 %v1861_v51, 16  ;;  %v2445_v1 = vsel %vm4219_vm6, %v1984_v15, %v2917_v31  ;;  %v2038_v27 = vrot.slane %v3873_v40, 3  ;;  %v1876_v37 = vld [vmem:[#allocation3 + $0x24] sm:$0xf]  ;;  %v3130_v46 = vld [vmem:[%s4138_s7 + $0x18] sm:$0xff]  }
 0x37e   : > { %v1825_v4 = vld [vmem:[#allocation2 + $0x10] sm:$0xf]  ;;  %2952 = vmatprep.mubr.msk.bf16.mxu0 %vm4220_vm1, %v2445_v1  ;;  %v2188_v44 = vrot.slane %v3871_v34, 1  ;;  %v2072_v17 = vrot.slane %v3866_v36, 1  ;;  %v2122_v24 = vrot.slane %v3873_v40, 1  ;;  %v2073_v15 = vrot.slane %v3873_v40, 2  ;;  %2561 = vmatpush1.bf16.msra.mxu0 %v3130_v46 }
 0x37f   : > { %v1827_v59 = vshrl.u32 %v1825_v4, 16  ;;  %v1830_v23 = vshll.u32 %v1825_v4, 16  ;;  %2008 = vrot.lane.b32.xlu1 %v2007_v8, %s3147_s27  ;;  %1939 = vrot.lane.b32.xlu0 %v1938_v49, %s3149_s12  ;;  %v3868_v32 = vrot.slane %v1863_v22, 5  ;;  %v1868_v43 = vrot.slane %v1866_v2, 4  ;;  %v1910_v42 = vld [vmem:[#allocation3 + $0xc] sm:$0x3] }
 0x380   : > { %v1879_v60 = vld [vmem:[#allocation2 + $0x1c] sm:$0xf]  ;;  %v1837_v51 = vld [vmem:[#allocation3 + $0x18] sm:$0xe]  ;;  %v2039_v2 = vor.u32 %v2038_v27, %v2035_v13  ;;  %v1948_v1 = vshll.u32 %v3887_v55, 16  ;;  %2562 = vmatprep.subr.bf16.mxu0 %v3146_v6  ;;  %vm4232_vm11 = vcmask 523264  }
 0x381   : > { %v1829_v57 = vrot.slane %v1827_v59, 6  ;;  %v1832_v28 = vrot.slane %v1830_v23, 7  ;;  %v1881_v58 = vshrl.u32 %v1879_v60, 16  ;;  %v1869_v9 = vor.u32 %v1868_v43, %v3868_v32  ;;  %v1840_v49 = vld [vmem:[#allocation3 + $0x1c] sm:$0x3]  ;;  %vm4234_vm9 = vmmov %vm4232_vm11 }
 0x382   : > { %v1843_v3 = vld [vmem:[#allocation2 + $0x14] sm:$0xf]  ;;  %v1884_v35 = vshll.u32 %v1879_v60, 16  ;;  %v1890_v18 = vld [vmem:[#allocation3 + $0x28] sm:$0xf]  ;;  %v2919_v43 = vcombine.low %v3839_v53, %v3855_v12  ;;  %v1874_v48 = vsel %vm3296_vm4, %v3868_v32, %v1873_v20  ;;  %v1950_v54 = vrot.slane %v1948_v1, 2 }
 0x383   : > { %v1845_v61 = vshrl.u32 %v1843_v3, 16  ;;  %2130 = vrot.lane.b32.xlu1 %v2129_v11, %s3149_s12  ;;  %1958 = vrot.lane.b32.xlu0 %v1957_v21, %s3151_s16  ;;  %v1848_v0 = vshll.u32 %v1843_v3, 16  ;;  %v1833_v52 = vor.u32 %v1832_v28, %v1829_v57  ;;  %v1883_v31 = vrot.slane %v1881_v58, 7  ;;  %v1909_v23 = vld [vmem:[#allocation3 + $0x8] sm:$0xc]  ;;  %v3131_v11 = vld [vmem:[%s4138_s7 + $0x10] sm:$0xff]  }
 0x384   : > { %v1870_v63 = vrot.slane %v1869_v9, 4  ;;  %v3910_v60 = vcombine.low %v1909_v23, %v1910_v42  ;;  %v1893_v40 = vld [vmem:[#allocation3 + $0x2c] sm:$0x1]  ;;  %v1858_v57 = vld [vmem:[#allocation3 + $0x20] sm:$0x7]  ;;  %v2123_v28 = vor.u32 %v2122_v24, %v3866_v36  ;;  %v2074_v58 = vor.u32 %v2073_v15, %v2072_v17  ;;  %2563 = vmatpush1.bf16.msra.mxu0 %v3131_v11 }
 0x385   : > { %v1847_v30 = vrot.slane %v1845_v61, 5  ;;  %v1850_v38 = vrot.slane %v1848_v0, 6  ;;  %v1834_v8 = vrot.slane %v1833_v52, 4  ;;  %v1886_v22 = vor.u32 %v1884_v35, %v1883_v31  ;;  %1875 = vst [vmem:[#allocation3 + $0x20] sm:$0x8] %v1874_v48  ;;  %2564 = vmatprep.subr.bf16.mxu0 %v3146_v6  ;;  %v3134_v20 = vld [vmem:[%s4138_s7 + $0x40] sm:$0xff]  }
 0x386   : > { %v1887_v45 = vrot.slane %v1883_v31, 4  ;;  %v1945_v21 = vshrl.u32 %v3887_v55, 16  ;;  %v1877_v12 = vsel %vm3306_vm8, %v1870_v63, %v1876_v37  ;;  %v2003_v3 = vrot.slane %v1948_v1, 1  ;;  %v3133_v31 = vld [vmem:[%s4138_s7] sm:$0xff]   ;;  %v2363_v17 = vld [vmem:[#allocation3 + $0x2c] sm:$0xc] }
 0x387   : > { %2138 = vrot.lane.b32.xlu1 %v2137_v50, %s3151_s16  ;;  %2084 = vrot.lane.b32.xlu0 %v2083_v7, %s3150_s13  ;;  %v1851_v16 = vor.u32 %v1850_v38, %v1847_v30  ;;  %1878 = vst [vmem:[#allocation3 + $0x24] sm:$0xf] %v1877_v12  ;;  %v1838_v61 = vsel %vm3312_vm5, %v1833_v52, %v1837_v51  ;;  %v2010_v7 = vrot.slane %v3910_v60, 1  ;;  %v2090_v13 = vshrl.u32 %v2919_v43, 16  ;;  %vm4224_vm5 = vmmov %vm4220_vm1 }
 0x388   : > { %v1841_v62 = vsel %vm3325_vm13, %v1834_v8, %v1840_v49  ;;  %v1891_v32 = vsel %vm3319_vm0, %v1886_v22, %v1890_v18  ;;  %1839 = vst [vmem:[#allocation3 + $0x18] sm:$0xe] %v1838_v61  ;;  %v1894_v36 = vsel %vm3339_vm2, %v1887_v45, %v1893_v40  ;;  %v2913_v33 = vcombine.low %v1909_v23, %v3833_v29  ;;  %vm4221_vm0 = vmmov %vm4219_vm6 }
 0x389   : > { %v1852_v4 = vrot.slane %v1851_v16, 4  ;;  %v1856_v59 = vsel %vm3333_vm12, %v1851_v16, %v1855_v41  ;;  %1842 = vst [vmem:[#allocation3 + $0x1c] sm:$0x3] %v1841_v62  ;;  %1892 = vst [vmem:[#allocation3 + $0x28] sm:$0xf] %v1891_v32  ;;  %v1947_v39 = vrot.slane %v1945_v21, 1  ;;  %v2004_v56 = vor.u32 %v2003_v3, %v1945_v21  ;;  %2565 = vmatpush1.bf16.msra.mxu0 %v3132_v25 }
 0x38a   : > { %1857 = vst [vmem:[#allocation3 + $0x1c] sm:$0xc] %v1856_v59  ;;  %1895 = vst [vmem:[#allocation3 + $0x2c] sm:$0x1] %v1894_v36  ;;  %v2093_v47 = vshll.u32 %v2919_v43, 16  ;;  %2566 = vmatprep.subr.bf16.mxu0 %v3146_v6  ;;  %v2018_v9 = vrot.slane %v3843_v10, 2 }
 0x38b   : > { %2040 = vrot.lane.b32.xlu1 %v2039_v2, %s3152_s25  ;;  %2189 = vrot.lane.b32.xlu0 %v2188_v44, %s3147_s27  ;;  %v1859_v19 = vsel %vm4215_vm14, %v1852_v4, %v1858_v57  ;;  %v1951_v0 = vor.u32 %v1950_v54, %v1947_v39  ;;  %v2132_v50 = vrot.slane %v2090_v13, 5  ;;  %v1972_v29 = vshrl.u32 %v2913_v33, 16  ;;  %v3953_v44 = vld [vmem:[#allocation3 + $0x30] sm:$0x3]  ;;  %vm4222_vm4 = vmmov %vm4221_vm0 }
 0x38c   : > { %1860 = vst [vmem:[#allocation3 + $0x20] sm:$0x7] %v1859_v19  ;;  %v2133_v27 = vrot.slane %v2093_v47, 6  ;;  %v1975_v52 = vshll.u32 %v2913_v33, 16  ;;  %v1965_v55 = vrot.slane %v3910_v60, 2  ;;  %v2066_v35 = vrot.slane %v3843_v10, 1  ;;  %vm4223_vm8 = vmmov %vm4221_vm0 }
 0x38d   : > { %v2013_v38 = vrot.slane %v1972_v29, 1  ;;  %2567 = vmatpush1.bf16.msra.mxu0 %v3133_v31  ;;  %v1974_v37 = vrot.slane %v1972_v29, 2  ;;  %v2092_v63 = vrot.slane %v2090_v13, 6  ;;  %v2095_v16 = vrot.slane %v2093_v47, 7  ;;  %v2242_v49 = vld [vmem:[#allocation3 + $0x20] sm:$0x8]  ;;  %vm4227_vm2 = vmmov %vm4220_vm1 }
 0x38e   : > { %v2134_v30 = vor.u32 %v2133_v27, %v2132_v50  ;;  %v2014_v41 = vrot.slane %v1975_v52, 2  ;;  %v1977_v46 = vrot.slane %v1975_v52, 3  ;;  %2582 = vmatprep.subr.bf16.mxu0 %v3146_v6  ;;  %v2243_v22 = vld [vmem:[#allocation3 + $0x24] sm:$0x7]  ;;  %v2935_v10 = vcombine.low %v2363_v17, %v3953_v44  ;;  %vm4228_vm14 = vmmov %vm4220_vm1 }
 0x38f   : > { %2124 = vrot.lane.b32.xlu1 %v2123_v28, %s3148_s28  ;;  %2075 = vrot.lane.b32.xlu0 %v2074_v58, %s3153_s15  ;;  %v2121_v2 = vld [vmem:[#allocation3 + $0x18] sm:$0xc]  ;;  %v2096_v59 = vor.u32 %v2095_v16, %v2092_v63  ;;  %v2184_v23 = vrot.slane %v2093_v47, 1  ;;  %v3967_v11 = vcombine.low %v2242_v49, %v2243_v22  ;;  %v2244_v43 = vld [vmem:[#allocation3 + $0x24] sm:$0xf]  ;;  %v2937_v40 = vrot.slane %v3871_v34, 9 }
 0x390   : > { %v2120_v24 = vld [vmem:[#allocation3 + $0x1c] sm:$0x3]  ;;  %v2015_v15 = vor.u32 %v2014_v41, %v2013_v38  ;;  %v2303_v51 = vld [vmem:[#allocation3 + $0x28] sm:$0xe]  ;;  %v1978_v4 = vor.u32 %v1977_v46, %v1974_v37  ;;  %v2941_v48 = vrot.slane %v2935_v10, 14  ;;  %v2929_v57 = vcombine.low %v2244_v43, %v2244_v43 }
 0x391   : > { %v3956_v42 = vld [vmem:[#allocation3 + $0x2c] sm:$0x1]  ;;  %2583 = vmatpush2.bf16.msra.mxu0 %v3134_v20  ;;  %v2183_v1 = vld [vmem:[#allocation3 + $0x1c] sm:$0x8]  ;;  %v2923_v18 = vcombine.low %v2121_v2, %v2120_v24  ;;  %v2185_v12 = vor.u32 %v2184_v23, %v2090_v13  ;;  %v2268_v3 = vrot.slane %v3967_v11, 2  ;;  %v2062_v61 = vrot.slane %v1975_v52, 1 }
 0x392   : > { %v2932_v6 = vcombine.low %v2303_v51, %v3956_v42  ;;  %v2119_v62 = vld [vmem:[#allocation3 + $0x1c] sm:$0x1]  ;;  %v2118_v34 = vld [vmem:[#allocation3 + $0x18] sm:$0xe]  ;;  %v2368_v33 = vrot.slane %v2929_v57, 5  ;;  %v2311_v54 = vrot.slane %v3967_v11, 1  ;;  %v2928_v13 = vcombine.low %v2242_v49, %v2244_v43 }
 0x393   : > { %2011 = vrot.lane.b32.xlu1 %v2010_v7, %s3149_s12  ;;  %2005 = vrot.lane.b32.xlu0 %v2004_v56, %s3148_s28  ;;  %v3958_v8 = vld [vmem:[#allocation3 + $0x20] sm:$0x7]  ;;  %v2938_v28 = vrot.slane %v2923_v18, 14  ;;  %v2063_v25 = vor.u32 %v2062_v61, %v1972_v29  ;;  %v3985_v39 = vcombine.low %v2118_v34, %v2119_v62  ;;  %v2301_v56 = vld [vmem:[#allocation3 + $0x28] sm:$0xf]  ;;  %v2319_v47 = vrot.slane %v2929_v57, 6 }
 0x394   : > { %v3965_v45 = vcombine.low %v2183_v1, %v3958_v8  ;;  %v2940_v21 = vrot.slane %v2932_v6, 9  ;;  %v2922_v50 = vcombine.low %v2118_v34, %v2120_v24  ;;  %v2275_v52 = vshrl.u32 %v2928_v13, 16  ;;  %v2181_v49 = vld [vmem:[#allocation3 + $0x20] sm:$0x3]  ;;  %v2360_v62 = vld [vmem:[#allocation3 + $0x2c] sm:$0xe] }
 0x395   : > { %v3975_v32 = vsel %vm4221_vm0, %v2937_v40, %v2938_v28  ;;  %v2145_v7 = vrot.slane %v3985_v39, 6  ;;  %v2191_v27 = vrot.slane %v3985_v39, 1  ;;  %v2278_v31 = vshll.u32 %v2928_v13, 16  ;;  %v2361_v13 = vld [vmem:[#allocation3 + $0x30] sm:$0x1] }
 0x396   : > { %v2226_v58 = vrot.slane %v3965_v45, 3  ;;  %v3981_v19 = vsel %vm4223_vm8, %v2940_v21, %v2941_v48  ;;  %v2379_v38 = vrot.slane %v2932_v6, 6  ;;  %v2314_v41 = vrot.slane %v2275_v52, 1  ;;  %v2180_v6 = vld [vmem:[#allocation3 + $0x1c] sm:$0xc] }
 0x397   : > { %2019 = vrot.lane.b32.xlu1 %v2018_v9, %s3151_s16  ;;  %1952 = vrot.lane.b32.xlu0 %v1951_v0, %s3153_s15  ;;  %v2249_v9 = vrot.slane %v2923_v18, 1  ;;  %v3993_v0 = vcombine.low %v2301_v56, %v2301_v56  ;;  %v2315_v20 = vrot.slane %v2278_v31, 2  ;;  %v2280_v17 = vrot.slane %v2278_v31, 3 }
 0x398   : > { %v3978_v36 = vsel %vm4222_vm4, %v2226_v58, %v2929_v57  ;;  %v2152_v37 = vshrl.u32 %v2922_v50, 16  ;;  %v2364_v24 = vrot.slane %v2278_v31, 1  ;;  %v4008_v23 = vcombine.low %v2180_v6, %v2181_v49 }
 0x399   : > { %v2371_v29 = vrot.slane %v3993_v0, 5  ;;  %v2316_v46 = vor.u32 %v2315_v20, %v2314_v41  ;;  %v2925_v43 = vcombine.low %v2180_v6, %v3958_v8  ;;  %v2260_v8 = vrot.slane %v3965_v45, 2  ;;  %v1926_v41 = vpop.permute.xlu0 %1925 }
 0x39a   : > { %v2365_v10 = vor.u32 %v2364_v24, %v2275_v52  ;;  %v2154_v2 = vrot.slane %v2152_v37, 6  ;;  %v2207_v57 = vrot.slane %v4008_v23, 2  ;;  %v2252_v28 = vrot.slane %v4008_v23, 1 }
 0x39b   : > { %2135 = vrot.lane.b32.xlu1 %v2134_v30, %s3153_s15  ;;  %1966 = vrot.lane.b32.xlu0 %v1965_v55, %s3150_s13  ;;  %v2155_v30 = vshll.u32 %v2922_v50, 16  ;;  %v2199_v55 = vrot.slane %v2923_v18, 2  ;;  %v2931_v18 = vcombine.low %v2301_v56, %v3956_v42  ;;  %v2217_v58 = vshll.u32 %v2925_v43, 16 }
 0x39c   : > { %v2325_v56 = vrot.slane %v3993_v0, 6  ;;  %vm4225_vm13 = vcmask 261120   ;;  %vm4226_vm12 = vcmask 392192   ;;  %vm4235_vm6 = vcmask 654336  }
 0x39d   : > { %v2245_v16 = vrot.slane %v2155_v30, 1  ;;  %v2195_v51 = vrot.slane %v2155_v30, 2  ;;  %v2157_v1 = vrot.slane %v2155_v30, 7  ;;  %v2332_v48 = vshrl.u32 %v2931_v18, 16  ;;  %vm4229_vm15 = vmmov %vm4225_vm13 }
 0x39e   : > { %v2335_v40 = vshll.u32 %v2931_v18, 16  ;;  %v2304_v61 = vrot.slane %v2217_v58, 1  ;;  %vm4230_vm3 = vmmov %vm4225_vm13  ;;  %vm4237_vm0 = vcmask 785408   ;;  %vm4239_vm8 = vcmask 916480  }
 0x39f   : > { %2016 = vrot.lane.b32.xlu1 %v2015_v15, %s3153_s15  ;;  %2067 = vrot.lane.b32.xlu0 %v2066_v35, %s3147_s27  ;;  %v2277_v35 = vrot.slane %v2275_v52, 2  ;;  %v2194_v15 = vrot.slane %v2152_v37, 1  ;;  %v2246_v22 = vor.u32 %v2245_v16, %v2152_v37  ;;  %v2374_v42 = vrot.slane %v2332_v48, 5  ;;  %vm4231_vm10 = vmmov %vm4226_vm12 }
 0x3a0   : > { %v2375_v21 = vrot.slane %v2335_v40, 6  ;;  %vm4233_vm7 = vmmov %vm4231_vm10 }
 0x3a1   : > { %v2281_v63 = vor.u32 %v2280_v17, %v2277_v35  ;;  %v1932_v35 = vpop.permute.xlu0 %1931  ;;  %vm4236_vm1 = vmmov %vm4235_vm6 }
 0x3a2   : > { %vm4238_vm4 = vmmov %vm4237_vm0 }
 0x3a3   : > { %1979 = vrot.lane.b32.xlu1 %v1978_v4, %s3152_s25  ;;  %2097 = vrot.lane.b32.xlu0 %v2096_v59, %s3152_s25  ;;  %v2196_v4 = vor.u32 %v2195_v51, %v2194_v15  ;;  %v2158_v59 = vor.u32 %v2157_v1, %v2154_v2 }
 0x3a7   : > { %2186 = vrot.lane.b32.xlu0 %v2185_v12, %s3148_s28  ;;  %2269 = vrot.lane.b32.xlu1 %v2268_v3, %s3150_s13  ;;  %v2308_v12 = vrot.slane %v3965_v45, 1  ;;  %v2214_v3 = vshrl.u32 %v2925_v43, 16  ;;  %v2334_v45 = vrot.slane %v2332_v48, 6 }
 0x3a9   : > { %v2305_v34 = vor.u32 %v2304_v61, %v2214_v3  ;;  %v2216_v50 = vrot.slane %v2214_v3, 2 }
 0x3ab   : > { %2064 = vrot.lane.b32.xlu0 %v2063_v25, %s3148_s28  ;;  %2369 = vrot.lane.b32.xlu1 %v2368_v33, %s3147_s27  ;;  %v2376_v25 = vor.u32 %v2375_v21, %v2374_v42  ;;  %v2255_v33 = vrot.slane %v2214_v3, 1 }
 0x3af   : > { %2312 = vrot.lane.b32.xlu0 %v2311_v54, %s3149_s12  ;;  %2146 = vrot.lane.b32.xlu1 %v2145_v7, %s3150_s13  ;;  %v2256_v54 = vrot.slane %v2217_v58, 2  ;;  %v2934_v7 = vcombine.low %v2360_v62, %v3953_v44 }
 0x3b1   : > { %v2394_v52 = vshrl.u32 %v2934_v7, 16  ;;  %v2397_v31 = vshll.u32 %v2934_v7, 16 }
 0x3b3   : > { %2320 = vrot.lane.b32.xlu0 %v2319_v47, %s3151_s16  ;;  %2250 = vrot.lane.b32.xlu1 %v2249_v9, %s3147_s27  ;;  %v2257_v47 = vor.u32 %v2256_v54, %v2255_v33  ;;  %v2337_v9 = vrot.slane %v2335_v40, 7  ;;  %v2396_v0 = vrot.slane %v2394_v52, 6 }
 0x3b5   : > { %v2338_v30 = vor.u32 %v2337_v9, %v2334_v45 }
 0x3b7   : > { %2192 = vrot.lane.b32.xlu0 %v2191_v27, %s3149_s12  ;;  %2372 = vrot.lane.b32.xlu1 %v2371_v29, %s3149_s12  ;;  %v2219_v27 = vrot.slane %v2217_v58, 3  ;;  %v2933_v29 = vcombine.low %v2360_v62, %v2361_v13  ;;  %v1987_v58 = vsel %vm4228_vm14, %v3780_v5, %v1926_v41  ;;  %vm4243_vm14 = vmmov %vm4230_vm3 }
 0x3b9   : > { %v2387_v44 = vrot.slane %v2933_v29, 6 }
 0x3bb   : > { %2200 = vrot.lane.b32.xlu0 %v2199_v55, %s3151_s16  ;;  %2380 = vrot.lane.b32.xlu1 %v2379_v38, %s3151_s16  ;;  %v2220_v55 = vor.u32 %v2219_v27, %v2216_v50  ;;  %v2399_v38 = vrot.slane %v2397_v31, 7 }
 0x3bd   : > { %v2400_v20 = vor.u32 %v2399_v38, %v2396_v0 }
 0x3bf   : > { %2317 = vrot.lane.b32.xlu0 %v2316_v46, %s3153_s15  ;;  %2282 = vrot.lane.b32.xlu1 %v2281_v63, %s3152_s25 }
 0x3c3   : > { %2247 = vrot.lane.b32.xlu0 %v2246_v22, %s3148_s28  ;;  %2366 = vrot.lane.b32.xlu1 %v2365_v10, %s3148_s28 }
 0x3c7   : > { %2197 = vrot.lane.b32.xlu0 %v2196_v4, %s3153_s15  ;;  %2159 = vrot.lane.b32.xlu1 %v2158_v59, %s3152_s25 }
 0x3cb   : > { %2208 = vrot.lane.b32.xlu0 %v2207_v57, %s3150_s13  ;;  %2253 = vrot.lane.b32.xlu1 %v2252_v28, %s3149_s12 }
 0x3cf   : > { %2309 = vrot.lane.b32.xlu0 %v2308_v12, %s3147_s27  ;;  %2261 = vrot.lane.b32.xlu1 %v2260_v8, %s3151_s16 }
 0x3d3   : > { %2306 = vrot.lane.b32.xlu0 %v2305_v34, %s3148_s28  ;;  %2377 = vrot.lane.b32.xlu1 %v2376_v25, %s3153_s15 }
 0x3d7   : > { %2326 = vrot.lane.b32.xlu0 %v2325_v56, %s3150_s13  ;;  %2258 = vrot.lane.b32.xlu1 %v2257_v47, %s3153_s15  ;;  %s2966_s15 = sshll.u32 %s4290_s18, 6 }
 0x3d8   : > { %s386_s26 = scalar_lea.vmem %s4142_s11, %s2966_s15 }
 0x3db   : > { %2339 = vrot.lane.b32.xlu0 %v2338_v30, %s3152_s25  ;;  %2221 = vrot.lane.b32.xlu1 %v2220_v55, %s3152_s25 }
 0x3df   : > { %2388 = vrot.lane.b32.xlu1 %v2387_v44, %s3150_s13 }
 0x3e3   : > { %2401 = vrot.lane.b32.xlu1 %v2400_v20, %s3152_s25 }
 0x3e9   : > { %v2028_v17 = vpop.permute.xlu1 %2027  ;;  %v2071_v37 = vpop.permute.xlu0 %2070 }
 0x3ed   : > { %v2128_v46 = vpop.permute.xlu1 %2127  ;;  %v2079_v63 = vpop.permute.xlu0 %2078 }
 0x3f1   : > { %v2009_v16 = vpop.permute.xlu1 %2008  ;;  %v1940_v24 = vpop.permute.xlu0 %1939 }
 0x3f5   : > { %v2131_v15 = vpop.permute.xlu1 %2130  ;;  %v1959_v51 = vpop.permute.xlu0 %1958 }
 0x3f9   : > { %v2139_v22 = vpop.permute.xlu1 %2138  ;;  %v2085_v10 = vpop.permute.xlu0 %2084 }
 0x3fd   : > { %v2041_v2 = vpop.permute.xlu1 %2040  ;;  %v4031_v1 = vpop.permute.xlu0 %2189 }
 0x401   : > { %v2125_v49 = vpop.permute.xlu1 %2124  ;;  %v2076_v18 = vpop.permute.xlu0 %2075 }
 0x402   : > { %v2167_v6 = vsel %vm4224_vm5, %v3817_v26, %v2125_v49  ;;  %v1989_v26 = vsel %vm4230_vm3, %v1987_v58, %v1932_v35  ;;  %vm4240_vm5 = vmmov %vm4239_vm8 }
 0x403   : > { %v2169_v4 = vsel %vm4225_vm13, %v2167_v6, %v2128_v46  ;;  %v1991_v8 = vsel %vm4231_vm10, %v1989_v26, %v1940_v24  ;;  %vm4241_vm13 = vcmask 1043456   ;;  %vm4245_vm3 = vmmov %vm4234_vm9 }
 0x404   : > { %v2171_v59 = vsel %vm4226_vm12, %v2169_v4, %v2131_v15  ;;  %vm4242_vm12 = vmmov %vm4227_vm2 }
 0x405   : > { %v2012_v43 = vpop.permute.xlu1 %2011  ;;  %v2006_v48 = vpop.permute.xlu0 %2005  ;;  %vm4246_vm10 = vmmov %vm4236_vm1 }
 0x406   : > { %v2046_v28 = vsel %vm4227_vm2, %v3837_v14, %v2006_v48 }
 0x407   : > { %v2048_v12 = vsel %vm4229_vm15, %v2046_v28, %v2009_v16  ;;  %vm4244_vm15 = vmmov %vm4233_vm7 }
 0x408   : > { %v2050_v62 = vsel %vm4233_vm7, %v2048_v12, %v2012_v43  ;;  %vm4248_vm7 = vmmov %vm4237_vm0 }
 0x409   : > { %v2020_v40 = vpop.permute.xlu1 %2019  ;;  %v1953_v57 = vpop.permute.xlu0 %1952 }
 0x40a   : > { %v1993_v3 = vsel %vm4232_vm11, %v1991_v8, %v1953_v57  ;;  %vm4247_vm11 = vmmov %vm4245_vm3 }
 0x40b   : > { %v1995_v5 = vsel %vm4236_vm1, %v1993_v3, %v1959_v51 }
 0x40d   : > { %v2136_v42 = vpop.permute.xlu1 %2135  ;;  %v1967_v21 = vpop.permute.xlu0 %1966 }
 0x40e   : > { %v1997_v54 = vsel %vm4238_vm4, %v1995_v5, %v1967_v21  ;;  %vm4253_vm4 = vmmov %vm4241_vm13 }
 0x411   : > { %v2017_v61 = vpop.permute.xlu1 %2016  ;;  %v2068_v34 = vpop.permute.xlu0 %2067 }
 0x412   : > { %v2052_v25 = vsel %vm4234_vm9, %v2050_v62, %v2017_v61  ;;  %vm4249_vm9 = vmmov %vm4236_vm1 }
 0x413   : > { %v2054_v14 = vsel %vm4235_vm6, %v2052_v25, %v2020_v40  ;;  %vm4250_vm6 = vmmov %vm4240_vm5 }
 0x414   : > { %v2056_v33 = vsel %vm4237_vm0, %v2054_v14, %v2028_v17  ;;  %vm4251_vm1 = vmmov %vm4237_vm0 }
 0x415   : > { %v2058_v7 = vsel %vm4239_vm8, %v2056_v33, %v2041_v2  ;;  %v1980_v56 = vpop.permute.xlu1 %1979  ;;  %v2098_v45 = vpop.permute.xlu0 %2097  ;;  %vm4252_vm0 = vmmov %vm4240_vm5 }
 0x416   : > { %v1999_v13 = vsel %vm4240_vm5, %v1997_v54, %v1980_v56  ;;  %v2423_v47 = vrot.slane %v2058_v7, 5  ;;  %vm4254_vm8 = vmmov %vm4227_vm2 }
 0x417   : > { %vm4255_vm5 = vmmov %vm4227_vm2 }
 0x418   : > { %v2441_v9 = vsel %vm4241_vm13, %v1999_v13, %v2423_v47  ;;  %vm4256_vm13 = vmmov %vm4227_vm2 }
 0x419   : > { %v2270_v50 = vpop.permute.xlu1 %2269  ;;  %2585 = vmatmul.mubr.bf16.vlgmr.msra.gmra.mxu0 %v2441_v9  ;;  %v2187_v27 = vpop.permute.xlu0 %2186 }
 0x41a   : > { %2953 = vmatprep.mubr.msk.bf16.mxu0 %vm4242_vm12, %v3975_v32  ;;  %v2229_v58 = vsel %vm4255_vm5, %v3839_v53, %v2187_v27  ;;  %vm4257_vm12 = vmmov %vm4227_vm2 }
 0x41d   : > { %v2370_v29 = vpop.permute.xlu1 %2369  ;;  %v2065_v52 = vpop.permute.xlu0 %2064 }
 0x41e   : > { %v2105_v31 = vsel %vm4227_vm2, %v3910_v60, %v2065_v52  ;;  %v2173_v60 = vsel %vm4247_vm11, %v2171_v59, %v2136_v42  ;;  %vm4258_vm2 = vmmov %vm4243_vm14 }
 0x41f   : > { %v2107_v30 = vsel %vm4243_vm14, %v2105_v31, %v2068_v34  ;;  %v2175_v49 = vsel %vm4249_vm9, %v2173_v60, %v2139_v22  ;;  %v2231_v8 = vsel %vm4258_vm2, %v2229_v58, %v4031_v1  ;;  %vm4259_vm14 = vmmov %vm4258_vm2 }
 0x420   : > { %v2109_v55 = vsel %vm4244_vm15, %v2107_v30, %v2071_v37 }
 0x421   : > { %v2111_v44 = vsel %vm4245_vm3, %v2109_v55, %v2076_v18  ;;  %v2147_v0 = vpop.permute.xlu1 %2146  ;;  %v2313_v38 = vpop.permute.xlu0 %2312  ;;  %vm4260_vm3 = vmmov %vm4258_vm2 }
 0x422   : > { %v2113_v41 = vsel %vm4246_vm10, %v2111_v44, %v2079_v63  ;;  %v2177_v63 = vsel %vm4251_vm1, %v2175_v49, %v2147_v0  ;;  %vm4261_vm10 = vmmov %vm4247_vm11  ;;  %vm4266_vm1 = vcmask 654336  }
 0x423   : > { %v2115_v37 = vsel %vm4248_vm7, %v2113_v41, %v2085_v10  ;;  %vm4262_vm11 = vmmov %vm4244_vm15 }
 0x424   : > { %v2117_v18 = vsel %vm4250_vm6, %v2115_v37, %v2098_v45  ;;  %vm4263_vm7 = vmmov %vm4255_vm5 }
 0x425   : > { %v2251_v20 = vpop.permute.xlu1 %2250  ;;  %v2321_v35 = vpop.permute.xlu0 %2320  ;;  %v2426_v40 = vrot.slane %v2117_v18, 2  ;;  %vm4264_vm9 = vmmov %vm4262_vm11 }
 0x426   : > { %vm4265_vm6 = vmmov %vm4261_vm10 }
 0x429   : > { %v2373_v17 = vpop.permute.xlu1 %2372  ;;  %v2193_v46 = vpop.permute.xlu0 %2192 }
 0x42d   : > { %v2381_v32 = vpop.permute.xlu1 %2380  ;;  %v2201_v16 = vpop.permute.xlu0 %2200 }
 0x431   : > { %v2283_v24 = vpop.permute.xlu1 %2282  ;;  %v2318_v15 = vpop.permute.xlu0 %2317 }
 0x435   : > { %v2367_v51 = vpop.permute.xlu1 %2366  ;;  %v2248_v2 = vpop.permute.xlu0 %2247 }
 0x436   : > { %v2288_v42 = vsel %vm4256_vm13, %v3985_v39, %v2248_v2  ;;  %v2409_v39 = vsel %vm4263_vm7, %v3967_v11, %v2367_v51  ;;  %vm4271_vm13 = vmmov %vm4265_vm6 }
 0x437   : > { %v2290_v61 = vsel %vm4260_vm3, %v2288_v42, %v2251_v20  ;;  %vm4276_vm3 = vcmask 1043456  }
 0x439   : > { %v2160_v6 = vpop.permute.xlu1 %2159  ;;  %v2198_v4 = vpop.permute.xlu0 %2197 }
 0x43a   : > { %v2179_v43 = vsel %vm4252_vm0, %v2177_v63, %v2160_v6  ;;  %vm4267_vm0 = vmmov %vm4266_vm1 }
 0x43b   : > { %v2429_v48 = vrot.slane %v2179_v43, 7 }
 0x43d   : > { %v2254_v57 = vpop.permute.xlu1 %2253  ;;  %v2209_v28 = vpop.permute.xlu0 %2208  ;;  %v2448_v59 = vsel %vm4253_vm4, %v2426_v40, %v2429_v48  ;;  %vm4268_vm4 = vcmask 785408  }
 0x43e   : > { %2593 = vmatmul.mubr.bf16.gmra.mxu0 %v2448_v59  ;;  %v2292_v53 = vsel %vm4262_vm11, %v2290_v61, %v2254_v57  ;;  %vm4270_vm5 = vmmov %vm4268_vm4 }
 0x43f   : > { %2954 = vmatprep.mubr.msk.bf16.mxu0 %vm4254_vm8, %v3978_v36  ;;  %v2233_v36 = vsel %vm4244_vm15, %v2231_v8, %v2193_v46  ;;  %vm4269_vm8 = vmmov %vm4258_vm2  ;;  %v3137_v46 = vld [vmem:[%s4140_s9] sm:$0xff]  }
 0x440   : > { %v2235_v62 = vsel %vm4261_vm10, %v2233_v36, %v2198_v4  ;;  %v2411_v54 = vsel %vm4269_vm8, %v2409_v39, %v2370_v29  ;;  %vm4275_vm15 = vmmov %vm4267_vm0 }
 0x441   : > { %v2262_v10 = vpop.permute.xlu1 %2261  ;;  %v2310_v22 = vpop.permute.xlu0 %2309  ;;  %v2237_v5 = vsel %vm4267_vm0, %v2235_v62, %v2201_v16  ;;  %vm4277_vm10 = vmmov %vm4265_vm6 }
 0x442   : > { %v2239_v7 = vsel %vm4270_vm5, %v2237_v5, %v2209_v28  ;;  %vm4278_vm11 = vmmov %vm4263_vm7 }
 0x443   : > { %vm4279_vm7 = vmmov %vm4268_vm4 }
 0x445   : > { %v2378_v21 = vpop.permute.xlu1 %2377  ;;  %v2307_v12 = vpop.permute.xlu0 %2306 }
 0x446   : > { %v2347_v26 = vsel %vm4257_vm12, %v4008_v23, %v2307_v12  ;;  %vm4272_vm12 = vcmask 916480  }
 0x447   : > { %v2349_v3 = vsel %vm4259_vm14, %v2347_v26, %v2310_v22  ;;  %vm4273_vm2 = vmmov %vm4272_vm12 }
 0x448   : > { %v2351_v25 = vsel %vm4264_vm9, %v2349_v3, %v2313_v38  ;;  %vm4274_vm14 = vmmov %vm4264_vm9 }
 0x449   : > { %v2259_v34 = vpop.permute.xlu1 %2258  ;;  %v2327_v14 = vpop.permute.xlu0 %2326  ;;  %v2353_v56 = vsel %vm4271_vm13, %v2351_v25, %v2318_v15  ;;  %v2413_v9 = vsel %vm4274_vm14, %v2411_v54, %v2373_v17  ;;  %vm4280_vm9 = vmmov %vm4273_vm2  ;;  %vm4285_vm13 = vcmask 261120  }
 0x44a   : > { %v2294_v23 = vsel %vm4265_vm6, %v2292_v53, %v2259_v34  ;;  %v2355_v27 = vsel %vm4275_vm15, %v2353_v56, %v2321_v35  ;;  %vm4281_vm6 = vmmov %vm4267_vm0 }
 0x44b   : > { %v2296_v1 = vsel %vm4266_vm1, %v2294_v23, %v2262_v10  ;;  %v2357_v30 = vsel %vm4279_vm7, %v2355_v27, %v2327_v14  ;;  %vm4282_vm1 = vmmov %vm4268_vm4 }
 0x44c   : > { %v2298_v33 = vsel %vm4268_vm4, %v2296_v1, %v2270_v50  ;;  %v2415_v50 = vsel %vm4277_vm10, %v2413_v9, %v2378_v21  ;;  %vm4283_vm0 = vmmov %vm4273_vm2 }
 0x44d   : > { %v2222_v45 = vpop.permute.xlu1 %2221  ;;  %v2300_v11 = vsel %vm4272_vm12, %v2298_v33, %v2283_v24  ;;  %v2340_v31 = vpop.permute.xlu0 %2339  ;;  %v2417_v44 = vsel %vm4281_vm6, %v2415_v50, %v2381_v32  ;;  %vm4284_vm4 = vmmov %vm4276_vm3  ;;  %v2942_v32 = vld [vmem:[%s4139_s8] ss:$0 sm:$0xff] }
 0x44e   : > { %v2241_v13 = vsel %vm4273_vm2, %v2239_v7, %v2222_v45  ;;  %v2432_v47 = vrot.slane %v2300_v11, 5  ;;  %v2359_v55 = vsel %vm4280_vm9, %v2357_v30, %v2340_v31  ;;  %vm4286_vm14 = vmmov %vm4285_vm13 }
 0x44f   : > { %v2435_v20 = vrot.slane %v2359_v55, 2  ;;  %vm4287_vm10 = vmmov %vm4285_vm13 }
 0x450   : > { %v2454_v52 = vsel %vm4276_vm3, %v2241_v13, %v2432_v47  ;;  %vm4288_vm9 = vmmov %vm4287_vm10  ;;  %v2956_v13 = vld [vmem:[%s4141_s10] ss:$0 sm:$0xff] }
 0x451   : > { %v2389_v29 = vpop.permute.xlu1 %2388  ;;  %2601 = vmatmul.mubr.bf16.gmra.mxu0 %v2454_v52 }
 0x452   : > { %2955 = vmatprep.mubr.msk.bf16.mxu0 %vm4278_vm11, %v3981_v19  ;;  %v2419_v0 = vsel %vm4282_vm1, %v2417_v44, %v2389_v29  ;;  %v3136_v19 = vld [vmem:[%s4140_s9 + $0x8] sm:$0xff]  }
 0x453   : > { %3033 = vmatprep.subr.bf16.mxu1 %v3136_v19 }
 0x454   : > { %3034 = vmatpush3.bf16.msra.mxu1 %v3136_v19 }
 0x455   : > { %v2402_v38 = vpop.permute.xlu1 %2401  ;;  %3035 = vmatprep.subr.bf16.mxu1 %v3137_v46 }
 0x456   : > { %v2421_v41 = vsel %vm4283_vm0, %v2419_v0, %v2402_v38 }
 0x457   : > { %v2438_v35 = vrot.slane %v2421_v41, 7 }
 0x458   : > { %3036 = vmatpush3.bf16.msra.mxu1 %v3137_v46 }
 0x459   : > { %v2461_v17 = vsel %vm4284_vm4, %v2435_v20, %v2438_v35 }
 0x45a   : > { %2609 = vmatmul.mubr.bf16.gmra.mxu0 %v2461_v17 }
 0x4d9   : > { %v2586_v16 = vpop.f32.mrf.mxu0 }
 0x4da   : > { %v2587_v24 = vadd.f32 %v2942_v32, %v2586_v16 }
 0x4db   : > { %v2588_v15 = vpop.f32.mrf.mxu0 }
 0x4dc   : > { %v2625_v51 = vmul.f32 0.1, %v2587_v24  ;;  %vm2617_vm8 = vcmp.gt.f32.partialorder %v2587_v24, 0.0 }
 0x4dd   : > { %v2589_v60 = vpop.f32.mrf.mxu0 }
 0x4de   : > { %v2590_v2 = vadd.f32 %v2942_v32, %v2589_v60  ;;  %v2633_v18 = vsel %vm2617_vm8, %v2587_v24, %v2625_v51 }
 0x4df   : > { %v2591_v37 = vpop.f32.mrf.mxu0 }
 0x4e0   : > { %vm2618_vm5 = vcmp.gt.f32.partialorder %v2590_v2, 0.0  ;;  %v2626_v49 = vmul.f32 0.1, %v2590_v2 }
 0x4e2   : > { %v2634_v63 = vsel %vm2618_vm5, %v2590_v2, %v2626_v49 }
 0x4e3   : > { %v2641_v6 = vpack.c.bf16 %v2634_v63, %v2633_v18 }
 0x4e5   : > { %3037 = vmatprep.mubr.msk.bf16.mxu1 %vm4285_vm13, %v2641_v6 }
 0x4fe   : > { %v2594_v4 = vpop.f32.mrf.mxu0 }
 0x4ff   : > { %v2595_v43 = vadd.f32 %v2942_v32, %v2594_v4 }
 0x500   : > { %v2596_v48 = vpop.f32.mrf.mxu0 }
 0x501   : > { %v2627_v57 = vmul.f32 0.1, %v2595_v43  ;;  %vm2619_vm12 = vcmp.gt.f32.partialorder %v2595_v43, 0.0 }
 0x502   : > { %v2597_v40 = vpop.f32.mrf.mxu0 }
 0x503   : > { %v2598_v28 = vadd.f32 %v2942_v32, %v2597_v40  ;;  %v2635_v22 = vsel %vm2619_vm12, %v2595_v43, %v2627_v57 }
 0x504   : > { %v2599_v59 = vpop.f32.mrf.mxu0 }
 0x505   : > { %vm2620_vm2 = vcmp.gt.f32.partialorder %v2598_v28, 0.0  ;;  %v2628_v10 = vmul.f32 0.1, %v2598_v28 }
 0x507   : > { %v2636_v58 = vsel %vm2620_vm2, %v2598_v28, %v2628_v10 }
 0x508   : > { %v2642_v42 = vpack.c.bf16 %v2636_v58, %v2635_v22 }
 0x50a   : > { %3038 = vmatmul.mubr.msk.bf16.vlgmr.msra.gmra.mxu1 %vm4286_vm14, %v2642_v42 }
 0x511   : > { %v2602_v21 = vpop.f32.mrf.mxu0 }
 0x512   : > { %v2603_v12 = vadd.f32 %v2942_v32, %v2602_v21 }
 0x513   : > { %v2604_v26 = vpop.f32.mrf.mxu0 }
 0x514   : > { %v2629_v3 = vmul.f32 0.1, %v2603_v12  ;;  %vm2621_vm15 = vcmp.gt.f32.partialorder %v2603_v12, 0.0 }
 0x515   : > { %v2605_v8 = vpop.f32.mrf.mxu0 }
 0x516   : > { %v2606_v36 = vadd.f32 %v2942_v32, %v2605_v8  ;;  %v2637_v53 = vsel %vm2621_vm15, %v2603_v12, %v2629_v3 }
 0x517   : > { %v2607_v61 = vpop.f32.mrf.mxu0 }
 0x518   : > { %vm2622_vm3 = vcmp.gt.f32.partialorder %v2606_v36, 0.0  ;;  %v2630_v62 = vmul.f32 0.1, %v2606_v36 }
 0x51a   : > { %v2638_v34 = vsel %vm2622_vm3, %v2606_v36, %v2630_v62  ;;  %v2610_v39 = vpop.f32.mrf.mxu0 }
 0x51b   : > { %v2643_v25 = vpack.c.bf16 %v2638_v34, %v2637_v53  ;;  %v2611_v23 = vadd.f32 %v2942_v32, %v2610_v39 }
 0x51c   : > { %v2612_v1 = vpop.f32.mrf.mxu0 }
 0x51d   : > { %3041 = vmatprep.mubr.msk.bf16.mxu1 %vm4287_vm10, %v2643_v25  ;;  %v2631_v5 = vmul.f32 0.1, %v2611_v23  ;;  %vm2623_vm11 = vcmp.gt.f32.partialorder %v2611_v23, 0.0 }
 0x51e   : > { %v2613_v14 = vpop.f32.mrf.mxu0 }
 0x51f   : > { %v2614_v33 = vadd.f32 %v2942_v32, %v2613_v14  ;;  %v2639_v56 = vsel %vm2623_vm11, %v2611_v23, %v2631_v5 }
 0x520   : > { %v2615_v54 = vpop.f32.mrf.mxu0 }
 0x521   : > { %vm2624_vm7 = vcmp.gt.f32.partialorder %v2614_v33, 0.0  ;;  %v2632_v7 = vmul.f32 0.1, %v2614_v33 }
 0x523   : > { %v2640_v45 = vsel %vm2624_vm7, %v2614_v33, %v2632_v7 }
 0x524   : > { %v2644_v11 = vpack.c.bf16 %v2640_v45, %v2639_v56 }
 0x526   : > { %3042 = vmatmul.mubr.msk.bf16.gmra.mxu1 %vm4288_vm9, %v2644_v11 }
 0x5ca   : > { %v3039_v47 = vpop.f32.mrf.mxu1 }
 0x5cb   : > { %v2718_v9 = vadd.f32 %v3039_v47, %v2956_v13 }
 0x5cc   : > { %v2709_v27 = vpop.f32.mrf.mxu1 }
 0x5cd   : > { %2742 = vst [vmem:[%s386_s26 + $0x10] sm:$0xff] %v2718_v9  ;;  %v2710_v52 = vadd.f32 %v2956_v13, %v2709_v27 }
 0x5ce   : > { %v3040_v50 = vpop.f32.mrf.mxu1 }
 0x5cf   : > { %2740 = vst [vmem:[%s386_s26] sm:$0xff] %v2710_v52  ;;  %v2721_v31 = vadd.f32 %v3040_v50, %v2956_v13 }
 0x5d0   : > { %v2712_v29 = vpop.f32.mrf.mxu1 }
 0x5d1   : > { %2743 = vst [vmem:[%s386_s26 + $0x18] sm:$0xff] %v2721_v31  ;;  %v2713_v30 = vadd.f32 %v2956_v13, %v2712_v29 }
 0x5d3   : > { %2741 = vst [vmem:[%s386_s26 + $0x8] sm:$0xff] %v2713_v30 }
 0x5e6   : > { %v3043_v55 = vpop.f32.mrf.mxu1 }
 0x5e7   : > { %v2734_v44 = vadd.f32 %v3043_v55, %v2956_v13 }
 0x5e8   : > { %v2725_v0 = vpop.f32.mrf.mxu1 }
 0x5e9   : > { %2746 = vst [vmem:[%s386_s26 + $0x30] sm:$0xff] %v2734_v44  ;;  %v2726_v38 = vadd.f32 %v2956_v13, %v2725_v0 }
 0x5ea   : > { %v3044_v41 = vpop.f32.mrf.mxu1 }
 0x5eb   : > { %2744 = vst [vmem:[%s386_s26 + $0x20] sm:$0xff] %v2726_v38  ;;  %v2737_v20 = vadd.f32 %v3044_v41, %v2956_v13 }
 0x5ec   : > { %v2728_v35 = vpop.f32.mrf.mxu1 }
 0x5ed   : > { %2747 = vst [vmem:[%s386_s26 + $0x38] sm:$0xff] %v2737_v20  ;;  %v2729_v17 = vadd.f32 %v2956_v13, %v2728_v35 }
 0x5ef   : > { %2745 = vst [vmem:[%s386_s26 + $0x28] sm:$0xff] %v2729_v17 }
 0x5f0 PF: > { %s21_s17 = sadd.s32 1, %s3144_s17  }
 0x5f1   : > { %p18_p4 = scmp.ge.s32.totalorder %s21_s17, 4  }
 0x5f3   :  { %20 = sbr.rel (!%p18_p4) target bundleno = 1 (0x1), region = 94 }

</bundles_post_ra>
